<compile_context>
chip_gen: v6e
topology: v6e:2x2x1
jax: 0.10.0
libtpu: 0.0.40
codegen_flags: <defaults>
</compile_context>

<pallas_src>
import functools
import math

import jax
import jax.numpy as jnp
from jax import lax
from jax.experimental import pallas as pl
from jax.experimental.pallas import tpu as pltpu


LANE = 128   # TPU lane width: hidden / class dims padded to this for lane-dense layout
TM = 256     # node-row tile (multiple of 8; 256 fills v6e/v7x MXU rows)
TK = 256     # A_hat column (reduction) tile; bounds VMEM independent of N


# ----------------------------- kernels -----------------------------

def layer1_kernel(a_ref, x_ref, w1_ref, b1_ref, h_ref, acc_ref):
    """h_tile = relu((A_hat_tile @ X) @ W1 + b1), K-tiled accumulation over A_hat columns."""
    k = pl.program_id(1)

    @pl.when(k == 0)
    def _():
        acc_ref[...] = jnp.zeros_like(acc_ref)

    # Accumulate the aggregation into the narrow (TM, f_in) f32 scratch (bf16 MXU operands).
    acc_ref[...] += jnp.dot(a_ref[...], x_ref[...],
                            preferred_element_type=jnp.float32)

    @pl.when(k == pl.num_programs(1) - 1)
    def _():
        # Tiny per-row-tile projection, kept in f32 (free accuracy; MXU has ample slack).
        h = jnp.dot(acc_ref[...], w1_ref[...],
                    preferred_element_type=jnp.float32) + b1_ref[...]
        # TODO(synk): F.dropout(p=0.5, training=True) is stochastic; kernel runs the
        # eval-mode (identity) path. Training parity would use pltpu.prng_seed/prng_random_bits.
        h_ref[...] = jnp.maximum(h, 0.0).astype(h_ref.dtype)


def layer2_kernel(a_ref, h_ref, w2_ref, b2_ref, out_ref, acc_ref, *, num_classes):
    """out_tile = log_softmax((A_hat_tile @ h) @ W2 + b2) over the valid class columns."""
    k = pl.program_id(1)

    @pl.when(k == 0)
    def _():
        acc_ref[...] = jnp.zeros_like(acc_ref)

    acc_ref[...] += jnp.dot(a_ref[...], h_ref[...],
                            preferred_element_type=jnp.float32)

    @pl.when(k == pl.num_programs(1) - 1)
    def _():
        logits = jnp.dot(acc_ref[...], w2_ref[...],
                         preferred_element_type=jnp.float32) + b2_ref[...]
        # Mask the zero-padded class lanes so they don't perturb the softmax reduction.
        col = lax.broadcasted_iota(jnp.int32, logits.shape, 1)
        logits = jnp.where(col < num_classes, logits, jnp.float32(-1e30))
        m = jnp.max(logits, axis=1, keepdims=True)
        z = logits - m
        lse = jnp.log(jnp.sum(jnp.exp(z), axis=1, keepdims=True))
        out_ref[...] = z - lse


# ----------------------------- wrappers -----------------------------

def _round_up(v, m):
    return -(-v // m) * m


def _pad2d(x, shape, dtype):
    pads = [(0, t - s) for s, t in zip(x.shape, shape)]
    return jnp.pad(x, pads).astype(dtype)


def prepare_gcn_inputs(a_hat, x, w1, b1, w2, b2, *, tm=TM, tk=TK):
    """One-time (cached) prep: pad to tile multiples, cast A_hat/X to bf16, pad weights.

    Kept out of the per-forward path so the forward never re-pads or re-casts the
    O(N^2) adjacency (that cast alone was ~1.5x the kernels' A_hat HBM traffic).
    Zero-padded rows/cols of A_hat are inert and the padded output rows are sliced away.
    """
    n, f_in = x.shape
    hidden = w1.shape[1]
    num_classes = w2.shape[1]

    n_pad = _round_up(n, math.lcm(tm, tk))
    h_pad = _round_up(max(hidden, 1), LANE)
    c_pad = _round_up(max(num_classes, 1), LANE)

    a_bf = _pad2d(a_hat, (n_pad, n_pad), jnp.bfloat16)   # dominant N^2 operand: bf16 once
    x_bf = _pad2d(x, (n_pad, f_in), jnp.bfloat16)
    w1_p = _pad2d(w1, (f_in, h_pad), jnp.float32)        # tiny projections stay f32
    b1_p = _pad2d(b1, (1, h_pad), jnp.float32)
    w2_p = _pad2d(w2, (h_pad, c_pad), jnp.float32)
    b2_p = _pad2d(b2, (1, c_pad), jnp.float32)
    return a_bf, x_bf, w1_p, b1_p, w2_p, b2_p


@functools.partial(jax.jit, static_argnames=("num_classes", "tm", "tk"))
def gcn_forward(a_bf, x_bf, w1_p, b1_p, w2_p, b2_p, *, num_classes, tm=TM, tk=TK):
    """Padded forward pass: returns (n_pad, c_pad) f32 log-probs; caller slices to (N, C)."""
    n_pad = a_bf.shape[0]
    f_in = x_bf.shape[1]
    h_pad = w1_p.shape[1]
    c_pad = w2_p.shape[1]

    grid = (n_pad // tm, n_pad // tk)
    params = pltpu.CompilerParams(
        dimension_semantics=("parallel", "arbitrary"))  # rows shard across TCs, K reduces

    # (1) h = relu((A_hat @ X) @ W1 + b1)
    h = pl.pallas_call(
        layer1_kernel,
        out_shape=jax.ShapeDtypeStruct((n_pad, h_pad), jnp.bfloat16),
        grid=grid,
        in_specs=[
            pl.BlockSpec((tm, tk), lambda i, k: (i, k)),        # A_hat row/col tile (bf16)
            pl.BlockSpec((tk, f_in), lambda i, k: (k, 0)),      # X K-tile (bf16)
            pl.BlockSpec((f_in, h_pad), lambda i, k: (0, 0)),   # W1 (f32)
            pl.BlockSpec((1, h_pad), lambda i, k: (0, 0)),      # b1 (f32)
        ],
        out_specs=pl.BlockSpec((tm, h_pad), lambda i, k: (i, 0)),
        scratch_shapes=[pltpu.VMEM((tm, f_in), jnp.float32)],   # narrow f32 accumulator
        compiler_params=params,
    )(a_bf, x_bf, w1_p, b1_p)

    # (2) out = log_softmax((A_hat @ h) @ W2 + b2)
    out_pad = pl.pallas_call(
        functools.partial(layer2_kernel, num_classes=num_classes),
        out_shape=jax.ShapeDtypeStruct((n_pad, c_pad), jnp.float32),
        grid=grid,
        in_specs=[
            pl.BlockSpec((tm, tk), lambda i, k: (i, k)),        # A_hat row/col tile (bf16)
            pl.BlockSpec((tk, h_pad), lambda i, k: (k, 0)),     # h K-tile (bf16)
            pl.BlockSpec((h_pad, c_pad), lambda i, k: (0, 0)),  # W2 (f32)
            pl.BlockSpec((1, c_pad), lambda i, k: (0, 0)),      # b2 (f32)
        ],
        out_specs=pl.BlockSpec((tm, c_pad), lambda i, k: (i, 0)),
        scratch_shapes=[pltpu.VMEM((tm, h_pad), jnp.float32)],
        compiler_params=params,
    )(a_bf, h, w2_p, b2_p)

    return out_pad


def build_normalized_adjacency(edge_index, num_nodes):
    """Dense A_hat = D^{-1/2} (A + I) D^{-1/2}  (GCNConv gcn_norm, edge_weight=1)."""
    src, dst = edge_index[0], edge_index[1]
    loop = jnp.arange(num_nodes, dtype=src.dtype)
    src = jnp.concatenate([src, loop])
    dst = jnp.concatenate([dst, loop])
    w = jnp.ones_like(src, dtype=jnp.float32)
    a = jnp.zeros((num_nodes, num_nodes), jnp.float32).at[dst, src].add(w)
    deg = jnp.sum(a, axis=1)
    dinv = jnp.where(deg > 0, 1.0 / jnp.sqrt(deg), 0.0)
    return dinv[:, None] * a * dinv[None, :]


if __name__ == "__main__":
    key = jax.random.PRNGKey(0)
    k_x, k_e, k_w1, k_w2 = jax.random.split(key, 4)

    # small synthetic "Planetoid-like" graph; N deliberately NOT a tile multiple
    N = 300          # nodes (pads to 512 = 2 row tiles x 2 K tiles)
    F_IN = 32        # input feature dim (data.x.shape[1])
    HIDDEN = 16      # GCNConv hidden size (from module __init__)
    C = 8            # num_classes
    E = 2000         # edges

    x = jax.random.normal(k_x, (N, F_IN), jnp.float32)
    edge_index = jax.random.randint(k_e, (2, E), 0, N, dtype=jnp.int32)
    a_hat = build_normalized_adjacency(edge_index, N)

    def glorot(k, shape):
        limit = jnp.sqrt(6.0 / (shape[0] + shape[1]))
        return jax.random.uniform(k, shape, jnp.float32, -limit, limit)

    w1 = glorot(k_w1, (F_IN, HIDDEN))
    b1 = jnp.zeros((1, HIDDEN), jnp.float32)
    w2 = glorot(k_w2, (HIDDEN, C))
    b2 = jnp.zeros((1, C), jnp.float32)

    # one-time cached prep (padding + bf16 cast of A_hat/X), then the jitted forward
    prepared = prepare_gcn_inputs(a_hat, x, w1, b1, w2, b2)
    out_pad = gcn_forward(*prepared, num_classes=C)
    out_pad = jax.block_until_ready(out_pad)
    out = out_pad[:N, :C]

    # sanity check against pure-f32 JAX reference (kernels use bf16 A_hat/X/h operands
    # with f32 accumulation, so tolerance is at the bf16 level)
    h_ref = jnp.maximum(a_hat @ (x @ w1) + b1, 0.0)
    z_ref = a_hat @ (h_ref @ w2) + b2
    ref = jax.nn.log_softmax(z_ref, axis=1)
    assert out.shape == (N, C)
    max_err = float(jnp.max(jnp.abs(out - ref)))
    assert max_err < 5e-2, f"max abs err {max_err}"

    print("KERNEL_OK")
</pallas_src>

<mosaic_0001>
module attributes {stable_mosaic.version = 11 : i64} {
  func.func @layer2_kernel(%arg0: i32, %arg1: i32, %arg2: memref<256x256xbf16, #tpu.memory_space<vmem>>, %arg3: memref<256x128xbf16, #tpu.memory_space<vmem>>, %arg4: memref<128x128xf32, #tpu.memory_space<vmem>>, %arg5: memref<1x128xf32, #tpu.memory_space<vmem>>, %arg6: memref<256x128xf32, #tpu.memory_space<vmem>>, %arg7: memref<256x128xf32, #tpu.memory_space<vmem>>) attributes {dimension_semantics = [#tpu.dimension_semantics<parallel>, #tpu.dimension_semantics<arbitrary>], iteration_bounds = array<i64: 2, 2>, scalar_prefetch = 0 : i64, scratch_operands = 1 : i64, tpu.core_type = #tpu.core_type<tc>, window_params = [{transform_indices = @transform_0, window_bounds = array<i64: 256, 256>}, {transform_indices = @transform_1, window_bounds = array<i64: 256, 128>}, {pipeline_mode = #tpu.pipeline_mode<synchronous>, transform_indices = @transform_2, window_bounds = array<i64: 128, 128>}, {pipeline_mode = #tpu.pipeline_mode<synchronous>, transform_indices = @transform_3, window_bounds = array<i64: 1, 128>}, {transform_indices = @transform_4, window_bounds = array<i64: 256, 128>}]} {
    %c0_i32 = arith.constant 0 : i32
    %0 = arith.cmpi eq, %arg1, %c0_i32 : i32
    %1 = arith.extui %0 : i1 to i32
    %c0_i32_0 = arith.constant 0 : i32
    %2 = arith.cmpi ne, %1, %c0_i32_0 : i32
    scf.if %2 {
      %cst_9 = arith.constant 0.000000e+00 : f32
      %12 = vector.broadcast %cst_9 : f32 to vector<256x128xf32>
      %c0_10 = arith.constant 0 : index
      %c0_11 = arith.constant 0 : index
      %13 = vector.load %arg7[%c0_10, %c0_11] : memref<256x128xf32, #tpu.memory_space<vmem>>, vector<256x128xf32>
      tpu.vector_store %arg7[%c0_10, %c0_11], %12 {strides = array<i32>} : memref<256x128xf32, #tpu.memory_space<vmem>>, vector<256x128xf32>,
    } else {
    }
    %c0 = arith.constant 0 : index
    %c0_1 = arith.constant 0 : index
    %3 = vector.load %arg7[%c0, %c0_1] : memref<256x128xf32, #tpu.memory_space<vmem>>, vector<256x128xf32>
    %c0_2 = arith.constant 0 : index
    %c0_3 = arith.constant 0 : index
    %4 = vector.load %arg2[%c0_2, %c0_3] : memref<256x256xbf16, #tpu.memory_space<vmem>>, vector<256x256xbf16>
    %c0_4 = arith.constant 0 : index
    %c0_5 = arith.constant 0 : index
    %5 = vector.load %arg3[%c0_4, %c0_5] : memref<256x128xbf16, #tpu.memory_space<vmem>>, vector<256x128xbf16>
    %cst = arith.constant dense<0.000000e+00> : vector<256x128xf32>
    %6 = tpu.matmul %4, %5, %cst {dimension_numbers = #tpu.dot_dimension_numbers<[1], [0], [0], [1], [0, 0, 1, 1], [], []>} : vector<256x256xbf16>, vector<256x128xbf16>, vector<256x128xf32> -> vector<256x128xf32>
    %7 = arith.addf %3, %6 : vector<256x128xf32>
    %c0_6 = arith.constant 0 : index
    %c0_7 = arith.constant 0 : index
    %8 = vector.load %arg7[%c0_6, %c0_7] : memref<256x128xf32, #tpu.memory_space<vmem>>, vector<256x128xf32>
    tpu.vector_store %arg7[%c0_6, %c0_7], %7 {strides = array<i32>} : memref<256x128xf32, #tpu.memory_space<vmem>>, vector<256x128xf32>,
    %c1_i32 = arith.constant 1 : i32
    %9 = arith.cmpi eq, %arg1, %c1_i32 : i32
    %10 = arith.extui %9 : i1 to i32
    %c0_i32_8 = arith.constant 0 : i32
    %11 = arith.cmpi ne, %10, %c0_i32_8 : i32
    scf.if %11 {
      %c0_9 = arith.constant 0 : index
      %c0_10 = arith.constant 0 : index
      %12 = vector.load %arg7[%c0_9, %c0_10] : memref<256x128xf32, #tpu.memory_space<vmem>>, vector<256x128xf32>
      %c0_11 = arith.constant 0 : index
      %c0_12 = arith.constant 0 : index
      %13 = vector.load %arg4[%c0_11, %c0_12] : memref<128x128xf32, #tpu.memory_space<vmem>>, vector<128x128xf32>
      %cst_13 = arith.constant dense<0.000000e+00> : vector<256x128xf32>
      %14 = tpu.matmul %12, %13, %cst_13 {dimension_numbers = #tpu.dot_dimension_numbers<[1], [0], [0], [1], [0, 0, 1, 1], [], []>} : vector<256x128xf32>, vector<128x128xf32>, vector<256x128xf32> -> vector<256x128xf32>
      %c0_14 = arith.constant 0 : index
      %c0_15 = arith.constant 0 : index
      %15 = vector.load %arg5[%c0_14, %c0_15] : memref<1x128xf32, #tpu.memory_space<vmem>>, vector<1x128xf32>
      %16 = vector.broadcast %15 : vector<1x128xf32> to vector<256x128xf32>
      %17 = arith.addf %14, %16 : vector<256x128xf32>
      %18 = tpu.iota {dimensions = array<i32: 1>} : vector<256x128xi32>
      %c8_i32 = arith.constant 8 : i32
      %19 = vector.broadcast %c8_i32 : i32 to vector<256x128xi32>
      %20 = arith.cmpi slt, %18, %19 : vector<256x128xi32>
      %cst_16 = arith.constant -1.000000e+30 : f32
      %21 = vector.broadcast %cst_16 : f32 to vector<256x128xf32>
      %22 = arith.select %20, %17, %21 : vector<256x128xi1>, vector<256x128xf32>
      %cst_17 = arith.constant dense<0xFF800000> : vector<256xf32>
      %23 = vector.multi_reduction <maximumf>, %22, %cst_17 [1] : vector<256x128xf32> to vector<256xf32>
      %24 = vector.shape_cast %23 : vector<256xf32> to vector<256x1xf32>
      %25 = vector.broadcast %24 : vector<256x1xf32> to vector<256x128xf32>
      %26 = arith.subf %22, %25 : vector<256x128xf32>
      %27 = math.exp %26 : vector<256x128xf32>
      %cst_18 = arith.constant dense<0.000000e+00> : vector<256xf32>
      %28 = vector.multi_reduction <add>, %27, %cst_18 [1] : vector<256x128xf32> to vector<256xf32>
      %29 = vector.shape_cast %28 : vector<256xf32> to vector<256x1xf32>
      %30 = math.log %29 : vector<256x1xf32>
      %31 = vector.broadcast %30 : vector<256x1xf32> to vector<256x128xf32>
      %32 = arith.subf %26, %31 : vector<256x128xf32>
      %c0_19 = arith.constant 0 : index
      %c0_20 = arith.constant 0 : index
      %33 = vector.load %arg6[%c0_19, %c0_20] : memref<256x128xf32, #tpu.memory_space<vmem>>, vector<256x128xf32>
      tpu.vector_store %arg6[%c0_19, %c0_20], %32 {strides = array<i32>} : memref<256x128xf32, #tpu.memory_space<vmem>>, vector<256x128xf32>,
    } else {
    }
    return
  }
  func.func @transform_0(%arg0: i32, %arg1: i32) -> (i32, i32) {
    %c0_i32 = arith.constant 0 : i32
    return %arg0, %arg1 : i32, i32
  }
  func.func @transform_1(%arg0: i32, %arg1: i32) -> (i32, i32) {
    %c0_i32 = arith.constant 0 : i32
    %c0_i32_0 = arith.constant 0 : i32
    return %arg1, %c0_i32 : i32, i32
  }
  func.func @transform_2(%arg0: i32, %arg1: i32) -> (i32, i32) {
    %c0_i32 = arith.constant 0 : i32
    %c0_i32_0 = arith.constant 0 : i32
    %c0_i32_1 = arith.constant 0 : i32
    return %c0_i32, %c0_i32_0 : i32, i32
  }
  func.func @transform_3(%arg0: i32, %arg1: i32) -> (i32, i32) {
    %c0_i32 = arith.constant 0 : i32
    %c0_i32_0 = arith.constant 0 : i32
    %c0_i32_1 = arith.constant 0 : i32
    return %c0_i32, %c0_i32_0 : i32, i32
  }
  func.func @transform_4(%arg0: i32, %arg1: i32) -> (i32, i32) {
    %c0_i32 = arith.constant 0 : i32
    %c0_i32_0 = arith.constant 0 : i32
    return %arg0, %c0_i32 : i32, i32
  }
}

module attributes {stable_mosaic.version = 11 : i64} {
  func.func @layer1_kernel(%arg0: i32, %arg1: i32, %arg2: memref<256x256xbf16, #tpu.memory_space<vmem>>, %arg3: memref<256x32xbf16, #tpu.memory_space<vmem>>, %arg4: memref<32x128xf32, #tpu.memory_space<vmem>>, %arg5: memref<1x128xf32, #tpu.memory_space<vmem>>, %arg6: memref<256x128xbf16, #tpu.memory_space<vmem>>, %arg7: memref<256x32xf32, #tpu.memory_space<vmem>>) attributes {dimension_semantics = [#tpu.dimension_semantics<parallel>, #tpu.dimension_semantics<arbitrary>], iteration_bounds = array<i64: 2, 2>, scalar_prefetch = 0 : i64, scratch_operands = 1 : i64, tpu.core_type = #tpu.core_type<tc>, window_params = [{transform_indices = @transform_0, window_bounds = array<i64: 256, 256>}, {transform_indices = @transform_1, window_bounds = array<i64: 256, 32>}, {pipeline_mode = #tpu.pipeline_mode<synchronous>, transform_indices = @transform_2, window_bounds = array<i64: 32, 128>}, {pipeline_mode = #tpu.pipeline_mode<synchronous>, transform_indices = @transform_3, window_bounds = array<i64: 1, 128>}, {transform_indices = @transform_4, window_bounds = array<i64: 256, 128>}]} {
    %c0_i32 = arith.constant 0 : i32
    %0 = arith.cmpi eq, %arg1, %c0_i32 : i32
    %1 = arith.extui %0 : i1 to i32
    %c0_i32_0 = arith.constant 0 : i32
    %2 = arith.cmpi ne, %1, %c0_i32_0 : i32
    scf.if %2 {
      %cst_9 = arith.constant 0.000000e+00 : f32
      %12 = vector.broadcast %cst_9 : f32 to vector<256x32xf32>
      %c0_10 = arith.constant 0 : index
      %c0_11 = arith.constant 0 : index
      %13 = vector.load %arg7[%c0_10, %c0_11] : memref<256x32xf32, #tpu.memory_space<vmem>>, vector<256x32xf32>
      tpu.vector_store %arg7[%c0_10, %c0_11], %12 {strides = array<i32>} : memref<256x32xf32, #tpu.memory_space<vmem>>, vector<256x32xf32>,
    } else {
    }
    %c0 = arith.constant 0 : index
    %c0_1 = arith.constant 0 : index
    %3 = vector.load %arg7[%c0, %c0_1] : memref<256x32xf32, #tpu.memory_space<vmem>>, vector<256x32xf32>
    %c0_2 = arith.constant 0 : index
    %c0_3 = arith.constant 0 : index
    %4 = vector.load %arg2[%c0_2, %c0_3] : memref<256x256xbf16, #tpu.memory_space<vmem>>, vector<256x256xbf16>
    %c0_4 = arith.constant 0 : index
    %c0_5 = arith.constant 0 : index
    %5 = vector.load %arg3[%c0_4, %c0_5] : memref<256x32xbf16, #tpu.memory_space<vmem>>, vector<256x32xbf16>
    %cst = arith.constant dense<0.000000e+00> : vector<256x32xf32>
    %6 = tpu.matmul %4, %5, %cst {dimension_numbers = #tpu.dot_dimension_numbers<[1], [0], [0], [1], [0, 0, 1, 1], [], []>} : vector<256x256xbf16>, vector<256x32xbf16>, vector<256x32xf32> -> vector<256x32xf32>
    %7 = arith.addf %3, %6 : vector<256x32xf32>
    %c0_6 = arith.constant 0 : index
    %c0_7 = arith.constant 0 : index
    %8 = vector.load %arg7[%c0_6, %c0_7] : memref<256x32xf32, #tpu.memory_space<vmem>>, vector<256x32xf32>
    tpu.vector_store %arg7[%c0_6, %c0_7], %7 {strides = array<i32>} : memref<256x32xf32, #tpu.memory_space<vmem>>, vector<256x32xf32>,
    %c1_i32 = arith.constant 1 : i32
    %9 = arith.cmpi eq, %arg1, %c1_i32 : i32
    %10 = arith.extui %9 : i1 to i32
    %c0_i32_8 = arith.constant 0 : i32
    %11 = arith.cmpi ne, %10, %c0_i32_8 : i32
    scf.if %11 {
      %c0_9 = arith.constant 0 : index
      %c0_10 = arith.constant 0 : index
      %12 = vector.load %arg7[%c0_9, %c0_10] : memref<256x32xf32, #tpu.memory_space<vmem>>, vector<256x32xf32>
      %c0_11 = arith.constant 0 : index
      %c0_12 = arith.constant 0 : index
      %13 = vector.load %arg4[%c0_11, %c0_12] : memref<32x128xf32, #tpu.memory_space<vmem>>, vector<32x128xf32>
      %cst_13 = arith.constant dense<0.000000e+00> : vector<256x128xf32>
      %14 = tpu.matmul %12, %13, %cst_13 {dimension_numbers = #tpu.dot_dimension_numbers<[1], [0], [0], [1], [0, 0, 1, 1], [], []>} : vector<256x32xf32>, vector<32x128xf32>, vector<256x128xf32> -> vector<256x128xf32>
      %c0_14 = arith.constant 0 : index
      %c0_15 = arith.constant 0 : index
      %15 = vector.load %arg5[%c0_14, %c0_15] : memref<1x128xf32, #tpu.memory_space<vmem>>, vector<1x128xf32>
      %16 = vector.broadcast %15 : vector<1x128xf32> to vector<256x128xf32>
      %17 = arith.addf %14, %16 : vector<256x128xf32>
      %cst_16 = arith.constant 0.000000e+00 : f32
      %18 = vector.broadcast %cst_16 : f32 to vector<256x128xf32>
      %19 = arith.maximumf %17, %18 : vector<256x128xf32>
      %20 = arith.truncf %19 : vector<256x128xf32> to vector<256x128xbf16>
      %c0_17 = arith.constant 0 : index
      %c0_18 = arith.constant 0 : index
      %21 = vector.load %arg6[%c0_17, %c0_18] : memref<256x128xbf16, #tpu.memory_space<vmem>>, vector<256x128xbf16>
      tpu.vector_store %arg6[%c0_17, %c0_18], %20 {strides = array<i32>} : memref<256x128xbf16, #tpu.memory_space<vmem>>, vector<256x128xbf16>,
    } else {
    }
    return
  }
  func.func @transform_0(%arg0: i32, %arg1: i32) -> (i32, i32) {
    %c0_i32 = arith.constant 0 : i32
    return %arg0, %arg1 : i32, i32
  }
  func.func @transform_1(%arg0: i32, %arg1: i32) -> (i32, i32) {
    %c0_i32 = arith.constant 0 : i32
    %c0_i32_0 = arith.constant 0 : i32
    return %arg1, %c0_i32 : i32, i32
  }
  func.func @transform_2(%arg0: i32, %arg1: i32) -> (i32, i32) {
    %c0_i32 = arith.constant 0 : i32
    %c0_i32_0 = arith.constant 0 : i32
    %c0_i32_1 = arith.constant 0 : i32
    return %c0_i32, %c0_i32_0 : i32, i32
  }
  func.func @transform_3(%arg0: i32, %arg1: i32) -> (i32, i32) {
    %c0_i32 = arith.constant 0 : i32
    %c0_i32_0 = arith.constant 0 : i32
    %c0_i32_1 = arith.constant 0 : i32
    return %c0_i32, %c0_i32_0 : i32, i32
  }
  func.func @transform_4(%arg0: i32, %arg1: i32) -> (i32, i32) {
    %c0_i32 = arith.constant 0 : i32
    %c0_i32_0 = arith.constant 0 : i32
    return %arg0, %c0_i32 : i32, i32
  }
}

</mosaic_0001>

<bundles_post_ra>
// kernel: gcn_forward.3
= control target key start
LH: loop header
LB: loop body
LE: loop exit
PB: predicated region body
PF: predicated region fallthrough
CT: control target
= control target key end

     0   :  { %s3313_s0 = inlined_call_operand.vmem [shape: bf16[512,512], index: 0, kind: input, shape index: {}]   ;;  %s3314_s1 = inlined_call_operand.vmem [shape: bf16[512,128], index: 1, kind: input, shape index: {}]   ;;  %s3315_s2 = inlined_call_operand.vmem [shape: f32[128,128], index: 2, kind: input, shape index: {}]   ;;  %s3316_s3 = inlined_call_operand.vmem [shape: f32[1,128], index: 3, kind: input, shape index: {}]   ;;  %s3317_s4 = inlined_call_operand.hbm [shape: f32[512,128], index: 4, kind: output, shape index: {}]  }
   0x1   :  { %3318 = sst [smem:[#allocation7_spill]] %s3313_s0 }
   0x2   :  { %9 = vsyncpa [#allocation5], 0 }
   0x3   :  { %11 = vsyncpa [#allocation5 + $0x1], 0  ;;  %s2572_s15 = smov 0   ;;  %s2574_s16 = smov 0  }
   0x4   :  { %s2576_s17 = smov 0   ;;  %s2578_s18 = smov 0  }
   0x5   :  { %s2580_s19 = smov 0   ;;  %s2582_s20 = smov 0  }
   0x6   :  { %s2584_s21 = smov 0   ;;  %s2586_s22 = smov 0  }
   0x7   :  { %s2588_s23 = smov 0   ;;  %s2590_s24 = smov 0  }
   0x8 LB: > { %s1791_s25 = sadd.s32 4294967295, %s2541_s24   ;;  %s1792_s26 = sadd.s32 4294967294, %s2541_s24   ;;  %s2541_s24 = sphi %s2590_s24, %s17_s24   ;;  %s2537_s23 = sphi %s2588_s23, %s3331_s23   ;;  %s2533_s22 = sphi %s2586_s22, %s3330_s22   ;;  %s2529_s21 = sphi %s2584_s21, %s3329_s21   ;;  %s2525_s20 = sphi %s2582_s20, %s3328_s20   ;;  %s2521_s19 = sphi %s2580_s19, %s3327_s19   ;;  %s2517_s18 = sphi %s2578_s18, %s3326_s18   ;;  %s2513_s17 = sphi %s2576_s17, %s3325_s17   ;;  %s2509_s16 = sphi %s2574_s16, %s3324_s16   ;;  %s2505_s15 = sphi %s2572_s15, %s3323_s15  }
   0x9   : > { %s26_s27 = sadd.s32 1, %s2533_s22  ;;  %s29_s28 = sadd.s32 1, %s2537_s23 }
   0xa   : > { %p27_p0 = scmp.ge.s32.totalorder %s26_s27, 2  ;;  %s38_s29 = sadd.s32 1, %s2521_s19 }
   0xb   : > { %p45_p1 = scmp.ne.s32.totalorder %s2521_s19, %s2517_s18  ;;  %p46_p2 = scmp.eq.s32.totalorder %s2541_s24, 0 }
   0xc   : > { %s3333_s27 = smov (%p27_p0, %s26_s27), 0  ;;  %s3335_s28 = smov (!%p27_p0, %s29_s28), %s2537_s23 }
   0xd   : > { %s34_s30 = ssub.s32 %s2533_s22, %s3333_s27  ;;  %p2635_p3 = por %p46_p2, %p45_p1 }
   0xe   : > { %p31_p4 = scmp.ge.s32.totalorder %s3335_s28, 2  ;;  %s132_s6 = sadd.s32 1, %s2513_s17 }
   0xf   : > { %p142_p5 = scmp.ne.s32.totalorder %s2513_s17, %s2509_s16  ;;  %p143_p6 = scmp.eq.s32.totalorder %s1791_s25, 3 }
  0x10   : > { %s3337_s28 = smov (%p31_p4, %s3335_s28), 0  ;;  %p148_p8 = scmp.ne.s32.totalorder %s2509_s16, %s2505_s15 }
  0x11   : > { %p2644_p7 = por %p143_p6, %p142_p5  ;;  %s33_s8 = ssub.s32 %s2537_s23, %s3337_s28 }
  0x12   : > { %p149_p9 = scmp.eq.s32.totalorder %s1792_s26, 3  ;;  %s35_s9 = sor.u32 %s34_s30, %s33_s8 }
  0x13   : > { %p130_p10 = scmp.eq.s32.totalorder %s33_s8, 0  ;;  %p36_p11 = scmp.eq.s32.totalorder %s35_s9, 0 }
  0x14   : > { %p2652_p12 = por %p149_p9, %p148_p8  ;;  %p1794_p13 = scmp.ge.s32.totalorder %s2541_s24, 4 }
  0x15   : > { %s2657_s11 = scalar_select %p130_p10, %s2513_s17, %s132_s6  }
  0x16   : > { %s2660_s12 = scalar_select %p36_p11, %s2521_s19, %s38_s29  }
  0x17   : > { %171 = sbr.rel (%p1794_p13) target bundleno = 54 (0x36), region = 24 }
  0x1c   : > { %174 = sbr.rel (!%p2635_p3) target bundleno = 54 (0x36), region = 28  ;;  %s176_s13 = sand.u32 (%p2635_p3), 1, %s2521_s19  }
  0x1d   : > { %s1797_s14 = sshll.u32 (%p2635_p3), %s2533_s22, 1  ;;  %s1795_s25 = sshll.u32 (%p2635_p3), %s176_s13, 8 }
  0x1e   : > { %s1861_s26 = sshll.u32 (%p2635_p3), %s2537_s23, 7  ;;  %s3322_s0 = sld [smem:[#allocation7_spill]] (%p2635_p3) }
  0x1f   : > { %s182_s30 = sadd.s32 (%p2635_p3), %s1861_s26, %s1797_s14  ;;  %s2676_s5 = scalar_lea.vmem (%p2635_p3), [#allocation3], %s1795_s25 }
  0x20   : > { %s1799_s8 = sshll.u32 (%p2635_p3), %s182_s30, 2 }
  0x24   : > { %s2671_s29 = scalar_lea.vmem %s3322_s0, %s1799_s8 }
  0x25   : > { %v275_v0 = vld [vmem:[%s2671_s29] sm:$0xff]  ;;  %v277_v1 = vld [vmem:[%s2671_s29 + $0x10] sm:$0xff] }
  0x26   : > { %v279_v2 = vld [vmem:[%s2671_s29 + $0x20] sm:$0xff]  ;;  %276 = vst [vmem:[%s2676_s5] sm:$0xff] %v275_v0  ;;  %278 = vst [vmem:[%s2676_s5 + $0x8] sm:$0xff] %v277_v1  ;;  %v281_v3 = vld [vmem:[%s2671_s29 + $0x30] sm:$0xff] }
  0x27   : > { %280 = vst [vmem:[%s2676_s5 + $0x10] sm:$0xff] %v279_v2  ;;  %v283_v4 = vld [vmem:[%s2671_s29 + $0x40] sm:$0xff]  ;;  %v285_v5 = vld [vmem:[%s2671_s29 + $0x50] sm:$0xff]  ;;  %282 = vst [vmem:[%s2676_s5 + $0x18] sm:$0xff] %v281_v3 }
  0x28   : > { %284 = vst [vmem:[%s2676_s5 + $0x20] sm:$0xff] %v283_v4  ;;  %286 = vst [vmem:[%s2676_s5 + $0x28] sm:$0xff] %v285_v5  ;;  %v287_v6 = vld [vmem:[%s2671_s29 + $0x60] sm:$0xff]  ;;  %v289_v7 = vld [vmem:[%s2671_s29 + $0x70] sm:$0xff] }
  0x29   : > { %v291_v8 = vld [vmem:[%s2671_s29 + $0x80] sm:$0xff]  ;;  %288 = vst [vmem:[%s2676_s5 + $0x30] sm:$0xff] %v287_v6  ;;  %290 = vst [vmem:[%s2676_s5 + $0x38] sm:$0xff] %v289_v7  ;;  %v293_v9 = vld [vmem:[%s2671_s29 + $0x90] sm:$0xff] }
  0x2a   : > { %292 = vst [vmem:[%s2676_s5 + $0x40] sm:$0xff] %v291_v8  ;;  %v295_v10 = vld [vmem:[%s2671_s29 + $0xa0] sm:$0xff]  ;;  %v297_v11 = vld [vmem:[%s2671_s29 + $0xb0] sm:$0xff]  ;;  %294 = vst [vmem:[%s2676_s5 + $0x48] sm:$0xff] %v293_v9 }
  0x2b   : > { %296 = vst [vmem:[%s2676_s5 + $0x50] sm:$0xff] %v295_v10  ;;  %298 = vst [vmem:[%s2676_s5 + $0x58] sm:$0xff] %v297_v11  ;;  %v299_v12 = vld [vmem:[%s2671_s29 + $0xc0] sm:$0xff]  ;;  %v301_v13 = vld [vmem:[%s2671_s29 + $0xd0] sm:$0xff] }
  0x2c   : > { %v303_v14 = vld [vmem:[%s2671_s29 + $0xe0] sm:$0xff]  ;;  %300 = vst [vmem:[%s2676_s5 + $0x60] sm:$0xff] %v299_v12  ;;  %302 = vst [vmem:[%s2676_s5 + $0x68] sm:$0xff] %v301_v13  ;;  %v305_v15 = vld [vmem:[%s2671_s29 + $0xf0] sm:$0xff] }
  0x2d   : > { %304 = vst [vmem:[%s2676_s5 + $0x70] sm:$0xff] %v303_v14  ;;  %v307_v16 = vld [vmem:[%s2671_s29 + $0x100] sm:$0xff]  ;;  %v309_v17 = vld [vmem:[%s2671_s29 + $0x110] sm:$0xff]  ;;  %306 = vst [vmem:[%s2676_s5 + $0x78] sm:$0xff] %v305_v15 }
  0x2e   : > { %308 = vst [vmem:[%s2676_s5 + $0x80] sm:$0xff] %v307_v16  ;;  %310 = vst [vmem:[%s2676_s5 + $0x88] sm:$0xff] %v309_v17  ;;  %v311_v18 = vld [vmem:[%s2671_s29 + $0x120] sm:$0xff]  ;;  %v313_v19 = vld [vmem:[%s2671_s29 + $0x130] sm:$0xff] }
  0x2f   : > { %v315_v20 = vld [vmem:[%s2671_s29 + $0x140] sm:$0xff]  ;;  %312 = vst [vmem:[%s2676_s5 + $0x90] sm:$0xff] %v311_v18  ;;  %314 = vst [vmem:[%s2676_s5 + $0x98] sm:$0xff] %v313_v19  ;;  %v317_v21 = vld [vmem:[%s2671_s29 + $0x150] sm:$0xff] }
  0x30   : > { %316 = vst [vmem:[%s2676_s5 + $0xa0] sm:$0xff] %v315_v20  ;;  %v319_v22 = vld [vmem:[%s2671_s29 + $0x160] sm:$0xff]  ;;  %v321_v23 = vld [vmem:[%s2671_s29 + $0x170] sm:$0xff]  ;;  %318 = vst [vmem:[%s2676_s5 + $0xa8] sm:$0xff] %v317_v21 }
  0x31   : > { %320 = vst [vmem:[%s2676_s5 + $0xb0] sm:$0xff] %v319_v22  ;;  %322 = vst [vmem:[%s2676_s5 + $0xb8] sm:$0xff] %v321_v23  ;;  %v323_v24 = vld [vmem:[%s2671_s29 + $0x180] sm:$0xff]  ;;  %v325_v25 = vld [vmem:[%s2671_s29 + $0x190] sm:$0xff] }
  0x32   : > { %v327_v26 = vld [vmem:[%s2671_s29 + $0x1a0] sm:$0xff]  ;;  %324 = vst [vmem:[%s2676_s5 + $0xc0] sm:$0xff] %v323_v24  ;;  %326 = vst [vmem:[%s2676_s5 + $0xc8] sm:$0xff] %v325_v25  ;;  %v329_v27 = vld [vmem:[%s2671_s29 + $0x1b0] sm:$0xff] }
  0x33   : > { %328 = vst [vmem:[%s2676_s5 + $0xd0] sm:$0xff] %v327_v26  ;;  %v331_v28 = vld [vmem:[%s2671_s29 + $0x1c0] sm:$0xff]  ;;  %v333_v29 = vld [vmem:[%s2671_s29 + $0x1d0] sm:$0xff]  ;;  %330 = vst [vmem:[%s2676_s5 + $0xd8] sm:$0xff] %v329_v27 }
  0x34   : > { %332 = vst [vmem:[%s2676_s5 + $0xe0] sm:$0xff] %v331_v28  ;;  %334 = vst [vmem:[%s2676_s5 + $0xe8] sm:$0xff] %v333_v29  ;;  %v335_v30 = vld [vmem:[%s2671_s29 + $0x1e0] sm:$0xff]  ;;  %v337_v31 = vld [vmem:[%s2671_s29 + $0x1f0] sm:$0xff] }
  0x35   : > { %336 = vst [vmem:[%s2676_s5 + $0xf0] sm:$0xff] %v335_v30  ;;  %338 = vst [vmem:[%s2676_s5 + $0xf8] sm:$0xff] %v337_v31 }
  0x36 PF: > { %p1800_p0 = scmp.ge.s32.totalorder %s2541_s24, 1  ;;  %p352_p1 = scmp.lt.s32.totalorder %s2541_s24, 5 }
  0x38   : > { %p353_p2 = pnand %p1800_p0, %p352_p1 }
  0x39   : > { %s359_s13 = sand.u32 (!%p353_p2), 1, %s2517_s18   ;;  %s386_s14 = sand.u32 (!%p353_p2), 1, %s2509_s16  }
  0x3a   : > { %356 = sbr.rel (%p353_p2) target bundleno = 1010 (0x3f2), region = 70  ;;  %s1801_s25 = sshll.u32 (!%p353_p2), %s359_s13, 8 }
  0x3b   : > { %s1802_s26 = sshll.u32 (!%p353_p2), %s386_s14, 8  ;;  %s1803_s30 = sshll.u32 (!%p353_p2), %s2525_s20, 5 }
  0x3c   : > { %p392_p3 = scmp.lt.s32.totalorder (!%p353_p2), %s1803_s30, 63  ;;  %s2751_s5 = scalar_lea.vmem (!%p353_p2), [#allocation3], %s1801_s25 }
  0x3d   : > { %s2753_s0 = scalar_lea.vmem (!%p353_p2), [#allocation4], %s1802_s26  ;;  %p1805_p4 = scmp.ne.s32.totalorder (!%p353_p2), %s2525_s20, 0 }
  0x3f   : > { %s3339_s30 = smov (!%p392_p3, %s1803_s30), 63  ;;  %402 = sbr.rel (%p1805_p4) target bundleno = 85 (0x55), region = 78 }
  0x40   : > { %s1804_s8 = sshll.u32 %s3339_s30, 2 }
  0x41   : > { %s2749_s29 = scalar_lea.vmem %s3314_s1, %s1804_s8 }
  0x44   : > { %v2543_v32 = vmov 0.0  }
  0x45   : > { %403 = vst [vmem:[#allocation2 + $0xb0] sm:$0xff] %v2543_v32  ;;  %404 = vst [vmem:[#allocation2] sm:$0xff] %v2543_v32 }
  0x46   : > { %405 = vst [vmem:[#allocation2 + $0xd8] sm:$0xff] %v2543_v32  ;;  %406 = vst [vmem:[#allocation2 + $0x18] sm:$0xff] %v2543_v32 }
  0x47   : > { %407 = vst [vmem:[#allocation2 + $0x50] sm:$0xff] %v2543_v32  ;;  %408 = vst [vmem:[#allocation2 + $0x68] sm:$0xff] %v2543_v32 }
  0x48   : > { %409 = vst [vmem:[#allocation2 + $0x30] sm:$0xff] %v2543_v32  ;;  %410 = vst [vmem:[#allocation2 + $0x48] sm:$0xff] %v2543_v32 }
  0x49   : > { %411 = vst [vmem:[#allocation2 + $0x80] sm:$0xff] %v2543_v32  ;;  %412 = vst [vmem:[#allocation2 + $0x88] sm:$0xff] %v2543_v32 }
  0x4a   : > { %413 = vst [vmem:[#allocation2 + $0xe8] sm:$0xff] %v2543_v32  ;;  %414 = vst [vmem:[#allocation2 + $0xb8] sm:$0xff] %v2543_v32 }
  0x4b   : > { %415 = vst [vmem:[#allocation2 + $0x60] sm:$0xff] %v2543_v32  ;;  %416 = vst [vmem:[#allocation2 + $0xf0] sm:$0xff] %v2543_v32 }
  0x4c   : > { %417 = vst [vmem:[#allocation2 + $0x8] sm:$0xff] %v2543_v32  ;;  %418 = vst [vmem:[#allocation2 + $0x78] sm:$0xff] %v2543_v32 }
  0x4d   : > { %419 = vst [vmem:[#allocation2 + $0x38] sm:$0xff] %v2543_v32  ;;  %420 = vst [vmem:[#allocation2 + $0x58] sm:$0xff] %v2543_v32 }
  0x4e   : > { %421 = vst [vmem:[#allocation2 + $0x40] sm:$0xff] %v2543_v32  ;;  %422 = vst [vmem:[#allocation2 + $0xc8] sm:$0xff] %v2543_v32 }
  0x4f   : > { %423 = vst [vmem:[#allocation2 + $0xe0] sm:$0xff] %v2543_v32  ;;  %424 = vst [vmem:[#allocation2 + $0x90] sm:$0xff] %v2543_v32 }
  0x50   : > { %425 = vst [vmem:[#allocation2 + $0x70] sm:$0xff] %v2543_v32  ;;  %426 = vst [vmem:[#allocation2 + $0xc0] sm:$0xff] %v2543_v32 }
  0x51   : > { %427 = vst [vmem:[#allocation2 + $0xa8] sm:$0xff] %v2543_v32  ;;  %428 = vst [vmem:[#allocation2 + $0xd0] sm:$0xff] %v2543_v32 }
  0x52   : > { %429 = vst [vmem:[#allocation2 + $0x10] sm:$0xff] %v2543_v32  ;;  %430 = vst [vmem:[#allocation2 + $0x28] sm:$0xff] %v2543_v32 }
  0x53   : > { %431 = vst [vmem:[#allocation2 + $0xa0] sm:$0xff] %v2543_v32  ;;  %432 = vst [vmem:[#allocation2 + $0xf8] sm:$0xff] %v2543_v32 }
  0x54   : > { %433 = vst [vmem:[#allocation2 + $0x20] sm:$0xff] %v2543_v32  ;;  %434 = vst [vmem:[#allocation2 + $0x98] sm:$0xff] %v2543_v32 }
  0x55 PF: > { %v2241_v33 = vld [vmem:[%s2749_s29 + $0x78] sm:$0xff]   ;;  %v2243_v35 = vld [vmem:[%s2749_s29 + $0x70] sm:$0xff]   ;;  %v2245_v37 = vld [vmem:[%s2749_s29 + $0x68] sm:$0xff]   ;;  %p1854_p5 = scmp.ne.s32.totalorder %s2525_s20, 1 }
  0x56   : > { %v2242_v34 = vld [vmem:[%s2749_s29 + $0x38] sm:$0xff]   ;;  %1863 = vmatprep.subr.bf16.mxu0 %v2241_v33  ;;  %2103 = vmatprep.subr.bf16.mxu1 %v2241_v33  ;;  %v2244_v36 = vld [vmem:[%s2749_s29 + $0x30] sm:$0xff]   ;;  %v2246_v38 = vld [vmem:[%s2749_s29 + $0x28] sm:$0xff]  }
  0x57   : > { %1864 = vmatpush3.bf16.msra.mxu0 %v2242_v34  ;;  %2111 = vmatpush3.bf16.msra.mxu1 %v2242_v34  ;;  %v2247_v39 = vld [vmem:[%s2749_s29 + $0x60] sm:$0xff]   ;;  %v2249_v41 = vld [vmem:[%s2749_s29 + $0x58] sm:$0xff]   ;;  %v2251_v43 = vld [vmem:[%s2749_s29 + $0x50] sm:$0xff]  }
  0x58   : > { %1865 = vmatprep.subr.bf16.mxu0 %v2243_v35  ;;  %2104 = vmatprep.subr.bf16.mxu1 %v2243_v35  ;;  %v2248_v40 = vld [vmem:[%s2749_s29 + $0x20] sm:$0xff]   ;;  %v2250_v42 = vld [vmem:[%s2749_s29 + $0x18] sm:$0xff]   ;;  %v2252_v46 = vld [vmem:[%s2749_s29 + $0x10] sm:$0xff]  }
  0x59   : > { %v2259_v44 = vld [vmem:[%s2751_s5 + $0x4] ss:$8 sps:$4 sm:$0xff]   ;;  %v2257_v51 = vld [vmem:[%s2751_s5] ss:$8 sps:$4 sm:$0xff]   ;;  %v2263_v53 = vld [vmem:[%s2751_s5 + $0x14] ss:$8 sps:$4 sm:$0xff]  }
  0x5a   : > { %v2262_v45 = vld [vmem:[%s2751_s5 + $0x84] ss:$8 sps:$4 sm:$0xff]   ;;  %819 = vmatprep.mubr.bf16.mxu0 %v2259_v44  ;;  %v2260_v52 = vld [vmem:[%s2751_s5 + $0x80] ss:$8 sps:$4 sm:$0xff]   ;;  %v2265_v54 = vld [vmem:[%s2751_s5 + $0x94] ss:$8 sps:$4 sm:$0xff]  }
  0x5b   : > { %1866 = vmatpush3.bf16.msra.mxu0 %v2244_v36  ;;  %2112 = vmatpush3.bf16.msra.mxu1 %v2244_v36  ;;  %v2253_v47 = vld [vmem:[%s2749_s29 + $0x48] sm:$0xff]   ;;  %v2255_v49 = vld [vmem:[%s2749_s29 + $0x40] sm:$0xff]   ;;  %v2267_v55 = vld [vmem:[%s2751_s5 + $0x10] ss:$8 sps:$4 sm:$0xff]  }
  0x5c   : > { %1867 = vmatprep.subr.bf16.mxu0 %v2245_v37  ;;  %2105 = vmatprep.subr.bf16.mxu1 %v2245_v37  ;;  %v2254_v48 = vld [vmem:[%s2749_s29 + $0x8] sm:$0xff]   ;;  %v2256_v50 = vld [vmem:[%s2749_s29] sm:$0xff]   ;;  %v2268_v56 = vld [vmem:[%s2751_s5 + $0x90] ss:$8 sps:$4 sm:$0xff]  }
  0x5d   : > { %883 = vmatprep.mubr.bf16.mxu1 %v2262_v45  ;;  %v2269_v57 = vld [vmem:[%s2751_s5 + $0x24] ss:$8 sps:$4 sm:$0xff]   ;;  %v2273_v59 = vld [vmem:[%s2751_s5 + $0x20] ss:$8 sps:$4 sm:$0xff]   ;;  %v2275_v61 = vld [vmem:[%s2751_s5 + $0x34] ss:$8 sps:$4 sm:$0xff]  }
  0x5e   : > { %v2271_v58 = vld [vmem:[%s2751_s5 + $0xa4] ss:$8 sps:$4 sm:$0xff]   ;;  %v2274_v60 = vld [vmem:[%s2751_s5 + $0xa0] ss:$8 sps:$4 sm:$0xff]   ;;  %v2277_v62 = vld [vmem:[%s2751_s5 + $0xb4] ss:$8 sps:$4 sm:$0xff]  }
  0x5f   : > { %1868 = vmatpush3.bf16.msra.mxu0 %v2246_v38  ;;  %2113 = vmatpush3.bf16.msra.mxu1 %v2246_v38  ;;  %v2279_v63 = vld [vmem:[%s2751_s5 + $0x30] ss:$8 sps:$4 sm:$0xff]   ;;  %v2281_v1 = vld [vmem:[%s2751_s5 + $0x44] ss:$8 sps:$4 sm:$0xff]   ;;  %v2285_v3 = vld [vmem:[%s2751_s5 + $0x40] ss:$8 sps:$4 sm:$0xff]  }
  0x60   : > { %1869 = vmatprep.subr.bf16.mxu0 %v2247_v39  ;;  %2106 = vmatprep.subr.bf16.mxu1 %v2247_v39  ;;  %v2280_v0 = vld [vmem:[%s2751_s5 + $0xb0] ss:$8 sps:$4 sm:$0xff]   ;;  %v2283_v2 = vld [vmem:[%s2751_s5 + $0xc4] ss:$8 sps:$4 sm:$0xff]   ;;  %v2286_v4 = vld [vmem:[%s2751_s5 + $0xc0] ss:$8 sps:$4 sm:$0xff]  }
  0x61   : > { %v2287_v5 = vld [vmem:[%s2751_s5 + $0x54] ss:$8 sps:$4 sm:$0xff]   ;;  %v2291_v7 = vld [vmem:[%s2751_s5 + $0x50] ss:$8 sps:$4 sm:$0xff]   ;;  %v2293_v9 = vld [vmem:[%s2751_s5 + $0x64] ss:$8 sps:$4 sm:$0xff]  }
  0x62   : > { %v2289_v6 = vld [vmem:[%s2751_s5 + $0xd4] ss:$8 sps:$4 sm:$0xff]   ;;  %v2292_v8 = vld [vmem:[%s2751_s5 + $0xd0] ss:$8 sps:$4 sm:$0xff]   ;;  %v2295_v10 = vld [vmem:[%s2751_s5 + $0xe4] ss:$8 sps:$4 sm:$0xff]  }
  0x63   : > { %1870 = vmatpush3.bf16.msra.mxu0 %v2248_v40  ;;  %2114 = vmatpush3.bf16.msra.mxu1 %v2248_v40  ;;  %v2297_v11 = vld [vmem:[%s2751_s5 + $0x60] ss:$8 sps:$4 sm:$0xff]   ;;  %v2299_v13 = vld [vmem:[%s2751_s5 + $0x74] ss:$8 sps:$4 sm:$0xff]   ;;  %v2303_v15 = vld [vmem:[%s2751_s5 + $0x70] ss:$8 sps:$4 sm:$0xff]  }
  0x64   : > { %1871 = vmatprep.subr.bf16.mxu0 %v2249_v41  ;;  %2107 = vmatprep.subr.bf16.mxu1 %v2249_v41  ;;  %v2298_v12 = vld [vmem:[%s2751_s5 + $0xe0] ss:$8 sps:$4 sm:$0xff]   ;;  %v2301_v14 = vld [vmem:[%s2751_s5 + $0xf4] ss:$8 sps:$4 sm:$0xff]   ;;  %v2304_v16 = vld [vmem:[%s2751_s5 + $0xf0] ss:$8 sps:$4 sm:$0xff]  }
  0x65   : > { %v435_v19 = vld [vmem:[#allocation2 + $0xb0] sm:$0xff]  ;;  %v451_v21 = vld [vmem:[#allocation2 + $0x38] sm:$0xff]  ;;  %v436_v29 = vld [vmem:[#allocation2] sm:$0xff] }
  0x66   : > { %v452_v31 = vld [vmem:[#allocation2 + $0x58] sm:$0xff]  ;;  %v453_v41 = vld [vmem:[#allocation2 + $0x40] sm:$0xff] }
  0x67   : > { %1872 = vmatpush3.bf16.msra.mxu0 %v2250_v42  ;;  %2115 = vmatpush3.bf16.msra.mxu1 %v2250_v42  ;;  %v437_v39 = vld [vmem:[#allocation2 + $0xd8] sm:$0xff] }
  0x68   : > { %1873 = vmatprep.subr.bf16.mxu0 %v2251_v43  ;;  %2108 = vmatprep.subr.bf16.mxu1 %v2251_v43 }
  0x6b   : > { %1874 = vmatpush3.bf16.msra.mxu0 %v2252_v46  ;;  %2116 = vmatpush3.bf16.msra.mxu1 %v2252_v46 }
  0x6c   : > { %1875 = vmatprep.subr.bf16.mxu0 %v2253_v47  ;;  %2109 = vmatprep.subr.bf16.mxu1 %v2253_v47 }
  0x6f   : > { %1876 = vmatpush3.bf16.msra.mxu0 %v2254_v48  ;;  %2117 = vmatpush3.bf16.msra.mxu1 %v2254_v48 }
  0x70   : > { %1877 = vmatprep.subr.bf16.mxu0 %v2255_v49  ;;  %2110 = vmatprep.subr.bf16.mxu1 %v2255_v49  ;;  %v438_v49 = vld [vmem:[#allocation2 + $0x18] sm:$0xff] }
  0x73   : > { %1878 = vmatpush3.bf16.msra.mxu0 %v2256_v50  ;;  %2118 = vmatpush3.bf16.msra.mxu1 %v2256_v50 }
  0x76   : > { %820 = vmatmul.mubr.bf16.vlgmr.msra.gmra.mxu0 %v2257_v51  ;;  %884 = vmatmul.mubr.bf16.vlgmr.msra.gmra.mxu1 %v2260_v52  ;;  %v454_v51 = vld [vmem:[#allocation2 + $0xc8] sm:$0xff] }
  0x77   : > { %827 = vmatprep.mubr.bf16.mxu0 %v2263_v53  ;;  %891 = vmatprep.mubr.bf16.mxu1 %v2265_v54 }
  0x7e   : > { %828 = vmatmul.mubr.bf16.gmra.mxu0 %v2267_v55  ;;  %892 = vmatmul.mubr.bf16.gmra.mxu1 %v2268_v56 }
  0x7f   : > { %835 = vmatprep.mubr.bf16.mxu0 %v2269_v57  ;;  %899 = vmatprep.mubr.bf16.mxu1 %v2271_v58 }
  0x86   : > { %836 = vmatmul.mubr.bf16.gmra.mxu0 %v2273_v59  ;;  %900 = vmatmul.mubr.bf16.gmra.mxu1 %v2274_v60  ;;  %v439_v59 = vld [vmem:[#allocation2 + $0x50] sm:$0xff] }
  0x87   : > { %843 = vmatprep.mubr.bf16.mxu0 %v2275_v61  ;;  %907 = vmatprep.mubr.bf16.mxu1 %v2277_v62  ;;  %v455_v61 = vld [vmem:[#allocation2 + $0xe0] sm:$0xff] }
  0x8e   : > { %844 = vmatmul.mubr.bf16.gmra.mxu0 %v2279_v63  ;;  %908 = vmatmul.mubr.bf16.gmra.mxu1 %v2280_v0 }
  0x8f   : > { %851 = vmatprep.mubr.bf16.mxu0 %v2281_v1  ;;  %915 = vmatprep.mubr.bf16.mxu1 %v2283_v2 }
  0x96   : > { %852 = vmatmul.mubr.bf16.gmra.mxu0 %v2285_v3  ;;  %916 = vmatmul.mubr.bf16.gmra.mxu1 %v2286_v4 }
  0x97   : > { %859 = vmatprep.mubr.bf16.mxu0 %v2287_v5  ;;  %923 = vmatprep.mubr.bf16.mxu1 %v2289_v6  ;;  %v440_v5 = vld [vmem:[#allocation2 + $0x68] sm:$0xff] }
  0x9e   : > { %860 = vmatmul.mubr.bf16.gmra.mxu0 %v2291_v7  ;;  %924 = vmatmul.mubr.bf16.gmra.mxu1 %v2292_v8  ;;  %v456_v7 = vld [vmem:[#allocation2 + $0x90] sm:$0xff] }
  0x9f   : > { %867 = vmatprep.mubr.bf16.mxu0 %v2293_v9  ;;  %931 = vmatprep.mubr.bf16.mxu1 %v2295_v10 }
  0xa6   : > { %868 = vmatmul.mubr.bf16.gmra.mxu0 %v2297_v11  ;;  %932 = vmatmul.mubr.bf16.gmra.mxu1 %v2298_v12 }
  0xa7   : > { %875 = vmatprep.mubr.bf16.mxu0 %v2299_v13  ;;  %939 = vmatprep.mubr.bf16.mxu1 %v2301_v14 }
  0xae   : > { %876 = vmatmul.mubr.bf16.gmra.mxu0 %v2303_v15  ;;  %940 = vmatmul.mubr.bf16.gmra.mxu1 %v2304_v16  ;;  %v441_v15 = vld [vmem:[#allocation2 + $0x30] sm:$0xff] }
 0x136   : > { %v1879_v17 = vpop.f32.mrf.mxu0  ;;  %v1927_v18 = vpop.f32.mrf.mxu1 }
 0x138   : > { %v1880_v20 = vpop.f32.mrf.mxu0  ;;  %v1928_v22 = vpop.f32.mrf.mxu1 }
 0x139   : > { %v1881_v23 = vadd.f32 %v1880_v20, %v1879_v17  ;;  %v1929_v24 = vadd.f32 %v1928_v22, %v1927_v18  ;;  %v457_v17 = vld [vmem:[#allocation2 + $0x70] sm:$0xff] }
 0x13a   : > { %v1882_v25 = vpop.f32.mrf.mxu0  ;;  %v1930_v26 = vpop.f32.mrf.mxu1 }
 0x13b   : > { %v948_v27 = vadd.f32 %v1881_v23, %v435_v19  ;;  %v964_v28 = vadd.f32 %v1929_v24, %v451_v21 }
 0x13c   : > { %v1883_v30 = vpop.f32.mrf.mxu0  ;;  %v1931_v32 = vpop.f32.mrf.mxu1 }
 0x13d   : > { %980 = vst [vmem:[#allocation2 + $0xb0] sm:$0xff] %v948_v27  ;;  %996 = vst [vmem:[#allocation2 + $0x38] sm:$0xff] %v964_v28  ;;  %v1884_v33 = vadd.f32 %v1883_v30, %v1882_v25  ;;  %v1932_v34 = vadd.f32 %v1931_v32, %v1930_v26  ;;  %v442_v25 = vld [vmem:[#allocation2 + $0x48] sm:$0xff]  ;;  %v458_v27 = vld [vmem:[#allocation2 + $0xc0] sm:$0xff] }
 0x13e   : > { %v1885_v35 = vpop.f32.mrf.mxu0  ;;  %v1933_v36 = vpop.f32.mrf.mxu1 }
 0x13f   : > { %v949_v37 = vadd.f32 %v1884_v33, %v436_v29  ;;  %v965_v38 = vadd.f32 %v1932_v34, %v452_v31 }
 0x140   : > { %v1886_v40 = vpop.f32.mrf.mxu0  ;;  %v1934_v42 = vpop.f32.mrf.mxu1 }
 0x141   : > { %981 = vst [vmem:[#allocation2] sm:$0xff] %v949_v37  ;;  %997 = vst [vmem:[#allocation2 + $0x58] sm:$0xff] %v965_v38  ;;  %v1887_v43 = vadd.f32 %v1886_v40, %v1885_v35  ;;  %v1935_v44 = vadd.f32 %v1934_v42, %v1933_v36  ;;  %v443_v35 = vld [vmem:[#allocation2 + $0x80] sm:$0xff]  ;;  %v459_v37 = vld [vmem:[#allocation2 + $0xa8] sm:$0xff] }
 0x142   : > { %v1888_v45 = vpop.f32.mrf.mxu0  ;;  %v1936_v46 = vpop.f32.mrf.mxu1 }
 0x143   : > { %v950_v47 = vadd.f32 %v1887_v43, %v437_v39  ;;  %v966_v48 = vadd.f32 %v1935_v44, %v453_v41 }
 0x144   : > { %v1889_v50 = vpop.f32.mrf.mxu0  ;;  %v1937_v52 = vpop.f32.mrf.mxu1 }
 0x145   : > { %982 = vst [vmem:[#allocation2 + $0xd8] sm:$0xff] %v950_v47  ;;  %998 = vst [vmem:[#allocation2 + $0x40] sm:$0xff] %v966_v48  ;;  %v1890_v53 = vadd.f32 %v1889_v50, %v1888_v45  ;;  %v1938_v54 = vadd.f32 %v1937_v52, %v1936_v46  ;;  %v444_v45 = vld [vmem:[#allocation2 + $0x88] sm:$0xff]  ;;  %v460_v47 = vld [vmem:[#allocation2 + $0xd0] sm:$0xff] }
 0x146   : > { %v1891_v55 = vpop.f32.mrf.mxu0  ;;  %v1939_v56 = vpop.f32.mrf.mxu1 }
 0x147   : > { %v951_v57 = vadd.f32 %v1890_v53, %v438_v49  ;;  %v967_v58 = vadd.f32 %v1938_v54, %v454_v51 }
 0x148   : > { %v1892_v60 = vpop.f32.mrf.mxu0  ;;  %v1940_v62 = vpop.f32.mrf.mxu1 }
 0x149   : > { %983 = vst [vmem:[#allocation2 + $0x18] sm:$0xff] %v951_v57  ;;  %999 = vst [vmem:[#allocation2 + $0xc8] sm:$0xff] %v967_v58  ;;  %v1893_v63 = vadd.f32 %v1892_v60, %v1891_v55  ;;  %v1941_v0 = vadd.f32 %v1940_v62, %v1939_v56  ;;  %v445_v55 = vld [vmem:[#allocation2 + $0xe8] sm:$0xff]  ;;  %v461_v57 = vld [vmem:[#allocation2 + $0x10] sm:$0xff] }
 0x14a   : > { %v1894_v1 = vpop.f32.mrf.mxu0  ;;  %v1942_v2 = vpop.f32.mrf.mxu1 }
 0x14b   : > { %v952_v3 = vadd.f32 %v1893_v63, %v439_v59  ;;  %v968_v4 = vadd.f32 %v1941_v0, %v455_v61 }
 0x14c   : > { %v1895_v6 = vpop.f32.mrf.mxu0  ;;  %v1943_v8 = vpop.f32.mrf.mxu1 }
 0x14d   : > { %984 = vst [vmem:[#allocation2 + $0x50] sm:$0xff] %v952_v3  ;;  %1000 = vst [vmem:[#allocation2 + $0xe0] sm:$0xff] %v968_v4  ;;  %v1896_v9 = vadd.f32 %v1895_v6, %v1894_v1  ;;  %v1944_v10 = vadd.f32 %v1943_v8, %v1942_v2  ;;  %v446_v1 = vld [vmem:[#allocation2 + $0xb8] sm:$0xff]  ;;  %v462_v3 = vld [vmem:[#allocation2 + $0x28] sm:$0xff] }
 0x14e   : > { %v1897_v11 = vpop.f32.mrf.mxu0  ;;  %v1945_v12 = vpop.f32.mrf.mxu1 }
 0x14f   : > { %v953_v13 = vadd.f32 %v1896_v9, %v440_v5  ;;  %v969_v14 = vadd.f32 %v1944_v10, %v456_v7 }
 0x150   : > { %v1898_v16 = vpop.f32.mrf.mxu0  ;;  %v1946_v18 = vpop.f32.mrf.mxu1 }
 0x151   : > { %985 = vst [vmem:[#allocation2 + $0x68] sm:$0xff] %v953_v13  ;;  %1001 = vst [vmem:[#allocation2 + $0x90] sm:$0xff] %v969_v14  ;;  %v1899_v19 = vadd.f32 %v1898_v16, %v1897_v11  ;;  %v1947_v20 = vadd.f32 %v1946_v18, %v1945_v12  ;;  %v447_v11 = vld [vmem:[#allocation2 + $0x60] sm:$0xff] }
 0x152   : > { %v1900_v21 = vpop.f32.mrf.mxu0  ;;  %v1948_v22 = vpop.f32.mrf.mxu1  ;;  %v463_v13 = vld [vmem:[#allocation2 + $0xa0] sm:$0xff] }
 0x153   : > { %v954_v23 = vadd.f32 %v1899_v19, %v441_v15  ;;  %v970_v24 = vadd.f32 %v1947_v20, %v457_v17 }
 0x154   : > { %v1901_v26 = vpop.f32.mrf.mxu0  ;;  %v1949_v28 = vpop.f32.mrf.mxu1 }
 0x155   : > { %986 = vst [vmem:[#allocation2 + $0x30] sm:$0xff] %v954_v23  ;;  %1002 = vst [vmem:[#allocation2 + $0x70] sm:$0xff] %v970_v24  ;;  %v1902_v29 = vadd.f32 %v1901_v26, %v1900_v21  ;;  %v1950_v30 = vadd.f32 %v1949_v28, %v1948_v22  ;;  %v448_v21 = vld [vmem:[#allocation2 + $0xf0] sm:$0xff]  ;;  %v464_v23 = vld [vmem:[#allocation2 + $0xf8] sm:$0xff] }
 0x156   : > { %v1903_v31 = vpop.f32.mrf.mxu0  ;;  %v1951_v32 = vpop.f32.mrf.mxu1 }
 0x157   : > { %v955_v33 = vadd.f32 %v1902_v29, %v442_v25  ;;  %v971_v34 = vadd.f32 %v1950_v30, %v458_v27 }
 0x158   : > { %v1904_v36 = vpop.f32.mrf.mxu0  ;;  %v1952_v38 = vpop.f32.mrf.mxu1 }
 0x159   : > { %987 = vst [vmem:[#allocation2 + $0x48] sm:$0xff] %v955_v33  ;;  %1003 = vst [vmem:[#allocation2 + $0xc0] sm:$0xff] %v971_v34  ;;  %v1905_v39 = vadd.f32 %v1904_v36, %v1903_v31  ;;  %v1953_v40 = vadd.f32 %v1952_v38, %v1951_v32  ;;  %v449_v31 = vld [vmem:[#allocation2 + $0x8] sm:$0xff]  ;;  %v465_v33 = vld [vmem:[#allocation2 + $0x20] sm:$0xff] }
 0x15a   : > { %v1906_v41 = vpop.f32.mrf.mxu0  ;;  %v1954_v42 = vpop.f32.mrf.mxu1 }
 0x15b   : > { %v956_v43 = vadd.f32 %v1905_v39, %v443_v35  ;;  %v972_v44 = vadd.f32 %v1953_v40, %v459_v37 }
 0x15c   : > { %v1907_v46 = vpop.f32.mrf.mxu0  ;;  %v1955_v48 = vpop.f32.mrf.mxu1 }
 0x15d   : > { %988 = vst [vmem:[#allocation2 + $0x80] sm:$0xff] %v956_v43  ;;  %1004 = vst [vmem:[#allocation2 + $0xa8] sm:$0xff] %v972_v44  ;;  %v1908_v49 = vadd.f32 %v1907_v46, %v1906_v41  ;;  %v1956_v50 = vadd.f32 %v1955_v48, %v1954_v42  ;;  %v450_v41 = vld [vmem:[#allocation2 + $0x78] sm:$0xff] }
 0x15e   : > { %v1909_v51 = vpop.f32.mrf.mxu0  ;;  %v1957_v52 = vpop.f32.mrf.mxu1  ;;  %v466_v43 = vld [vmem:[#allocation2 + $0x98] sm:$0xff] }
 0x15f   : > { %v957_v53 = vadd.f32 %v1908_v49, %v444_v45  ;;  %v973_v54 = vadd.f32 %v1956_v50, %v460_v47 }
 0x160   : > { %v1910_v56 = vpop.f32.mrf.mxu0  ;;  %v1958_v58 = vpop.f32.mrf.mxu1 }
 0x161   : > { %989 = vst [vmem:[#allocation2 + $0x88] sm:$0xff] %v957_v53  ;;  %1005 = vst [vmem:[#allocation2 + $0xd0] sm:$0xff] %v973_v54  ;;  %v1911_v59 = vadd.f32 %v1910_v56, %v1909_v51  ;;  %v1959_v60 = vadd.f32 %v1958_v58, %v1957_v52 }
 0x162   : > { %v1912_v61 = vpop.f32.mrf.mxu0  ;;  %v1960_v62 = vpop.f32.mrf.mxu1 }
 0x163   : > { %v958_v63 = vadd.f32 %v1911_v59, %v445_v55  ;;  %v974_v0 = vadd.f32 %v1959_v60, %v461_v57 }
 0x164   : > { %v1913_v2 = vpop.f32.mrf.mxu0  ;;  %v1961_v4 = vpop.f32.mrf.mxu1 }
 0x165   : > { %990 = vst [vmem:[#allocation2 + $0xe8] sm:$0xff] %v958_v63  ;;  %1006 = vst [vmem:[#allocation2 + $0x10] sm:$0xff] %v974_v0  ;;  %v1914_v5 = vadd.f32 %v1913_v2, %v1912_v61  ;;  %v1962_v6 = vadd.f32 %v1961_v4, %v1960_v62 }
 0x166   : > { %v1915_v7 = vpop.f32.mrf.mxu0  ;;  %v1963_v8 = vpop.f32.mrf.mxu1 }
 0x167   : > { %v959_v9 = vadd.f32 %v1914_v5, %v446_v1  ;;  %v975_v10 = vadd.f32 %v1962_v6, %v462_v3 }
 0x168   : > { %v1916_v12 = vpop.f32.mrf.mxu0  ;;  %v1964_v14 = vpop.f32.mrf.mxu1 }
 0x169   : > { %991 = vst [vmem:[#allocation2 + $0xb8] sm:$0xff] %v959_v9  ;;  %1007 = vst [vmem:[#allocation2 + $0x28] sm:$0xff] %v975_v10  ;;  %v1917_v15 = vadd.f32 %v1916_v12, %v1915_v7  ;;  %v1965_v16 = vadd.f32 %v1964_v14, %v1963_v8 }
 0x16a   : > { %v1918_v17 = vpop.f32.mrf.mxu0  ;;  %v1966_v18 = vpop.f32.mrf.mxu1 }
 0x16b   : > { %v960_v19 = vadd.f32 %v1917_v15, %v447_v11  ;;  %v976_v20 = vadd.f32 %v1965_v16, %v463_v13 }
 0x16c   : > { %v1919_v22 = vpop.f32.mrf.mxu0  ;;  %v1967_v24 = vpop.f32.mrf.mxu1 }
 0x16d   : > { %992 = vst [vmem:[#allocation2 + $0x60] sm:$0xff] %v960_v19  ;;  %1008 = vst [vmem:[#allocation2 + $0xa0] sm:$0xff] %v976_v20  ;;  %v1920_v25 = vadd.f32 %v1919_v22, %v1918_v17  ;;  %v1968_v26 = vadd.f32 %v1967_v24, %v1966_v18 }
 0x16e   : > { %v1921_v27 = vpop.f32.mrf.mxu0  ;;  %v1969_v28 = vpop.f32.mrf.mxu1 }
 0x16f   : > { %v961_v29 = vadd.f32 %v1920_v25, %v448_v21  ;;  %v977_v30 = vadd.f32 %v1968_v26, %v464_v23 }
 0x170   : > { %v1922_v32 = vpop.f32.mrf.mxu0  ;;  %v1970_v34 = vpop.f32.mrf.mxu1 }
 0x171   : > { %993 = vst [vmem:[#allocation2 + $0xf0] sm:$0xff] %v961_v29  ;;  %1009 = vst [vmem:[#allocation2 + $0xf8] sm:$0xff] %v977_v30  ;;  %v1923_v35 = vadd.f32 %v1922_v32, %v1921_v27  ;;  %v1971_v36 = vadd.f32 %v1970_v34, %v1969_v28 }
 0x172   : > { %v1924_v37 = vpop.f32.mrf.mxu0  ;;  %v1972_v38 = vpop.f32.mrf.mxu1 }
 0x173   : > { %v962_v39 = vadd.f32 %v1923_v35, %v449_v31  ;;  %v978_v40 = vadd.f32 %v1971_v36, %v465_v33 }
 0x174   : > { %v1925_v42 = vpop.f32.mrf.mxu0  ;;  %v1973_v44 = vpop.f32.mrf.mxu1 }
 0x175   : > { %994 = vst [vmem:[#allocation2 + $0x8] sm:$0xff] %v962_v39  ;;  %1010 = vst [vmem:[#allocation2 + $0x20] sm:$0xff] %v978_v40  ;;  %v1926_v45 = vadd.f32 %v1925_v42, %v1924_v37  ;;  %v1974_v46 = vadd.f32 %v1973_v44, %v1972_v38  ;;  %1015 = sbr.rel (%p1854_p5) target bundleno = 986 (0x3da), region = 82 }
 0x177   : > { %v963_v47 = vadd.f32 %v1926_v45, %v450_v41  ;;  %v979_v48 = vadd.f32 %v1974_v46, %v466_v43 }
 0x179   : > { %995 = vst [vmem:[#allocation2 + $0x78] sm:$0xff] %v963_v47  ;;  %1011 = vst [vmem:[#allocation2 + $0x98] sm:$0xff] %v979_v48 }
 0x17a   : > { %v1063_v49 = vld [vmem:[%s3315_s2 + $0x78] sm:$0xff]  ;;  %v1062_v50 = vld [vmem:[%s3315_s2 + $0x70] sm:$0xff]  ;;  %v1061_v51 = vld [vmem:[%s3315_s2 + $0x68] sm:$0xff]  ;;  %v1296_v33 = vlaneseq }
 0x17b   : > { %2023 = vmatprep.subr.mxu0 %v1063_v49  ;;  %2119 = vmatprep.subr.mxu1 %v1063_v49  ;;  %v1060_v52 = vld [vmem:[%s3315_s2 + $0x60] sm:$0xff]  ;;  %v1059_v53 = vld [vmem:[%s3315_s2 + $0x58] sm:$0xff]  ;;  %v1058_v54 = vld [vmem:[%s3315_s2 + $0x50] sm:$0xff] }
 0x17c   : > { %2024 = vmatpush3.msra.mxu0 %v1063_v49  ;;  %2135 = vmatpush3.msra.mxu1 %v1063_v49  ;;  %v1057_v55 = vld [vmem:[%s3315_s2 + $0x48] sm:$0xff]  ;;  %v1056_v56 = vld [vmem:[%s3315_s2 + $0x40] sm:$0xff]  ;;  %v1055_v57 = vld [vmem:[%s3315_s2 + $0x38] sm:$0xff]  ;;  %v2853_v34 = vand.u32 127, %v1296_v33 }
 0x17d   : > { %2025 = vmatprep.subr.mxu0 %v1062_v50  ;;  %2120 = vmatprep.subr.mxu1 %v1062_v50  ;;  %v1054_v58 = vld [vmem:[%s3315_s2 + $0x30] sm:$0xff]  ;;  %v1053_v59 = vld [vmem:[%s3315_s2 + $0x28] sm:$0xff]  ;;  %v1052_v60 = vld [vmem:[%s3315_s2 + $0x20] sm:$0xff] }
 0x17e   : > { %2026 = vmatpush3.msra.mxu0 %v1062_v50  ;;  %2136 = vmatpush3.msra.mxu1 %v1062_v50  ;;  %v1051_v61 = vld [vmem:[%s3315_s2 + $0x18] sm:$0xff]  ;;  %v1050_v62 = vld [vmem:[%s3315_s2 + $0x10] sm:$0xff]  ;;  %v1049_v63 = vld [vmem:[%s3315_s2 + $0x8] sm:$0xff]  ;;  %vm1298_vm0 = vcmp.lt.s32.totalorder %v2853_v34, 8 }
 0x17f   : > { %2027 = vmatprep.subr.mxu0 %v1061_v51  ;;  %2121 = vmatprep.subr.mxu1 %v1061_v51  ;;  %v1048_v0 = vld [vmem:[%s3315_s2] sm:$0xff]  ;;  %v1016_v1 = vld [vmem:[#allocation2 + $0xb0] sm:$0xff]  ;;  %v1032_v2 = vld [vmem:[#allocation2 + $0x38] sm:$0xff] }
 0x180   : > { %2028 = vmatpush3.msra.mxu0 %v1061_v51  ;;  %2137 = vmatpush3.msra.mxu1 %v1061_v51  ;;  %v1017_v3 = vld [vmem:[#allocation2] sm:$0xff]  ;;  %v1033_v4 = vld [vmem:[#allocation2 + $0x58] sm:$0xff]  ;;  %v1035_v8 = vld [vmem:[#allocation2 + $0xc8] sm:$0xff] }
 0x181   : > { %2029 = vmatprep.subr.mxu0 %v1060_v52  ;;  %2122 = vmatprep.subr.mxu1 %v1060_v52  ;;  %v1018_v5 = vld [vmem:[#allocation2 + $0xd8] sm:$0xff]  ;;  %v1034_v6 = vld [vmem:[#allocation2 + $0x40] sm:$0xff]  ;;  %v1020_v9 = vld [vmem:[#allocation2 + $0x50] sm:$0xff] }
 0x182   : > { %2030 = vmatpush3.msra.mxu0 %v1060_v52  ;;  %2138 = vmatpush3.msra.mxu1 %v1060_v52  ;;  %v1019_v7 = vld [vmem:[#allocation2 + $0x18] sm:$0xff]  ;;  %v1036_v10 = vld [vmem:[#allocation2 + $0xe0] sm:$0xff]  ;;  %v1021_v11 = vld [vmem:[#allocation2 + $0x68] sm:$0xff] }
 0x183   : > { %2031 = vmatprep.subr.mxu0 %v1059_v53  ;;  %2123 = vmatprep.subr.mxu1 %v1059_v53  ;;  %v1037_v12 = vld [vmem:[#allocation2 + $0x90] sm:$0xff]  ;;  %v1023_v15 = vld [vmem:[#allocation2 + $0x48] sm:$0xff]  ;;  %v1039_v16 = vld [vmem:[#allocation2 + $0xc0] sm:$0xff] }
 0x184   : > { %2032 = vmatpush3.msra.mxu0 %v1059_v53  ;;  %2139 = vmatpush3.msra.mxu1 %v1059_v53  ;;  %v1022_v13 = vld [vmem:[#allocation2 + $0x30] sm:$0xff]  ;;  %v1024_v17 = vld [vmem:[#allocation2 + $0x80] sm:$0xff]  ;;  %v1040_v18 = vld [vmem:[#allocation2 + $0xa8] sm:$0xff] }
 0x185   : > { %2033 = vmatprep.subr.mxu0 %v1058_v54  ;;  %2124 = vmatprep.subr.mxu1 %v1058_v54  ;;  %v1038_v14 = vld [vmem:[#allocation2 + $0x70] sm:$0xff]  ;;  %v1025_v19 = vld [vmem:[#allocation2 + $0x88] sm:$0xff]  ;;  %v1027_v23 = vld [vmem:[#allocation2 + $0xb8] sm:$0xff] }
 0x186   : > { %2034 = vmatpush3.msra.mxu0 %v1058_v54  ;;  %2140 = vmatpush3.msra.mxu1 %v1058_v54  ;;  %v1041_v20 = vld [vmem:[#allocation2 + $0xd0] sm:$0xff]  ;;  %v1026_v21 = vld [vmem:[#allocation2 + $0xe8] sm:$0xff]  ;;  %v1028_v25 = vld [vmem:[#allocation2 + $0x60] sm:$0xff] }
 0x187   : > { %2035 = vmatprep.subr.mxu0 %v1057_v55  ;;  %2125 = vmatprep.subr.mxu1 %v1057_v55  ;;  %v1042_v22 = vld [vmem:[#allocation2 + $0x10] sm:$0xff]  ;;  %v1043_v24 = vld [vmem:[#allocation2 + $0x28] sm:$0xff]  ;;  %v1044_v26 = vld [vmem:[#allocation2 + $0xa0] sm:$0xff] }
 0x188   : > { %2036 = vmatpush3.msra.mxu0 %v1057_v55  ;;  %2141 = vmatpush3.msra.mxu1 %v1057_v55  ;;  %v1029_v27 = vld [vmem:[#allocation2 + $0xf0] sm:$0xff]  ;;  %v1045_v28 = vld [vmem:[#allocation2 + $0xf8] sm:$0xff]  ;;  %v1030_v29 = vld [vmem:[#allocation2 + $0x8] sm:$0xff] }
 0x189   : > { %2037 = vmatprep.subr.mxu0 %v1056_v56  ;;  %2126 = vmatprep.subr.mxu1 %v1056_v56  ;;  %v1046_v30 = vld [vmem:[#allocation2 + $0x20] sm:$0xff]  ;;  %v1031_v31 = vld [vmem:[#allocation2 + $0x78] sm:$0xff] }
 0x18a   : > { %2038 = vmatpush3.msra.mxu0 %v1056_v56  ;;  %2142 = vmatpush3.msra.mxu1 %v1056_v56  ;;  %v1047_v32 = vld [vmem:[#allocation2 + $0x98] sm:$0xff]  ;;  %v2858_v35 = vld [vmem:[%s3316_s3] ss:$0 sm:$0xff] }
 0x18b   : > { %2039 = vmatprep.subr.mxu0 %v1055_v57  ;;  %2127 = vmatprep.subr.mxu1 %v1055_v57 }
 0x18c   : > { %2040 = vmatpush3.msra.mxu0 %v1055_v57  ;;  %2143 = vmatpush3.msra.mxu1 %v1055_v57 }
 0x18d   : > { %2041 = vmatprep.subr.mxu0 %v1054_v58  ;;  %2128 = vmatprep.subr.mxu1 %v1054_v58 }
 0x18e   : > { %2042 = vmatpush3.msra.mxu0 %v1054_v58  ;;  %2144 = vmatpush3.msra.mxu1 %v1054_v58 }
 0x18f   : > { %2043 = vmatprep.subr.mxu0 %v1053_v59  ;;  %2129 = vmatprep.subr.mxu1 %v1053_v59 }
 0x190   : > { %2044 = vmatpush3.msra.mxu0 %v1053_v59  ;;  %2145 = vmatpush3.msra.mxu1 %v1053_v59 }
 0x191   : > { %2045 = vmatprep.subr.mxu0 %v1052_v60  ;;  %2130 = vmatprep.subr.mxu1 %v1052_v60 }
 0x192   : > { %2046 = vmatpush3.msra.mxu0 %v1052_v60  ;;  %2146 = vmatpush3.msra.mxu1 %v1052_v60 }
 0x193   : > { %2047 = vmatprep.subr.mxu0 %v1051_v61  ;;  %2131 = vmatprep.subr.mxu1 %v1051_v61 }
 0x194   : > { %2048 = vmatpush3.msra.mxu0 %v1051_v61  ;;  %2147 = vmatpush3.msra.mxu1 %v1051_v61 }
 0x195   : > { %2049 = vmatprep.subr.mxu0 %v1050_v62  ;;  %2132 = vmatprep.subr.mxu1 %v1050_v62 }
 0x196   : > { %2050 = vmatpush3.msra.mxu0 %v1050_v62  ;;  %2148 = vmatpush3.msra.mxu1 %v1050_v62 }
 0x197   : > { %2051 = vmatprep.subr.mxu0 %v1049_v63  ;;  %2133 = vmatprep.subr.mxu1 %v1049_v63 }
 0x198   : > { %2052 = vmatpush3.msra.mxu0 %v1049_v63  ;;  %2149 = vmatpush3.msra.mxu1 %v1049_v63 }
 0x199   : > { %2053 = vmatprep.subr.mxu0 %v1048_v0  ;;  %2134 = vmatprep.subr.mxu1 %v1048_v0 }
 0x19a   : > { %2054 = vmatpush3.msra.mxu0 %v1048_v0  ;;  %2150 = vmatpush3.msra.mxu1 %v1048_v0 }
 0x19b   : > { %2055 = vmatprep.mubr.f32.mxu0 %v1016_v1  ;;  %2079 = vmatprep.mubr.f32.mxu1 %v1032_v2 }
 0x19c   : > { %2056 = vmatmul.mubr.f32.vlgmr.msra.gmra.mxu0 %v1017_v3  ;;  %2080 = vmatmul.mubr.f32.vlgmr.msra.gmra.mxu1 %v1033_v4 }
 0x19d   : > { %2058 = vmatprep.mubr.f32.mxu0 %v1018_v5  ;;  %2082 = vmatprep.mubr.f32.mxu1 %v1034_v6 }
 0x1a0   : > { %2059 = vmatmul.mubr.f32.gmra.mxu0 %v1019_v7  ;;  %2083 = vmatmul.mubr.f32.gmra.mxu1 %v1035_v8 }
 0x1a1   : > { %2061 = vmatprep.mubr.f32.mxu0 %v1020_v9  ;;  %2085 = vmatprep.mubr.f32.mxu1 %v1036_v10 }
 0x1a4   : > { %2062 = vmatmul.mubr.f32.gmra.mxu0 %v1021_v11  ;;  %2086 = vmatmul.mubr.f32.gmra.mxu1 %v1037_v12 }
 0x1a5   : > { %2064 = vmatprep.mubr.f32.mxu0 %v1022_v13  ;;  %2088 = vmatprep.mubr.f32.mxu1 %v1038_v14 }
 0x1a8   : > { %2065 = vmatmul.mubr.f32.gmra.mxu0 %v1023_v15  ;;  %2089 = vmatmul.mubr.f32.gmra.mxu1 %v1039_v16 }
 0x1a9   : > { %2067 = vmatprep.mubr.f32.mxu0 %v1024_v17  ;;  %2091 = vmatprep.mubr.f32.mxu1 %v1040_v18 }
 0x1ac   : > { %2068 = vmatmul.mubr.f32.gmra.mxu0 %v1025_v19  ;;  %2092 = vmatmul.mubr.f32.gmra.mxu1 %v1041_v20 }
 0x1ad   : > { %2070 = vmatprep.mubr.f32.mxu0 %v1026_v21  ;;  %2094 = vmatprep.mubr.f32.mxu1 %v1042_v22 }
 0x1b0   : > { %2071 = vmatmul.mubr.f32.gmra.mxu0 %v1027_v23  ;;  %2095 = vmatmul.mubr.f32.gmra.mxu1 %v1043_v24 }
 0x1b1   : > { %2073 = vmatprep.mubr.f32.mxu0 %v1028_v25  ;;  %2097 = vmatprep.mubr.f32.mxu1 %v1044_v26 }
 0x1b4   : > { %2074 = vmatmul.mubr.f32.gmra.mxu0 %v1029_v27  ;;  %2098 = vmatmul.mubr.f32.gmra.mxu1 %v1045_v28 }
 0x1b5   : > { %2076 = vmatprep.mubr.f32.mxu0 %v1030_v29  ;;  %2100 = vmatprep.mubr.f32.mxu1 %v1046_v30 }
 0x1b8   : > { %2077 = vmatmul.mubr.f32.gmra.mxu0 %v1031_v31  ;;  %2101 = vmatmul.mubr.f32.gmra.mxu1 %v1047_v32 }
 0x25c   : > { %v2057_v36 = vpop.f32.mrf.mxu0  ;;  %v2081_v37 = vpop.f32.mrf.mxu1 }
 0x25d   : > { %v1143_v38 = vadd.f32 %v2057_v36, %v2858_v35  ;;  %v1223_v39 = vadd.f32 %v2081_v37, %v2858_v35 }
 0x25e   : > { %v1137_v40 = vpop.f32.mrf.mxu0  ;;  %v1217_v41 = vpop.f32.mrf.mxu1 }
 0x25f   : > { %v1138_v42 = vadd.f32 %v2858_v35, %v1137_v40  ;;  %v2866_v43 = vsel %vm1298_vm0, %v1223_v39, -1e+30  ;;  %v2870_v44 = vsel %vm1298_vm0, %v1143_v38, -1e+30  ;;  %v1218_v50 = vadd.f32 %v2858_v35, %v1217_v41 }
 0x260   : > { %1365 = vmax.xlane.f32.xlu1 %v2866_v43  ;;  %1333 = vmax.xlane.f32.xlu0 %v2870_v44  ;;  %v2060_v45 = vpop.f32.mrf.mxu0  ;;  %v2084_v46 = vpop.f32.mrf.mxu1 }
 0x261   : > { %v1153_v47 = vadd.f32 %v2060_v45, %v2858_v35  ;;  %v1233_v48 = vadd.f32 %v2084_v46, %v2858_v35  ;;  %v2883_v52 = vsel %vm1298_vm0, %v1138_v42, -1e+30  ;;  %v2895_v60 = vsel %vm1298_vm0, %v1218_v50, -1e+30 }
 0x262   : > { %v1147_v49 = vpop.f32.mrf.mxu0  ;;  %v1227_v53 = vpop.f32.mrf.mxu1 }
 0x263   : > { %v2879_v51 = vsel %vm1298_vm0, %v1153_v47, -1e+30  ;;  %v2889_v55 = vsel %vm1298_vm0, %v1233_v48, -1e+30  ;;  %v1148_v58 = vadd.f32 %v2858_v35, %v1147_v49  ;;  %v1228_v59 = vadd.f32 %v2858_v35, %v1227_v53 }
 0x264   : > { %1337 = vmax.xlane.f32.xlu1 %v2879_v51  ;;  %1331 = vmax.xlane.f32.xlu0 %v2883_v52  ;;  %v2063_v54 = vpop.f32.mrf.mxu0  ;;  %v2087_v57 = vpop.f32.mrf.mxu1 }
 0x265   : > { %v1163_v61 = vadd.f32 %v2063_v54, %v2858_v35  ;;  %v2903_v1 = vsel %vm1298_vm0, %v1148_v58, -1e+30  ;;  %v2907_v2 = vsel %vm1298_vm0, %v1228_v59, -1e+30  ;;  %v1243_v3 = vadd.f32 %v2087_v57, %v2858_v35 }
 0x266   : > { %v1157_v56 = vpop.f32.mrf.mxu0  ;;  %v1237_v63 = vpop.f32.mrf.mxu1 }
 0x267   : > { %v1158_v62 = vadd.f32 %v2858_v35, %v1157_v56  ;;  %v1238_v4 = vadd.f32 %v2858_v35, %v1237_v63  ;;  %v2915_v5 = vsel %vm1298_vm0, %v1163_v61, -1e+30  ;;  %v2927_v11 = vsel %vm1298_vm0, %v1243_v3, -1e+30 }
 0x268   : > { %1369 = vmax.xlane.f32.xlu1 %v2889_v55  ;;  %1363 = vmax.xlane.f32.xlu0 %v2895_v60  ;;  %v2066_v0 = vpop.f32.mrf.mxu0  ;;  %v2090_v8 = vpop.f32.mrf.mxu1 }
 0x269   : > { %v2919_v6 = vsel %vm1298_vm0, %v1158_v62, -1e+30  ;;  %v1173_v9 = vadd.f32 %v2066_v0, %v2858_v35  ;;  %v2931_v12 = vsel %vm1298_vm0, %v1238_v4, -1e+30  ;;  %v1253_v15 = vadd.f32 %v2090_v8, %v2858_v35 }
 0x26a   : > { %v1167_v7 = vpop.f32.mrf.mxu0  ;;  %v1247_v13 = vpop.f32.mrf.mxu1 }
 0x26b   : > { %v1168_v10 = vadd.f32 %v2858_v35, %v1167_v7  ;;  %v1248_v16 = vadd.f32 %v2858_v35, %v1247_v13  ;;  %v2939_v17 = vsel %vm1298_vm0, %v1173_v9, -1e+30  ;;  %v2951_v23 = vsel %vm1298_vm0, %v1253_v15, -1e+30 }
 0x26c   : > { %1335 = vmax.xlane.f32.xlu1 %v2903_v1  ;;  %1367 = vmax.xlane.f32.xlu0 %v2907_v2  ;;  %v2069_v14 = vpop.f32.mrf.mxu0  ;;  %v2093_v20 = vpop.f32.mrf.mxu1 }
 0x26d   : > { %v2943_v18 = vsel %vm1298_vm0, %v1168_v10, -1e+30  ;;  %v1183_v21 = vadd.f32 %v2069_v14, %v2858_v35  ;;  %v2955_v24 = vsel %vm1298_vm0, %v1248_v16, -1e+30  ;;  %v1263_v27 = vadd.f32 %v2093_v20, %v2858_v35 }
 0x26e   : > { %v1177_v19 = vpop.f32.mrf.mxu0  ;;  %v1257_v25 = vpop.f32.mrf.mxu1 }
 0x26f   : > { %v1178_v22 = vadd.f32 %v2858_v35, %v1177_v19  ;;  %v1258_v28 = vadd.f32 %v2858_v35, %v1257_v25  ;;  %v2963_v29 = vsel %vm1298_vm0, %v1183_v21, -1e+30  ;;  %v2975_v37 = vsel %vm1298_vm0, %v1263_v27, -1e+30 }
 0x270   : > { %1341 = vmax.xlane.f32.xlu1 %v2915_v5  ;;  %1339 = vmax.xlane.f32.xlu0 %v2919_v6  ;;  %v2072_v26 = vpop.f32.mrf.mxu0  ;;  %v2096_v32 = vpop.f32.mrf.mxu1 }
 0x271   : > { %v2967_v30 = vsel %vm1298_vm0, %v1178_v22, -1e+30  ;;  %v1193_v33 = vadd.f32 %v2072_v26, %v2858_v35  ;;  %v2979_v38 = vsel %vm1298_vm0, %v1258_v28, -1e+30  ;;  %v1273_v41 = vadd.f32 %v2096_v32, %v2858_v35 }
 0x272   : > { %v1187_v31 = vpop.f32.mrf.mxu0  ;;  %v1267_v39 = vpop.f32.mrf.mxu1 }
 0x273   : > { %v1188_v36 = vadd.f32 %v2858_v35, %v1187_v31  ;;  %v1268_v42 = vadd.f32 %v2858_v35, %v1267_v39  ;;  %v2987_v45 = vsel %vm1298_vm0, %v1193_v33, -1e+30  ;;  %v2999_v53 = vsel %vm1298_vm0, %v1273_v41, -1e+30 }
 0x274   : > { %1373 = vmax.xlane.f32.xlu1 %v2927_v11  ;;  %1371 = vmax.xlane.f32.xlu0 %v2931_v12  ;;  %v2075_v40 = vpop.f32.mrf.mxu0  ;;  %v2099_v48 = vpop.f32.mrf.mxu1 }
 0x275   : > { %v2991_v46 = vsel %vm1298_vm0, %v1188_v36, -1e+30  ;;  %v1203_v49 = vadd.f32 %v2075_v40, %v2858_v35  ;;  %v3003_v54 = vsel %vm1298_vm0, %v1268_v42, -1e+30  ;;  %v1283_v58 = vadd.f32 %v2099_v48, %v2858_v35 }
 0x276   : > { %v1197_v47 = vpop.f32.mrf.mxu0  ;;  %v1277_v56 = vpop.f32.mrf.mxu1 }
 0x277   : > { %v1198_v50 = vadd.f32 %v2858_v35, %v1197_v47  ;;  %v1278_v59 = vadd.f32 %v2858_v35, %v1277_v56  ;;  %v3011_v61 = vsel %vm1298_vm0, %v1203_v49, -1e+30  ;;  %v3023_v7 = vsel %vm1298_vm0, %v1283_v58, -1e+30 }
 0x278   : > { %1345 = vmax.xlane.f32.xlu1 %v2939_v17  ;;  %1343 = vmax.xlane.f32.xlu0 %v2943_v18  ;;  %v2078_v57 = vpop.f32.mrf.mxu0  ;;  %v2102_v0 = vpop.f32.mrf.mxu1 }
 0x279   : > { %v3015_v62 = vsel %vm1298_vm0, %v1198_v50, -1e+30  ;;  %v1213_v3 = vadd.f32 %v2078_v57, %v2858_v35  ;;  %v3027_v8 = vsel %vm1298_vm0, %v1278_v59, -1e+30  ;;  %v1293_v10 = vadd.f32 %v2102_v0, %v2858_v35 }
 0x27a   : > { %v1207_v63 = vpop.f32.mrf.mxu0  ;;  %v1287_v9 = vpop.f32.mrf.mxu1 }
 0x27b   : > { %v1208_v4 = vadd.f32 %v2858_v35, %v1207_v63  ;;  %v1288_v13 = vadd.f32 %v2858_v35, %v1287_v9  ;;  %v3035_v14 = vsel %vm1298_vm0, %v1213_v3, -1e+30  ;;  %v3045_v16 = vsel %vm1298_vm0, %v1293_v10, -1e+30 }
 0x27c   : > { %1377 = vmax.xlane.f32.xlu1 %v2951_v23  ;;  %1375 = vmax.xlane.f32.xlu0 %v2955_v24 }
 0x27d   : > { %v3039_v15 = vsel %vm1298_vm0, %v1208_v4, -1e+30  ;;  %v3049_v19 = vsel %vm1298_vm0, %v1288_v13, -1e+30 }
 0x280   : > { %1349 = vmax.xlane.f32.xlu1 %v2963_v29  ;;  %1347 = vmax.xlane.f32.xlu0 %v2967_v30 }
 0x284   : > { %1381 = vmax.xlane.f32.xlu1 %v2975_v37  ;;  %1379 = vmax.xlane.f32.xlu0 %v2979_v38 }
 0x288   : > { %1353 = vmax.xlane.f32.xlu1 %v2987_v45  ;;  %1351 = vmax.xlane.f32.xlu0 %v2991_v46 }
 0x28c   : > { %1385 = vmax.xlane.f32.xlu1 %v2999_v53  ;;  %1383 = vmax.xlane.f32.xlu0 %v3003_v54 }
 0x290   : > { %1357 = vmax.xlane.f32.xlu1 %v3011_v61  ;;  %1355 = vmax.xlane.f32.xlu0 %v3015_v62 }
 0x294   : > { %1389 = vmax.xlane.f32.xlu1 %v3023_v7  ;;  %1387 = vmax.xlane.f32.xlu0 %v3027_v8 }
 0x298   : > { %1361 = vmax.xlane.f32.xlu1 %v3035_v14  ;;  %1359 = vmax.xlane.f32.xlu0 %v3039_v15 }
 0x29c   : > { %1393 = vmax.xlane.f32.xlu1 %v3045_v16  ;;  %1391 = vmax.xlane.f32.xlu0 %v3049_v19 }
 0x2e9   : > { %v1366_v35 = vpop.xlane.xlu1 %1365  ;;  %v1334_v20 = vpop.xlane.xlu0 %1333 }
 0x2ea   : > { %v3054_v21 = vsub.f32 %v2866_v43, %v1366_v35  ;;  %v3057_v22 = vsub.f32 %v2870_v44, %v1334_v20 }
 0x2ec   : > { %v1429_v25 = vmul.f32 1.442695, %v3057_v22  ;;  %v1461_v34 = vmul.f32 1.442695, %v3054_v21 }
 0x2ed   : > { %v1338_v26 = vpop.xlane.xlu1 %1337  ;;  %v1332_v27 = vpop.xlane.xlu0 %1331 }
 0x2ee   : > { %v3062_v28 = vsub.f32 %v2879_v51, %v1338_v26  ;;  %v3065_v31 = vsub.f32 %v2883_v52, %v1332_v27  ;;  %2305 = vpow2.f32 %v1429_v25 }
 0x2ef   : > { %2307 = vpow2.f32 %v1461_v34 }
 0x2f0   : > { %v1427_v32 = vmul.f32 1.442695, %v3065_v31  ;;  %v1433_v44 = vmul.f32 1.442695, %v3062_v28 }
 0x2f1   : > { %v1370_v43 = vpop.xlane.xlu1 %1369  ;;  %v1364_v33 = vpop.xlane.xlu0 %1363 }
 0x2f2   : > { %v3070_v36 = vsub.f32 %v2895_v60, %v1364_v33  ;;  %2309 = vpow2.f32 %v1427_v32  ;;  %v3073_v39 = vsub.f32 %v2889_v55, %v1370_v43 }
 0x2f3   : > { %2311 = vpow2.f32 %v1433_v44 }
 0x2f4   : > { %v1459_v51 = vmul.f32 1.442695, %v3070_v36  ;;  %v1465_v42 = vmul.f32 1.442695, %v3073_v39 }
 0x2f5   : > { %v1336_v40 = vpop.xlane.xlu1 %1335  ;;  %v1368_v52 = vpop.xlane.xlu0 %1367 }
 0x2f6   : > { %v3077_v41 = vsub.f32 %v2903_v1, %v1336_v40  ;;  %2313 = vpow2.f32 %v1459_v51  ;;  %v3081_v47 = vsub.f32 %v2907_v2, %v1368_v52 }
 0x2f8   : > { %v1431_v60 = vmul.f32 1.442695, %v3077_v41  ;;  %v1463_v50 = vmul.f32 1.442695, %v3081_v47 }
 0x2f9   : > { %v1342_v48 = vpop.xlane.xlu1 %1341  ;;  %v1340_v49 = vpop.xlane.xlu0 %1339 }
 0x2fa   : > { %2315 = vpow2.f32 %v1431_v60  ;;  %v3085_v55 = vsub.f32 %v2915_v5, %v1342_v48  ;;  %v3089_v1 = vsub.f32 %v2919_v6, %v1340_v49 }
 0x2fb   : > { %2317 = vpow2.f32 %v1465_v42  ;;  %v2306_v56 = vpop.eup %2305 }
 0x2fc   : > { %v1437_v57 = vmul.f32 1.442695, %v3085_v55  ;;  %1493 = vadd.xlane.f32.xlu1 %v2306_v56  ;;  %v2308_v63 = vpop.eup %2307  ;;  %v1435_v5 = vmul.f32 1.442695, %v3089_v1 }
 0x2fd   : > { %v1374_v2 = vpop.xlane.xlu1 %1373  ;;  %v1372_v58 = vpop.xlane.xlu0 %1371 }
 0x2fe   : > { %2319 = vpow2.f32 %v1437_v57  ;;  %v3093_v59 = vsub.f32 %v2927_v11, %v1374_v2  ;;  %v3097_v0 = vsub.f32 %v2931_v12, %v1372_v58 }
 0x2ff   : > { %2321 = vpow2.f32 %v1463_v50  ;;  %v2310_v3 = vpop.eup %2309 }
 0x300   : > { %v1469_v6 = vmul.f32 1.442695, %v3093_v59  ;;  %1525 = vadd.xlane.f32.xlu1 %v2308_v63  ;;  %1491 = vadd.xlane.f32.xlu0 %v2310_v3  ;;  %v2312_v11 = vpop.eup %2311  ;;  %v1467_v13 = vmul.f32 1.442695, %v3097_v0 }
 0x301   : > { %v1346_v4 = vpop.xlane.xlu1 %1345  ;;  %v1344_v9 = vpop.xlane.xlu0 %1343 }
 0x302   : > { %2323 = vpow2.f32 %v1469_v6  ;;  %v3101_v10 = vsub.f32 %v2939_v17, %v1346_v4  ;;  %v3105_v35 = vsub.f32 %v2943_v18, %v1344_v9 }
 0x303   : > { %2325 = vpow2.f32 %v1435_v5  ;;  %v2314_v12 = vpop.eup %2313 }
 0x304   : > { %v1441_v20 = vmul.f32 1.442695, %v3101_v10  ;;  %1497 = vadd.xlane.f32.xlu1 %v2312_v11  ;;  %1523 = vadd.xlane.f32.xlu0 %v2314_v12  ;;  %v1439_v34 = vmul.f32 1.442695, %v3105_v35 }
 0x305   : > { %v1378_v25 = vpop.xlane.xlu1 %1377  ;;  %v1376_v26 = vpop.xlane.xlu0 %1375 }
 0x306   : > { %2327 = vpow2.f32 %v1441_v20  ;;  %v3109_v27 = vsub.f32 %v2951_v23, %v1378_v25  ;;  %v3113_v32 = vsub.f32 %v2955_v24, %v1376_v26 }
 0x307   : > { %v2316_v17 = vpop.eup %2315  ;;  %2329 = vpow2.f32 %v1467_v13 }
 0x308   : > { %v2318_v18 = vpop.eup %2317  ;;  %v1473_v43 = vmul.f32 1.442695, %v3109_v27  ;;  %1495 = vadd.xlane.f32.xlu0 %v2316_v17  ;;  %v1471_v40 = vmul.f32 1.442695, %v3113_v32 }
 0x309   : > { %1529 = vadd.xlane.f32.xlu1 %v2318_v18  ;;  %v1350_v33 = vpop.xlane.xlu1 %1349  ;;  %v1348_v44 = vpop.xlane.xlu0 %1347 }
 0x30a   : > { %2331 = vpow2.f32 %v1473_v43  ;;  %v3117_v51 = vsub.f32 %v2963_v29, %v1350_v33  ;;  %v3121_v52 = vsub.f32 %v2967_v30, %v1348_v44 }
 0x30b   : > { %v2320_v23 = vpop.eup %2319  ;;  %2333 = vpow2.f32 %v1439_v34 }
 0x30c   : > { %v2322_v24 = vpop.eup %2321  ;;  %v1445_v42 = vmul.f32 1.442695, %v3117_v51  ;;  %v1443_v50 = vmul.f32 1.442695, %v3121_v52 }
 0x30d   : > { %1501 = vadd.xlane.f32.xlu1 %v2320_v23  ;;  %1527 = vadd.xlane.f32.xlu0 %v2322_v24  ;;  %v1382_v60 = vpop.xlane.xlu1 %1381  ;;  %v1380_v48 = vpop.xlane.xlu0 %1379 }
 0x30e   : > { %2335 = vpow2.f32 %v1445_v42  ;;  %v3125_v49 = vsub.f32 %v2975_v37, %v1382_v60  ;;  %v3129_v56 = vsub.f32 %v2979_v38, %v1380_v48 }
 0x30f   : > { %v2324_v29 = vpop.eup %2323  ;;  %2337 = vpow2.f32 %v1471_v40 }
 0x310   : > { %v2326_v30 = vpop.eup %2325  ;;  %v1477_v57 = vmul.f32 1.442695, %v3125_v49  ;;  %v1475_v5 = vmul.f32 1.442695, %v3129_v56 }
 0x311   : > { %1533 = vadd.xlane.f32.xlu1 %v2324_v29  ;;  %1499 = vadd.xlane.f32.xlu0 %v2326_v30  ;;  %v1354_v2 = vpop.xlane.xlu1 %1353  ;;  %v1352_v58 = vpop.xlane.xlu0 %1351 }
 0x312   : > { %2339 = vpow2.f32 %v1477_v57  ;;  %v3133_v63 = vsub.f32 %v2987_v45, %v1354_v2  ;;  %v3137_v3 = vsub.f32 %v2991_v46, %v1352_v58 }
 0x313   : > { %v2328_v37 = vpop.eup %2327  ;;  %2341 = vpow2.f32 %v1443_v50 }
 0x314   : > { %v2330_v38 = vpop.eup %2329  ;;  %v1449_v6 = vmul.f32 1.442695, %v3133_v63  ;;  %v1447_v13 = vmul.f32 1.442695, %v3137_v3 }
 0x315   : > { %1505 = vadd.xlane.f32.xlu1 %v2328_v37  ;;  %1531 = vadd.xlane.f32.xlu0 %v2330_v38  ;;  %v1386_v4 = vpop.xlane.xlu1 %1385  ;;  %v1384_v9 = vpop.xlane.xlu0 %1383 }
 0x316   : > { %2343 = vpow2.f32 %v1449_v6  ;;  %v3141_v11 = vsub.f32 %v2999_v53, %v1386_v4  ;;  %v3145_v12 = vsub.f32 %v3003_v54, %v1384_v9 }
 0x317   : > { %v2332_v45 = vpop.eup %2331  ;;  %2345 = vpow2.f32 %v1475_v5 }
 0x318   : > { %v2334_v46 = vpop.eup %2333  ;;  %v1481_v20 = vmul.f32 1.442695, %v3141_v11  ;;  %v1479_v34 = vmul.f32 1.442695, %v3145_v12 }
 0x319   : > { %1537 = vadd.xlane.f32.xlu1 %v2332_v45  ;;  %1503 = vadd.xlane.f32.xlu0 %v2334_v46  ;;  %v1358_v25 = vpop.xlane.xlu1 %1357  ;;  %v1356_v26 = vpop.xlane.xlu0 %1355 }
 0x31a   : > { %2347 = vpow2.f32 %v1481_v20  ;;  %v3149_v17 = vsub.f32 %v3011_v61, %v1358_v25  ;;  %v3153_v18 = vsub.f32 %v3015_v62, %v1356_v26 }
 0x31b   : > { %v2336_v53 = vpop.eup %2335  ;;  %2349 = vpow2.f32 %v1447_v13 }
 0x31c   : > { %v2338_v54 = vpop.eup %2337  ;;  %v1453_v43 = vmul.f32 1.442695, %v3149_v17  ;;  %v1451_v40 = vmul.f32 1.442695, %v3153_v18 }
 0x31d   : > { %1509 = vadd.xlane.f32.xlu1 %v2336_v53  ;;  %1535 = vadd.xlane.f32.xlu0 %v2338_v54  ;;  %v1390_v33 = vpop.xlane.xlu1 %1389  ;;  %v1388_v44 = vpop.xlane.xlu0 %1387 }
 0x31e   : > { %2351 = vpow2.f32 %v1453_v43  ;;  %v3157_v23 = vsub.f32 %v3023_v7, %v1390_v33  ;;  %v3161_v24 = vsub.f32 %v3027_v8, %v1388_v44 }
 0x31f   : > { %v2340_v61 = vpop.eup %2339  ;;  %2353 = vpow2.f32 %v1479_v34 }
 0x320   : > { %v2342_v62 = vpop.eup %2341  ;;  %v1485_v42 = vmul.f32 1.442695, %v3157_v23  ;;  %v1483_v50 = vmul.f32 1.442695, %v3161_v24 }
 0x321   : > { %1541 = vadd.xlane.f32.xlu1 %v2340_v61  ;;  %1507 = vadd.xlane.f32.xlu0 %v2342_v62  ;;  %v1362_v60 = vpop.xlane.xlu1 %1361  ;;  %v1360_v48 = vpop.xlane.xlu0 %1359 }
 0x322   : > { %2355 = vpow2.f32 %v1485_v42  ;;  %v3165_v29 = vsub.f32 %v3035_v14, %v1362_v60  ;;  %v3169_v30 = vsub.f32 %v3039_v15, %v1360_v48 }
 0x323   : > { %v2344_v7 = vpop.eup %2343  ;;  %2357 = vpow2.f32 %v1451_v40 }
 0x324   : > { %v2346_v8 = vpop.eup %2345  ;;  %v1457_v57 = vmul.f32 1.442695, %v3165_v29  ;;  %v1455_v5 = vmul.f32 1.442695, %v3169_v30 }
 0x325   : > { %1513 = vadd.xlane.f32.xlu1 %v2344_v7  ;;  %1539 = vadd.xlane.f32.xlu0 %v2346_v8  ;;  %v1394_v2 = vpop.xlane.xlu1 %1393  ;;  %v1392_v58 = vpop.xlane.xlu0 %1391 }
 0x326   : > { %2359 = vpow2.f32 %v1457_v57  ;;  %v3173_v37 = vsub.f32 %v3045_v16, %v1394_v2  ;;  %v3177_v38 = vsub.f32 %v3049_v19, %v1392_v58 }
 0x327   : > { %v2348_v14 = vpop.eup %2347  ;;  %2361 = vpow2.f32 %v1483_v50 }
 0x328   : > { %v2350_v15 = vpop.eup %2349  ;;  %v1489_v6 = vmul.f32 1.442695, %v3173_v37  ;;  %v1487_v9 = vmul.f32 1.442695, %v3177_v38 }
 0x329   : > { %1545 = vadd.xlane.f32.xlu1 %v2348_v14  ;;  %1511 = vadd.xlane.f32.xlu0 %v2350_v15 }
 0x32a   : > { %2363 = vpow2.f32 %v1489_v6 }
 0x32b   : > { %v2352_v4 = vpop.eup %2351  ;;  %2365 = vpow2.f32 %v1455_v5 }
 0x32c   : > { %v2354_v45 = vpop.eup %2353  ;;  %2367 = vpow2.f32 %v1487_v9 }
 0x32d   : > { %1517 = vadd.xlane.f32.xlu1 %v2352_v4  ;;  %1543 = vadd.xlane.f32.xlu0 %v2354_v45 }
 0x32f   : > { %v2356_v16 = vpop.eup %2355 }
 0x330   : > { %v2358_v13 = vpop.eup %2357 }
 0x331   : > { %1549 = vadd.xlane.f32.xlu1 %v2356_v16  ;;  %1515 = vadd.xlane.f32.xlu0 %v2358_v13 }
 0x333   : > { %v2360_v19 = vpop.eup %2359 }
 0x334   : > { %v2362_v46 = vpop.eup %2361 }
 0x335   : > { %1521 = vadd.xlane.f32.xlu1 %v2360_v19  ;;  %1547 = vadd.xlane.f32.xlu0 %v2362_v46 }
 0x337   : > { %v2364_v20 = vpop.eup %2363 }
 0x338   : > { %v2366_v25 = vpop.eup %2365 }
 0x339   : > { %1553 = vadd.xlane.f32.xlu1 %v2364_v20  ;;  %1519 = vadd.xlane.f32.xlu0 %v2366_v25  ;;  %v2368_v26 = vpop.eup %2367 }
 0x33d   : > { %1551 = vadd.xlane.f32.xlu0 %v2368_v26 }
 0x385   : > { %v1494_v53 = vpop.xlane.xlu1 %1493 }
 0x386   : > { %2369 = vlog2.f32 %v1494_v53 }
 0x389   : > { %v1526_v34 = vpop.xlane.xlu1 %1525  ;;  %v1492_v54 = vpop.xlane.xlu0 %1491 }
 0x38a   : > { %2371 = vlog2.f32 %v1526_v34 }
 0x38b   : > { %2373 = vlog2.f32 %v1492_v54 }
 0x38d   : > { %v1498_v43 = vpop.xlane.xlu1 %1497  ;;  %v1524_v33 = vpop.xlane.xlu0 %1523 }
 0x38e   : > { %2375 = vlog2.f32 %v1498_v43 }
 0x38f   : > { %2377 = vlog2.f32 %v1524_v33 }
 0x391   : > { %v1496_v61 = vpop.xlane.xlu0 %1495 }
 0x392   : > { %v1530_v44 = vpop.xlane.xlu1 %1529 }
 0x393   : > { %2379 = vlog2.f32 %v1530_v44  ;;  %v2370_v40 = vpop.eup %2369 }
 0x394   : > { %2381 = vlog2.f32 %v1496_v61  ;;  %v1558_v62 = vmul.f32 0.6931472, %v2370_v40 }
 0x396   : > { %v1502_v42 = vpop.xlane.xlu1 %1501  ;;  %v1528_v60 = vpop.xlane.xlu0 %1527  ;;  %v1620_v48 = vsub.f32 %v3057_v22, %v1558_v62 }
 0x397   : > { %2383 = vlog2.f32 %v1502_v42  ;;  %v2372_v7 = vpop.eup %2371 }
 0x398   : > { %2385 = vlog2.f32 %v1528_v60  ;;  %v2374_v50 = vpop.eup %2373  ;;  %1652 = vst [vmem:[%s2753_s0 + $0x8] sm:$0xff] %v1620_v48  ;;  %v1590_v8 = vmul.f32 0.6931472, %v2372_v7 }
 0x399   : > { %v1556_v57 = vmul.f32 0.6931472, %v2374_v50 }
 0x39a   : > { %v1534_v2 = vpop.xlane.xlu1 %1533  ;;  %v1500_v58 = vpop.xlane.xlu0 %1499  ;;  %v1636_v14 = vsub.f32 %v3054_v21, %v1590_v8 }
 0x39b   : > { %2387 = vlog2.f32 %v1534_v2  ;;  %v2376_v5 = vpop.eup %2375  ;;  %v1619_v15 = vsub.f32 %v3065_v31, %v1556_v57 }
 0x39c   : > { %2389 = vlog2.f32 %v1500_v58  ;;  %v2378_v22 = vpop.eup %2377  ;;  %1668 = vst [vmem:[%s2753_s0 + $0x88] sm:$0xff] %v1636_v14  ;;  %v1562_v6 = vmul.f32 0.6931472, %v2376_v5 }
 0x39d   : > { %1651 = vst [vmem:[%s2753_s0] sm:$0xff] %v1619_v15  ;;  %v1588_v4 = vmul.f32 0.6931472, %v2378_v22 }
 0x39e   : > { %v1506_v9 = vpop.xlane.xlu1 %1505  ;;  %v1532_v45 = vpop.xlane.xlu0 %1531  ;;  %v1622_v16 = vsub.f32 %v3062_v28, %v1562_v6 }
 0x39f   : > { %2391 = vlog2.f32 %v1506_v9  ;;  %v1635_v21 = vsub.f32 %v3070_v36, %v1588_v4 }
 0x3a0   : > { %v2380_v13 = vpop.eup %2379  ;;  %2393 = vlog2.f32 %v1532_v45  ;;  %1654 = vst [vmem:[%s2753_s0 + $0x18] sm:$0xff] %v1622_v16 }
 0x3a1   : > { %v2382_v19 = vpop.eup %2381  ;;  %v1594_v31 = vmul.f32 0.6931472, %v2380_v13  ;;  %1667 = vst [vmem:[%s2753_s0 + $0x80] sm:$0xff] %v1635_v21 }
 0x3a2   : > { %v1560_v46 = vmul.f32 0.6931472, %v2382_v19  ;;  %v1538_v20 = vpop.xlane.xlu1 %1537  ;;  %v1504_v25 = vpop.xlane.xlu0 %1503 }
 0x3a3   : > { %v1638_v26 = vsub.f32 %v3073_v39, %v1594_v31  ;;  %2395 = vlog2.f32 %v1538_v20 }
 0x3a4   : > { %v2384_v53 = vpop.eup %2383  ;;  %v1621_v28 = vsub.f32 %v3077_v41, %v1560_v46  ;;  %2397 = vlog2.f32 %v1504_v25 }
 0x3a5   : > { %v2386_v34 = vpop.eup %2385  ;;  %1670 = vst [vmem:[%s2753_s0 + $0x98] sm:$0xff] %v1638_v26  ;;  %v1566_v36 = vmul.f32 0.6931472, %v2384_v53 }
 0x3a6   : > { %1653 = vst [vmem:[%s2753_s0 + $0x10] sm:$0xff] %v1621_v28  ;;  %v1592_v54 = vmul.f32 0.6931472, %v2386_v34  ;;  %v1510_v43 = vpop.xlane.xlu1 %1509  ;;  %v1536_v33 = vpop.xlane.xlu0 %1535 }
 0x3a7   : > { %v1624_v44 = vsub.f32 %v3085_v55, %v1566_v36  ;;  %2399 = vlog2.f32 %v1510_v43 }
 0x3a8   : > { %v2388_v61 = vpop.eup %2387  ;;  %v1637_v39 = vsub.f32 %v3081_v47, %v1592_v54  ;;  %2401 = vlog2.f32 %v1536_v33 }
 0x3a9   : > { %v2390_v40 = vpop.eup %2389  ;;  %1656 = vst [vmem:[%s2753_s0 + $0x28] sm:$0xff] %v1624_v44  ;;  %v1598_v41 = vmul.f32 0.6931472, %v2388_v61 }
 0x3aa   : > { %1669 = vst [vmem:[%s2753_s0 + $0x90] sm:$0xff] %v1637_v39  ;;  %v1564_v62 = vmul.f32 0.6931472, %v2390_v40  ;;  %v1542_v42 = vpop.xlane.xlu1 %1541  ;;  %v1508_v60 = vpop.xlane.xlu0 %1507 }
 0x3ab   : > { %v1640_v48 = vsub.f32 %v3093_v59, %v1598_v41  ;;  %2403 = vlog2.f32 %v1542_v42 }
 0x3ac   : > { %v2392_v7 = vpop.eup %2391  ;;  %v1623_v55 = vsub.f32 %v3089_v1, %v1564_v62  ;;  %2405 = vlog2.f32 %v1508_v60 }
 0x3ad   : > { %v2394_v50 = vpop.eup %2393  ;;  %1672 = vst [vmem:[%s2753_s0 + $0xa8] sm:$0xff] %v1640_v48  ;;  %v1570_v47 = vmul.f32 0.6931472, %v2392_v7 }
 0x3ae   : > { %1655 = vst [vmem:[%s2753_s0 + $0x20] sm:$0xff] %v1623_v55  ;;  %v1596_v8 = vmul.f32 0.6931472, %v2394_v50  ;;  %v1514_v57 = vpop.xlane.xlu1 %1513  ;;  %v1540_v2 = vpop.xlane.xlu0 %1539 }
 0x3af   : > { %v1626_v58 = vsub.f32 %v3101_v10, %v1570_v47  ;;  %2407 = vlog2.f32 %v1514_v57 }
 0x3b0   : > { %v2396_v14 = vpop.eup %2395  ;;  %v1639_v59 = vsub.f32 %v3097_v0, %v1596_v8  ;;  %2409 = vlog2.f32 %v1540_v2 }
 0x3b1   : > { %v2398_v5 = vpop.eup %2397  ;;  %1658 = vst [vmem:[%s2753_s0 + $0x38] sm:$0xff] %v1626_v58  ;;  %v1602_v1 = vmul.f32 0.6931472, %v2396_v14 }
 0x3b2   : > { %1671 = vst [vmem:[%s2753_s0 + $0xa0] sm:$0xff] %v1639_v59  ;;  %v1568_v15 = vmul.f32 0.6931472, %v2398_v5  ;;  %v1546_v22 = vpop.xlane.xlu1 %1545  ;;  %v1512_v6 = vpop.xlane.xlu0 %1511 }
 0x3b3   : > { %v1642_v4 = vsub.f32 %v3109_v27, %v1602_v1  ;;  %2411 = vlog2.f32 %v1546_v22 }
 0x3b4   : > { %v2400_v9 = vpop.eup %2399  ;;  %v1625_v10 = vsub.f32 %v3105_v35, %v1568_v15  ;;  %2413 = vlog2.f32 %v1512_v6 }
 0x3b5   : > { %v2402_v45 = vpop.eup %2401  ;;  %1674 = vst [vmem:[%s2753_s0 + $0xb8] sm:$0xff] %v1642_v4  ;;  %v1574_v0 = vmul.f32 0.6931472, %v2400_v9 }
 0x3b6   : > { %1657 = vst [vmem:[%s2753_s0 + $0x30] sm:$0xff] %v1625_v10  ;;  %v1600_v16 = vmul.f32 0.6931472, %v2402_v45  ;;  %v1518_v13 = vpop.xlane.xlu1 %1517  ;;  %v1544_v21 = vpop.xlane.xlu0 %1543 }
 0x3b7   : > { %v1628_v19 = vsub.f32 %v3117_v51, %v1574_v0  ;;  %2415 = vlog2.f32 %v1518_v13 }
 0x3b8   : > { %v2404_v31 = vpop.eup %2403  ;;  %v1641_v27 = vsub.f32 %v3113_v32, %v1600_v16  ;;  %2417 = vlog2.f32 %v1544_v21 }
 0x3b9   : > { %v2406_v46 = vpop.eup %2405  ;;  %1660 = vst [vmem:[%s2753_s0 + $0x48] sm:$0xff] %v1628_v19  ;;  %v1606_v35 = vmul.f32 0.6931472, %v2404_v31 }
 0x3ba   : > { %1673 = vst [vmem:[%s2753_s0 + $0xb0] sm:$0xff] %v1641_v27  ;;  %v1572_v20 = vmul.f32 0.6931472, %v2406_v46  ;;  %v1550_v25 = vpop.xlane.xlu1 %1549  ;;  %v1516_v26 = vpop.xlane.xlu0 %1515 }
 0x3bb   : > { %v1644_v53 = vsub.f32 %v3125_v49, %v1606_v35  ;;  %2419 = vlog2.f32 %v1550_v25 }
 0x3bc   : > { %v2408_v28 = vpop.eup %2407  ;;  %v1627_v51 = vsub.f32 %v3121_v52, %v1572_v20  ;;  %2421 = vlog2.f32 %v1516_v26 }
 0x3bd   : > { %v2410_v34 = vpop.eup %2409  ;;  %1676 = vst [vmem:[%s2753_s0 + $0xc8] sm:$0xff] %v1644_v53  ;;  %v1578_v32 = vmul.f32 0.6931472, %v2408_v28 }
 0x3be   : > { %1659 = vst [vmem:[%s2753_s0 + $0x40] sm:$0xff] %v1627_v51  ;;  %v1604_v36 = vmul.f32 0.6931472, %v2410_v34  ;;  %v1522_v54 = vpop.xlane.xlu1 %1521  ;;  %v1548_v43 = vpop.xlane.xlu0 %1547 }
 0x3bf   : > { %v1630_v33 = vsub.f32 %v3133_v63, %v1578_v32  ;;  %2423 = vlog2.f32 %v1522_v54 }
 0x3c0   : > { %v2412_v44 = vpop.eup %2411  ;;  %v1643_v49 = vsub.f32 %v3129_v56, %v1604_v36  ;;  %2425 = vlog2.f32 %v1548_v43 }
 0x3c1   : > { %v2414_v61 = vpop.eup %2413  ;;  %1662 = vst [vmem:[%s2753_s0 + $0x58] sm:$0xff] %v1630_v33  ;;  %v1610_v52 = vmul.f32 0.6931472, %v2412_v44 }
 0x3c2   : > { %1675 = vst [vmem:[%s2753_s0 + $0xc0] sm:$0xff] %v1643_v49  ;;  %v1576_v39 = vmul.f32 0.6931472, %v2414_v61  ;;  %v1554_v40 = vpop.xlane.xlu1 %1553  ;;  %v1520_v41 = vpop.xlane.xlu0 %1519 }
 0x3c3   : > { %v1646_v62 = vsub.f32 %v3141_v11, %v1610_v52  ;;  %2427 = vlog2.f32 %v1554_v40 }
 0x3c4   : > { %v2416_v42 = vpop.eup %2415  ;;  %v1629_v63 = vsub.f32 %v3137_v3, %v1576_v39  ;;  %2429 = vlog2.f32 %v1520_v41 }
 0x3c5   : > { %v2418_v60 = vpop.eup %2417  ;;  %1678 = vst [vmem:[%s2753_s0 + $0xd8] sm:$0xff] %v1646_v62  ;;  %v1582_v56 = vmul.f32 0.6931472, %v2416_v42 }
 0x3c6   : > { %1661 = vst [vmem:[%s2753_s0 + $0x50] sm:$0xff] %v1629_v63  ;;  %v1608_v48 = vmul.f32 0.6931472, %v2418_v60  ;;  %v1552_v7 = vpop.xlane.xlu0 %1551 }
 0x3c7   : > { %v1632_v55 = vsub.f32 %v3149_v17, %v1582_v56  ;;  %2431 = vlog2.f32 %v1552_v7 }
 0x3c8   : > { %v2420_v50 = vpop.eup %2419  ;;  %v1645_v11 = vsub.f32 %v3145_v12, %v1608_v48 }
 0x3c9   : > { %v2422_v47 = vpop.eup %2421  ;;  %1664 = vst [vmem:[%s2753_s0 + $0x68] sm:$0xff] %v1632_v55  ;;  %v1614_v8 = vmul.f32 0.6931472, %v2420_v50 }
 0x3ca   : > { %1677 = vst [vmem:[%s2753_s0 + $0xd0] sm:$0xff] %v1645_v11  ;;  %v1580_v3 = vmul.f32 0.6931472, %v2422_v47 }
 0x3cb   : > { %v1648_v57 = vsub.f32 %v3157_v23, %v1614_v8 }
 0x3cc   : > { %v2424_v2 = vpop.eup %2423  ;;  %v1631_v58 = vsub.f32 %v3153_v18, %v1580_v3 }
 0x3cd   : > { %v2426_v14 = vpop.eup %2425  ;;  %1680 = vst [vmem:[%s2753_s0 + $0xe8] sm:$0xff] %v1648_v57  ;;  %v1586_v17 = vmul.f32 0.6931472, %v2424_v2 }
 0x3ce   : > { %1663 = vst [vmem:[%s2753_s0 + $0x60] sm:$0xff] %v1631_v58  ;;  %v1612_v59 = vmul.f32 0.6931472, %v2426_v14 }
 0x3cf   : > { %v1634_v12 = vsub.f32 %v3165_v29, %v1586_v17 }
 0x3d0   : > { %v2428_v5 = vpop.eup %2427  ;;  %v1647_v1 = vsub.f32 %v3161_v24, %v1612_v59 }
 0x3d1   : > { %v2430_v15 = vpop.eup %2429  ;;  %1666 = vst [vmem:[%s2753_s0 + $0x78] sm:$0xff] %v1634_v12  ;;  %v1618_v22 = vmul.f32 0.6931472, %v2428_v5 }
 0x3d2   : > { %1679 = vst [vmem:[%s2753_s0 + $0xe0] sm:$0xff] %v1647_v1  ;;  %v1584_v23 = vmul.f32 0.6931472, %v2430_v15 }
 0x3d3   : > { %v1650_v18 = vsub.f32 %v3173_v37, %v1618_v22 }
 0x3d4   : > { %v2432_v6 = vpop.eup %2431  ;;  %v1633_v4 = vsub.f32 %v3169_v30, %v1584_v23 }
 0x3d5   : > { %1682 = vst [vmem:[%s2753_s0 + $0xf8] sm:$0xff] %v1650_v18  ;;  %v1616_v9 = vmul.f32 0.6931472, %v2432_v6 }
 0x3d6   : > { %1665 = vst [vmem:[%s2753_s0 + $0x70] sm:$0xff] %v1633_v4 }
 0x3d7   : > { %v1649_v10 = vsub.f32 %v3177_v38, %v1616_v9 }
 0x3d9   : > { %1681 = vst [vmem:[%s2753_s0 + $0xf0] sm:$0xff] %v1649_v10 }
 0x3da PF: > { %s1862_s13 = sshll.u32 %s2529_s21, 12  ;;  %s1697_s8 = sshll.u32 %s2753_s0, 4  ;;  %s3252_s8 = int_to_ptr.vmem [resolvable:$true] %s1697_s8 }
 0x3db   : > { %s3249_s30 = scalar_lea.hbm %s3317_s4, %s1862_s13  ;;  %s3256_s20 = scalar_lea.sflag [#allocation5], %s386_s14 }
 0x3dc   : > { %s2433_s9 = scalar_lea.vmem %s3252_s8, 4096  ;;  %s2544_s21 = smov [#allocation4]  }
 0x3dd   : > { %p2434_p6 = scmp.ne.s32.totalorder %s3252_s8, %s2433_s9  ;;  %s2437_s6 = sshll.u32 %s2544_s21, 4  ;;  %s2438_s6 = int_to_ptr.vmem [resolvable:$false] %s2437_s6 }
 0x3de   : > { %s2439_s29 = scalar_lea.vmem %s2438_s6, 8192  ;;  %p2440_p10 = scmp.lt.s32.totalorder %s3252_s8, %s2438_s6 }
 0x3df   : > { %p2435_p8 = pnand %p2434_p6, %p2644_p7  ;;  %p2441_p11 = scmp.lt.s32.totalorder %s2439_s29, %s2433_s9 }
 0x3e1   : > { %p2436_p9 = pneg %p2435_p8  ;;  %p2442_p13 = por %p2441_p11, %p2440_p10 }
 0x3e3   : > { %p2443_p0 = pnand %p2442_p13, %p2436_p9 }
 0x3e5   : > { %2446 = shalt.err (!%p2443_p0)
}
 0x3e6   : > { %s2447_s0 = scalar_lea.hbm %s3249_s30, 4096  ;;  %s2451_s18 = scalar_lea.hbm %s3317_s4, 8192 }
 0x3e7   : > { %p2448_p1 = scmp.ne.s32.totalorder %s3249_s30, %s2447_s0  ;;  %p2452_p4 = scmp.lt.s32.totalorder %s3249_s30, %s3317_s4 }
 0x3e8   : > { %p2453_p5 = scmp.lt.s32.totalorder %s2451_s18, %s2447_s0 }
 0x3e9   : > { %p2449_p2 = pnand %p2448_p1, %p2644_p7 }
 0x3ea   : > { %p2454_p6 = por %p2453_p5, %p2452_p4 }
 0x3eb   : > { %p2450_p3 = pneg %p2449_p2 }
 0x3ed   : > { %p2455_p8 = pnand %p2454_p6, %p2450_p3 }
 0x3ef   : > { %2458 = shalt.err (!%p2455_p8)
}
 0x3f0   : > { %s2545_s26 = smov 128   ;;  %s2546_s9 = smov 8  }
 0x3f1   : > { %2151 = dma.vmem_to_hbm [thread:$0]  (%p2644_p7), %s3252_s8, 4096, %s3249_s30, %s3256_s20, %s2545_s26, %s2545_s26, %s2546_s9  }
 0x3f2 PF: > { %p2157_p9 = scmp.ge.s32.totalorder %s2541_s24, 2  ;;  %s1712_s21 = sand.u32 1, %s2505_s15  }
 0x3f3   : > { %s1713_s6 = scalar_lea.sflag [#allocation5], %s1712_s21 }
 0x3f4   : > { %p2154_p10 = pnand %p2157_p9, %p2652_p12 }
 0x3f6   : > { %p2155_p11 = pneg %p2154_p10 }
 0x3f8   : > { %2500 = dma.done.wait (%p2155_p11), %s1713_s6, 4096  }
 0x3f9   : > { %2502 = vsyncadd (%p2155_p11), %s1713_s6, 4294963200  ;;  %s17_s24 = sadd.s32 1, %s2541_s24   ;;  %s3323_s15 = smov %s2509_s16 }
 0x3fa   : > { %p14_p13 = scmp.ge.s32.totalorder %s17_s24, 6   ;;  %s3324_s16 = smov %s2513_s17 }
 0x3fb   : > { %s3325_s17 = smov %s2657_s11  ;;  %s3326_s18 = smov %s2521_s19 }
 0x3fc   : > { %s3327_s19 = smov %s2660_s12  ;;  %s3328_s20 = smov %s2533_s22 }
 0x3fd   : > { %s3329_s21 = smov %s2537_s23  ;;  %s3330_s22 = smov %s3333_s27 }
 0x3fe   : > { %s3331_s23 = smov %s3337_s28  ;;  %16 = sbr.rel (!%p14_p13) target bundleno = 8 (0x8), region = 125 }
 0x403   :  { %1718 = vsyncpa [#allocation5], 1 }
 0x404   :  { %1720 = vsyncpa [#allocation5 + $0x1], 1 }

// kernel: gcn_forward.2
= control target key start
LH: loop header
LB: loop body
LE: loop exit
PB: predicated region body
PF: predicated region fallthrough
CT: control target
= control target key end

     0   :  { %s2779_s0 = inlined_call_operand.hbm [shape: bf16[512,512], index: 0, kind: input, shape index: {}]   ;;  %s2780_s1 = inlined_call_operand.vmem [shape: bf16[512,32], index: 1, kind: input, shape index: {}]   ;;  %s2781_s2 = inlined_call_operand.hbm [shape: f32[32,128], index: 2, kind: input, shape index: {}]   ;;  %s2782_s3 = inlined_call_operand.hbm [shape: f32[1,128], index: 3, kind: input, shape index: {}]   ;;  %s2783_s4 = inlined_call_operand.vmem [shape: bf16[512,128], index: 4, kind: output, shape index: {}]  }
   0x1   :  { %2791 = sst [smem:[#allocation13_spill]] %s2781_s2 }
   0x2   :  { %2792 = sst [smem:[#allocation14_spill]] %s2782_s3 }
   0x3   :  { %9 = vsyncpa [#allocation4], 0 }
   0x4   :  { %11 = vsyncpa [#allocation4 + $0x1], 0 }
   0x5   :  { %12 = vsyncpa [#allocation6], 0  ;;  %s2412_s15 = smov 0   ;;  %s2414_s16 = smov 0  }
   0x6   :  { %s2416_s17 = smov 0   ;;  %s2418_s18 = smov 0  }
   0x7   :  { %s2420_s19 = smov 0   ;;  %s2422_s20 = smov 0  }
   0x8   :  { %s2424_s21 = smov 0   ;;  %s2426_s22 = smov 0  }
   0x9 LB: > { %2793 = sst [smem:[#allocation10_spill]] %s2370_s20  ;;  %s1576_s23 = sadd.s32 4294967295, %s2378_s22   ;;  %s2378_s22 = sphi %s2426_s22, %s18_s22   ;;  %s2374_s21 = sphi %s2424_s21, %s2814_s21   ;;  %s2370_s20 = sphi %s2422_s20, %s2809_s20   ;;  %s2366_s19 = sphi %s2420_s19, %s2813_s19   ;;  %s2362_s18 = sphi %s2418_s18, %s2808_s18   ;;  %s2358_s17 = sphi %s2416_s17, %s2812_s17   ;;  %s2354_s16 = sphi %s2414_s16, %s2811_s16   ;;  %s2350_s15 = sphi %s2412_s15, %s2810_s15  }
   0xa   : > { %2794 = sst [smem:[#allocation11_spill]] %s2378_s22  ;;  %p46_p0 = scmp.ne.s32.totalorder %s2358_s17, %s2354_s16 }
   0xb   : > { %p47_p1 = scmp.eq.s32.totalorder %s2378_s22, 0  ;;  %p52_p2 = scmp.ne.s32.totalorder %s2354_s16, %s2350_s15 }
   0xc   : > { %p2456_p3 = scmp.eq.s32.totalorder %s1576_s23, 0  ;;  %p1578_p5 = scmp.ge.s32.totalorder %s2378_s22, 1 }
   0xd   : > { %p48_p4 = por %p47_p1, %p46_p0  ;;  %p157_p7 = scmp.lt.s32.totalorder %s2378_s22, 5 }
   0xe   : > { %s2795_s25 = scalar_select %p2456_p3, 1, 0 }
   0xf   : > { %p2463_p6 = por %p2456_p3, %p52_p2  ;;  %p2468_p8 = pnand %p1578_p5, %p157_p7 }
  0x10   : > { %s2380_s28 = smov [#allocation5]   ;;  %p2091_p10 = scmp.lt.s32.totalorder %s2378_s22, 4 }
  0x11   : > { %s169_s29 = sshll.u32 %s2380_s28, 4  ;;  %p2078_p9 = pneg %p2468_p8  ;;  %s170_s29 = int_to_ptr.vmem [resolvable:$true] %s169_s29 }
  0x12   : > { %p2481_p12 = pnand %p2091_p10, %p48_p4  ;;  %s2381_s6 = smov [#allocation7]  }
  0x13   : > { %p2477_p11 = pnand %p2078_p9, %p2456_p3  ;;  %s183_s7 = sshll.u32 %s2381_s6, 4  ;;  %s184_s7 = int_to_ptr.vmem [resolvable:$true] %s183_s7 }
  0x14   : > { %s2239_s8 = scalar_lea.vmem %s170_s29, 512  ;;  %p2247_p5 = scmp.lt.s32.totalorder %s170_s29, %s170_s29 }
  0x15   : > { %p2230_p13 = pneg %p2477_p11  ;;  %p2240_p0 = scmp.ne.s32.totalorder %s170_s29, %s2239_s8 }
  0x16   : > { %p2248_p7 = scmp.lt.s32.totalorder %s2239_s8, %s2239_s8 }
  0x17   : > { %p2242_p1 = pnand %p2240_p0, %p2230_p13 }
  0x18   : > { %p2249_p9 = por %p2248_p7, %p2247_p5 }
  0x19   : > { %p2243_p2 = pneg %p2242_p1 }
  0x1b   : > { %p2250_p3 = pnand %p2249_p9, %p2243_p2 }
  0x1d   : > { %2253 = shalt.err (!%p2250_p3)
}
  0x1e   : > { %s2786_s9 = smov 128   ;;  %s2787_s10 = smov 8  }
  0x1f   : > { %s2800_s2 = sld [smem:[#allocation13_spill]]  ;;  %s2265_s13 = scalar_lea.vmem %s184_s7, 16 }
  0x20   : > { %p2266_p4 = scmp.ne.s32.totalorder %s184_s7, %s2265_s13  ;;  %s2272_s14 = scalar_lea.vmem %s184_s7, 32 }
  0x21   : > { %p2273_p3 = scmp.lt.s32.totalorder %s184_s7, %s184_s7  ;;  %p2274_p1 = scmp.lt.s32.totalorder %s2272_s14, %s2265_s13 }
  0x22   : > { %p2268_p10 = pnand %p2266_p4, %p2230_p13 }
  0x23   : > { %p2275_p2 = por %p2274_p1, %p2273_p3 }
  0x24   : > { %p2269_p0 = pneg %p2268_p10 }
  0x25   : > { %2081 = dma.hbm_to_vmem [thread:$0]  (!%p2477_p11), %s2800_s2, 512, %s170_s29, [#allocation6], %s2786_s9, %s2786_s9, %s2787_s10  }
  0x26   : > { %p2276_p5 = pnand %p2275_p2, %p2269_p0 }
  0x28   : > { %2279 = shalt.err (!%p2276_p5)
}
  0x29   : > { %s2801_s3 = sld [smem:[#allocation14_spill]]  ;;  %s27_s28 = sadd.s32 1, %s2370_s20 }
  0x2a   : > { %p28_p13 = scmp.ge.s32.totalorder %s27_s28, 2  ;;  %s30_s29 = sadd.s32 1, %s2374_s21 }
  0x2b   : > { %s194_s6 = sand.u32 1, %s2358_s17   ;;  %s1584_s8 = sshll.u32 %s2370_s20, 1 }
  0x2c   : > { %s2816_s28 = smov (%p28_p13, %s27_s28), 0  ;;  %s2818_s29 = smov (!%p28_p13, %s30_s29), %s2374_s21 }
  0x2d   : > { %2802 = sst [smem:[#allocation12_spill]] %s2816_s28  ;;  %s35_s30 = ssub.s32 %s2370_s20, %s2816_s28 }
  0x2e   : > { %p32_p7 = scmp.ge.s32.totalorder %s2818_s29, 2  ;;  %s1582_s11 = sshll.u32 %s194_s6, 8 }
  0x2f   : > { %2084 = dma.hbm_to_vmem [thread:$0]  (!%p2477_p11), %s2801_s3, 16, %s184_s7, [#allocation6]  }
  0x30   : > { %s1712_s12 = sshll.u32 %s2374_s21, 7  ;;  %s2820_s29 = smov (%p32_p7, %s2818_s29), 0 }
  0x31   : > { %s205_s7 = sadd.s32 %s1712_s12, %s1584_s8  ;;  %s198_s13 = scalar_lea.vmem [#allocation3], %s1582_s11 }
  0x32   : > { %s208_s14 = sshll.u32 %s198_s13, 4  ;;  %s34_s15 = ssub.s32 %s2374_s21, %s2820_s29  ;;  %s209_s14 = int_to_ptr.vmem [resolvable:$true] %s208_s14 }
  0x33   : > { %s1586_s23 = sshll.u32 %s205_s7, 6  ;;  %s36_s9 = sor.u32 %s35_s30, %s34_s15 }
  0x34   : > { %s207_s2 = scalar_lea.hbm %s2779_s0, %s1586_s23  ;;  %p37_p11 = scmp.eq.s32.totalorder %s36_s9, 0 }
  0x35   : > { %s2803_s3 = sadd.s32 1, %s2358_s17  ;;  %s195_s20 = scalar_lea.sflag [#allocation4], %s194_s6 }
  0x36   : > { %s2526_s28 = scalar_select %p37_p11, %s2358_s17, %s2803_s3  }
  0x37   : > { %p2282_p9 = pneg %p2481_p12  ;;  %s2293_s22 = scalar_lea.vmem %s209_s14, 4096 }
  0x38   : > { %p2294_p4 = scmp.ne.s32.totalorder %s209_s14, %s2293_s22  ;;  %s2384_s8 = smov [#allocation3]  }
  0x39   : > { %s2298_s11 = sshll.u32 %s2384_s8, 4  ;;  %s2299_s11 = int_to_ptr.vmem [resolvable:$false] %s2298_s11 }
  0x3a   : > { %p2296_p10 = pnand %p2294_p4, %p2282_p9  ;;  %s2300_s30 = scalar_lea.vmem %s2299_s11, 8192 }
  0x3b   : > { %p2301_p3 = scmp.lt.s32.totalorder %s209_s14, %s2299_s11  ;;  %p2302_p1 = scmp.lt.s32.totalorder %s2300_s30, %s2293_s22 }
  0x3c   : > { %p2297_p0 = pneg %p2296_p10 }
  0x3d   : > { %p2303_p2 = por %p2302_p1, %p2301_p3 }
  0x3f   : > { %p2304_p5 = pnand %p2303_p2, %p2297_p0 }
  0x41   : > { %2307 = shalt.err (!%p2304_p5)
}
  0x42   : > { %s2385_s24 = smov 256   ;;  %s2804_s3 = smov 8  }
  0x43   : > { %s2805_s9 = smov 128   ;;  %229 = sbr.rel (%p2468_p8) target bundleno = 637 (0x27d), region = 36 }
  0x44   : > { %2088 = dma.hbm_to_vmem [thread:$0]  (!%p2481_p12), %s207_s2, 4096, %s209_s14, %s195_s20, %s2385_s24, %s2805_s9, %s2804_s3  }
  0x45   : > { %s231_s10 = sand.u32 (!%p2468_p8), 1, %s2354_s16  }
  0x46   : > { %s1588_s6 = sshll.u32 (!%p2468_p8), %s231_s10, 8  ;;  %s232_s12 = scalar_lea.sflag (!%p2468_p8), [#allocation4], %s231_s10 }
  0x47   : > { %s2537_s7 = scalar_lea.vmem (!%p2468_p8), [#allocation3], %s1588_s6 }
  0x48   : > { %2341 = dma.done.wait (%p2463_p6), %s232_s12, 4096  }
  0x49   : > { %2343 = vsyncadd (%p2463_p6), %s232_s12, 4294963200  ;;  %p2806_p13 = scmp.ne.s32.totalorder %s2795_s25, 0 }
  0x4b   : > { %2345 = dma.done.wait (%p2806_p13), [#allocation6], 528  }
  0x4c   : > { %2347 = vsyncadd (%p2806_p13), [#allocation6], 4294966768  ;;  %s1591_s2 = sshll.u32 %s2362_s18, 5  ;;  %s1593_s20 = sshll.u32 %s2366_s19, 5 }
  0x4d   : > { %p276_p8 = scmp.lt.s32.totalorder %s1591_s2, 63  ;;  %p282_p12 = scmp.lt.s32.totalorder %s1593_s20, 63 }
  0x4e   : > { %p1595_p6 = scmp.ne.s32.totalorder %s2362_s18, 0 }
  0x4f   : > { %s2822_s2 = smov (!%p276_p8, %s1591_s2), 63  ;;  %s2824_s20 = smov (!%p282_p12, %s1593_s20), 63 }
  0x50   : > { %s1592_s22 = sshll.u32 %s2822_s2, 2  ;;  %s1594_s13 = sshll.u32 %s2824_s20, 2 }
  0x51   : > { %s2552_s26 = scalar_lea.vmem %s2780_s1, %s1592_s22  ;;  %s2557_s25 = scalar_lea.vmem %s2783_s4, %s1594_s13 }
  0x52   : > { %291 = sbr.rel (%p1595_p6) target bundleno = 104 (0x68), region = 52 }
  0x57   : > { %vm292_vm0 = vcmask 261120   ;;  %v2386_v0 = vmov 0.0  }
  0x58   : > { %293 = vst.msk [vmem:[#allocation2] sm:$0xff] %vm292_vm0, %v2386_v0  ;;  %294 = vst.msk [vmem:[#allocation2 + $0x8] sm:$0xff] %vm292_vm0, %v2386_v0 }
  0x59   : > { %295 = vst.msk [vmem:[#allocation2 + $0x10] sm:$0xff] %vm292_vm0, %v2386_v0  ;;  %296 = vst.msk [vmem:[#allocation2 + $0x18] sm:$0xff] %vm292_vm0, %v2386_v0 }
  0x5a   : > { %297 = vst.msk [vmem:[#allocation2 + $0x20] sm:$0xff] %vm292_vm0, %v2386_v0  ;;  %298 = vst.msk [vmem:[#allocation2 + $0x28] sm:$0xff] %vm292_vm0, %v2386_v0 }
  0x5b   : > { %299 = vst.msk [vmem:[#allocation2 + $0x30] sm:$0xff] %vm292_vm0, %v2386_v0  ;;  %300 = vst.msk [vmem:[#allocation2 + $0x38] sm:$0xff] %vm292_vm0, %v2386_v0 }
  0x5c   : > { %301 = vst.msk [vmem:[#allocation2 + $0x40] sm:$0xff] %vm292_vm0, %v2386_v0  ;;  %302 = vst.msk [vmem:[#allocation2 + $0x48] sm:$0xff] %vm292_vm0, %v2386_v0 }
  0x5d   : > { %303 = vst.msk [vmem:[#allocation2 + $0x50] sm:$0xff] %vm292_vm0, %v2386_v0  ;;  %304 = vst.msk [vmem:[#allocation2 + $0x58] sm:$0xff] %vm292_vm0, %v2386_v0 }
  0x5e   : > { %305 = vst.msk [vmem:[#allocation2 + $0x60] sm:$0xff] %vm292_vm0, %v2386_v0  ;;  %306 = vst.msk [vmem:[#allocation2 + $0x68] sm:$0xff] %vm292_vm0, %v2386_v0 }
  0x5f   : > { %307 = vst.msk [vmem:[#allocation2 + $0x70] sm:$0xff] %vm292_vm0, %v2386_v0  ;;  %308 = vst.msk [vmem:[#allocation2 + $0x78] sm:$0xff] %vm292_vm0, %v2386_v0 }
  0x60   : > { %309 = vst.msk [vmem:[#allocation2 + $0x80] sm:$0xff] %vm292_vm0, %v2386_v0  ;;  %310 = vst.msk [vmem:[#allocation2 + $0x88] sm:$0xff] %vm292_vm0, %v2386_v0 }
  0x61   : > { %311 = vst.msk [vmem:[#allocation2 + $0x90] sm:$0xff] %vm292_vm0, %v2386_v0  ;;  %312 = vst.msk [vmem:[#allocation2 + $0x98] sm:$0xff] %vm292_vm0, %v2386_v0 }
  0x62   : > { %313 = vst.msk [vmem:[#allocation2 + $0xa0] sm:$0xff] %vm292_vm0, %v2386_v0  ;;  %314 = vst.msk [vmem:[#allocation2 + $0xa8] sm:$0xff] %vm292_vm0, %v2386_v0 }
  0x63   : > { %315 = vst.msk [vmem:[#allocation2 + $0xb0] sm:$0xff] %vm292_vm0, %v2386_v0  ;;  %316 = vst.msk [vmem:[#allocation2 + $0xb8] sm:$0xff] %vm292_vm0, %v2386_v0 }
  0x64   : > { %317 = vst.msk [vmem:[#allocation2 + $0xc0] sm:$0xff] %vm292_vm0, %v2386_v0  ;;  %318 = vst.msk [vmem:[#allocation2 + $0xc8] sm:$0xff] %vm292_vm0, %v2386_v0 }
  0x65   : > { %319 = vst.msk [vmem:[#allocation2 + $0xd0] sm:$0xff] %vm292_vm0, %v2386_v0  ;;  %320 = vst.msk [vmem:[#allocation2 + $0xd8] sm:$0xff] %vm292_vm0, %v2386_v0 }
  0x66   : > { %321 = vst.msk [vmem:[#allocation2 + $0xe0] sm:$0xff] %vm292_vm0, %v2386_v0  ;;  %322 = vst.msk [vmem:[#allocation2 + $0xe8] sm:$0xff] %vm292_vm0, %v2386_v0 }
  0x67   : > { %323 = vst.msk [vmem:[#allocation2 + $0xf0] sm:$0xff] %vm292_vm0, %v2386_v0  ;;  %324 = vst.msk [vmem:[#allocation2 + $0xf8] sm:$0xff] %vm292_vm0, %v2386_v0 }
  0x68 PF: > { %v2164_v1 = vld [vmem:[%s2552_s26 + $0x78] sm:$0xff]   ;;  %v2166_v3 = vld [vmem:[%s2552_s26 + $0x70] sm:$0xff]   ;;  %v2168_v5 = vld [vmem:[%s2552_s26 + $0x68] sm:$0xff]   ;;  %vm870_vm1 = vcmask 261120   ;;  %p1644_p7 = scmp.ne.s32.totalorder %s2362_s18, 1 }
  0x69   : > { %v2165_v2 = vld [vmem:[%s2552_s26 + $0x38] sm:$0xff]   ;;  %1840 = vmatprep.subr.bf16.mxu0 %v2164_v1  ;;  %2044 = vmatprep.subr.bf16.mxu1 %v2164_v1  ;;  %v2167_v4 = vld [vmem:[%s2552_s26 + $0x30] sm:$0xff]   ;;  %v2169_v6 = vld [vmem:[%s2552_s26 + $0x28] sm:$0xff]  }
  0x6a   : > { %1841 = vmatpush3.bf16.msra.mxu0 %v2165_v2  ;;  %2052 = vmatpush3.bf16.msra.mxu1 %v2165_v2  ;;  %v2170_v7 = vld [vmem:[%s2552_s26 + $0x60] sm:$0xff]   ;;  %v2172_v9 = vld [vmem:[%s2552_s26 + $0x58] sm:$0xff]   ;;  %v2174_v11 = vld [vmem:[%s2552_s26 + $0x50] sm:$0xff]  }
  0x6b   : > { %1842 = vmatprep.subr.bf16.mxu0 %v2166_v3  ;;  %2045 = vmatprep.subr.bf16.mxu1 %v2166_v3  ;;  %v2171_v8 = vld [vmem:[%s2552_s26 + $0x20] sm:$0xff]   ;;  %v2173_v10 = vld [vmem:[%s2552_s26 + $0x18] sm:$0xff]   ;;  %v2175_v14 = vld [vmem:[%s2552_s26 + $0x10] sm:$0xff]  }
  0x6c   : > { %v2182_v12 = vld [vmem:[%s2537_s7 + $0x4] ss:$8 sps:$4 sm:$0xff]   ;;  %v2180_v19 = vld [vmem:[%s2537_s7] ss:$8 sps:$4 sm:$0xff]   ;;  %v2186_v21 = vld [vmem:[%s2537_s7 + $0x14] ss:$8 sps:$4 sm:$0xff]  }
  0x6d   : > { %v2185_v13 = vld [vmem:[%s2537_s7 + $0x84] ss:$8 sps:$4 sm:$0xff]   ;;  %709 = vmatprep.mubr.bf16.mxu0 %v2182_v12  ;;  %v2183_v20 = vld [vmem:[%s2537_s7 + $0x80] ss:$8 sps:$4 sm:$0xff]   ;;  %v2188_v22 = vld [vmem:[%s2537_s7 + $0x94] ss:$8 sps:$4 sm:$0xff]  }
  0x6e   : > { %1843 = vmatpush3.bf16.msra.mxu0 %v2167_v4  ;;  %2053 = vmatpush3.bf16.msra.mxu1 %v2167_v4  ;;  %v2176_v15 = vld [vmem:[%s2552_s26 + $0x48] sm:$0xff]   ;;  %v2178_v17 = vld [vmem:[%s2552_s26 + $0x40] sm:$0xff]   ;;  %v2190_v23 = vld [vmem:[%s2537_s7 + $0x10] ss:$8 sps:$4 sm:$0xff]  }
  0x6f   : > { %1844 = vmatprep.subr.bf16.mxu0 %v2168_v5  ;;  %2046 = vmatprep.subr.bf16.mxu1 %v2168_v5  ;;  %v2177_v16 = vld [vmem:[%s2552_s26 + $0x8] sm:$0xff]   ;;  %v2179_v18 = vld [vmem:[%s2552_s26] sm:$0xff]   ;;  %v2191_v24 = vld [vmem:[%s2537_s7 + $0x90] ss:$8 sps:$4 sm:$0xff]  }
  0x70   : > { %773 = vmatprep.mubr.bf16.mxu1 %v2185_v13  ;;  %v2192_v25 = vld [vmem:[%s2537_s7 + $0x24] ss:$8 sps:$4 sm:$0xff]   ;;  %v2196_v27 = vld [vmem:[%s2537_s7 + $0x20] ss:$8 sps:$4 sm:$0xff]   ;;  %v2198_v29 = vld [vmem:[%s2537_s7 + $0x34] ss:$8 sps:$4 sm:$0xff]  }
  0x71   : > { %v2194_v26 = vld [vmem:[%s2537_s7 + $0xa4] ss:$8 sps:$4 sm:$0xff]   ;;  %v2197_v28 = vld [vmem:[%s2537_s7 + $0xa0] ss:$8 sps:$4 sm:$0xff]   ;;  %v2200_v30 = vld [vmem:[%s2537_s7 + $0xb4] ss:$8 sps:$4 sm:$0xff]  }
  0x72   : > { %1845 = vmatpush3.bf16.msra.mxu0 %v2169_v6  ;;  %2054 = vmatpush3.bf16.msra.mxu1 %v2169_v6  ;;  %v2202_v31 = vld [vmem:[%s2537_s7 + $0x30] ss:$8 sps:$4 sm:$0xff]   ;;  %v2204_v33 = vld [vmem:[%s2537_s7 + $0x44] ss:$8 sps:$4 sm:$0xff]   ;;  %v2208_v35 = vld [vmem:[%s2537_s7 + $0x40] ss:$8 sps:$4 sm:$0xff]  }
  0x73   : > { %1846 = vmatprep.subr.bf16.mxu0 %v2170_v7  ;;  %2047 = vmatprep.subr.bf16.mxu1 %v2170_v7  ;;  %v2203_v32 = vld [vmem:[%s2537_s7 + $0xb0] ss:$8 sps:$4 sm:$0xff]   ;;  %v2206_v34 = vld [vmem:[%s2537_s7 + $0xc4] ss:$8 sps:$4 sm:$0xff]   ;;  %v2209_v36 = vld [vmem:[%s2537_s7 + $0xc0] ss:$8 sps:$4 sm:$0xff]  }
  0x74   : > { %v2210_v37 = vld [vmem:[%s2537_s7 + $0x54] ss:$8 sps:$4 sm:$0xff]   ;;  %v2214_v39 = vld [vmem:[%s2537_s7 + $0x50] ss:$8 sps:$4 sm:$0xff]   ;;  %v2216_v41 = vld [vmem:[%s2537_s7 + $0x64] ss:$8 sps:$4 sm:$0xff]  }
  0x75   : > { %v2212_v38 = vld [vmem:[%s2537_s7 + $0xd4] ss:$8 sps:$4 sm:$0xff]   ;;  %v2215_v40 = vld [vmem:[%s2537_s7 + $0xd0] ss:$8 sps:$4 sm:$0xff]   ;;  %v2218_v42 = vld [vmem:[%s2537_s7 + $0xe4] ss:$8 sps:$4 sm:$0xff]  }
  0x76   : > { %1847 = vmatpush3.bf16.msra.mxu0 %v2171_v8  ;;  %2055 = vmatpush3.bf16.msra.mxu1 %v2171_v8  ;;  %v2220_v43 = vld [vmem:[%s2537_s7 + $0x60] ss:$8 sps:$4 sm:$0xff]   ;;  %v2222_v45 = vld [vmem:[%s2537_s7 + $0x74] ss:$8 sps:$4 sm:$0xff]   ;;  %v2226_v47 = vld [vmem:[%s2537_s7 + $0x70] ss:$8 sps:$4 sm:$0xff]  }
  0x77   : > { %1848 = vmatprep.subr.bf16.mxu0 %v2172_v9  ;;  %2048 = vmatprep.subr.bf16.mxu1 %v2172_v9  ;;  %v2221_v44 = vld [vmem:[%s2537_s7 + $0xe0] ss:$8 sps:$4 sm:$0xff]   ;;  %v2224_v46 = vld [vmem:[%s2537_s7 + $0xf4] ss:$8 sps:$4 sm:$0xff]   ;;  %v2227_v48 = vld [vmem:[%s2537_s7 + $0xf0] ss:$8 sps:$4 sm:$0xff]  }
  0x78   : > { %v325_v51 = vld [vmem:[#allocation2] sm:$0xff]  ;;  %v326_v61 = vld [vmem:[#allocation2 + $0x8] sm:$0xff]  ;;  %v327_v7 = vld [vmem:[#allocation2 + $0x10] sm:$0xff] }
  0x79   : > { %v341_v53 = vld [vmem:[#allocation2 + $0x80] sm:$0xff]  ;;  %v342_v63 = vld [vmem:[#allocation2 + $0x88] sm:$0xff]  ;;  %v343_v9 = vld [vmem:[#allocation2 + $0x90] sm:$0xff] }
  0x7a   : > { %1849 = vmatpush3.bf16.msra.mxu0 %v2173_v10  ;;  %2056 = vmatpush3.bf16.msra.mxu1 %v2173_v10 }
  0x7b   : > { %1850 = vmatprep.subr.bf16.mxu0 %v2174_v11  ;;  %2049 = vmatprep.subr.bf16.mxu1 %v2174_v11 }
  0x7e   : > { %1851 = vmatpush3.bf16.msra.mxu0 %v2175_v14  ;;  %2057 = vmatpush3.bf16.msra.mxu1 %v2175_v14 }
  0x7f   : > { %1852 = vmatprep.subr.bf16.mxu0 %v2176_v15  ;;  %2050 = vmatprep.subr.bf16.mxu1 %v2176_v15 }
  0x82   : > { %1853 = vmatpush3.bf16.msra.mxu0 %v2177_v16  ;;  %2058 = vmatpush3.bf16.msra.mxu1 %v2177_v16 }
  0x83   : > { %1854 = vmatprep.subr.bf16.mxu0 %v2178_v17  ;;  %2051 = vmatprep.subr.bf16.mxu1 %v2178_v17  ;;  %v328_v17 = vld [vmem:[#allocation2 + $0x18] sm:$0xff] }
  0x86   : > { %1855 = vmatpush3.bf16.msra.mxu0 %v2179_v18  ;;  %2059 = vmatpush3.bf16.msra.mxu1 %v2179_v18 }
  0x89   : > { %710 = vmatmul.mubr.bf16.vlgmr.msra.gmra.mxu0 %v2180_v19  ;;  %774 = vmatmul.mubr.bf16.vlgmr.msra.gmra.mxu1 %v2183_v20  ;;  %v344_v19 = vld [vmem:[#allocation2 + $0x98] sm:$0xff] }
  0x8a   : > { %717 = vmatprep.mubr.bf16.mxu0 %v2186_v21  ;;  %781 = vmatprep.mubr.bf16.mxu1 %v2188_v22 }
  0x91   : > { %718 = vmatmul.mubr.bf16.gmra.mxu0 %v2190_v23  ;;  %782 = vmatmul.mubr.bf16.gmra.mxu1 %v2191_v24 }
  0x92   : > { %725 = vmatprep.mubr.bf16.mxu0 %v2192_v25  ;;  %789 = vmatprep.mubr.bf16.mxu1 %v2194_v26 }
  0x99   : > { %726 = vmatmul.mubr.bf16.gmra.mxu0 %v2196_v27  ;;  %790 = vmatmul.mubr.bf16.gmra.mxu1 %v2197_v28  ;;  %v329_v27 = vld [vmem:[#allocation2 + $0x20] sm:$0xff] }
  0x9a   : > { %733 = vmatprep.mubr.bf16.mxu0 %v2198_v29  ;;  %797 = vmatprep.mubr.bf16.mxu1 %v2200_v30  ;;  %v345_v29 = vld [vmem:[#allocation2 + $0xa0] sm:$0xff] }
  0xa1   : > { %734 = vmatmul.mubr.bf16.gmra.mxu0 %v2202_v31  ;;  %798 = vmatmul.mubr.bf16.gmra.mxu1 %v2203_v32 }
  0xa2   : > { %741 = vmatprep.mubr.bf16.mxu0 %v2204_v33  ;;  %805 = vmatprep.mubr.bf16.mxu1 %v2206_v34 }
  0xa9   : > { %742 = vmatmul.mubr.bf16.gmra.mxu0 %v2208_v35  ;;  %806 = vmatmul.mubr.bf16.gmra.mxu1 %v2209_v36 }
  0xaa   : > { %749 = vmatprep.mubr.bf16.mxu0 %v2210_v37  ;;  %813 = vmatprep.mubr.bf16.mxu1 %v2212_v38  ;;  %v330_v37 = vld [vmem:[#allocation2 + $0x28] sm:$0xff] }
  0xb1   : > { %750 = vmatmul.mubr.bf16.gmra.mxu0 %v2214_v39  ;;  %814 = vmatmul.mubr.bf16.gmra.mxu1 %v2215_v40  ;;  %v346_v39 = vld [vmem:[#allocation2 + $0xa8] sm:$0xff] }
  0xb2   : > { %757 = vmatprep.mubr.bf16.mxu0 %v2216_v41  ;;  %821 = vmatprep.mubr.bf16.mxu1 %v2218_v42 }
  0xb9   : > { %758 = vmatmul.mubr.bf16.gmra.mxu0 %v2220_v43  ;;  %822 = vmatmul.mubr.bf16.gmra.mxu1 %v2221_v44 }
  0xba   : > { %765 = vmatprep.mubr.bf16.mxu0 %v2222_v45  ;;  %829 = vmatprep.mubr.bf16.mxu1 %v2224_v46 }
  0xc1   : > { %766 = vmatmul.mubr.bf16.gmra.mxu0 %v2226_v47  ;;  %830 = vmatmul.mubr.bf16.gmra.mxu1 %v2227_v48  ;;  %v331_v47 = vld [vmem:[#allocation2 + $0x30] sm:$0xff] }
 0x149   : > { %v1856_v49 = vpop.f32.mrf.mxu0  ;;  %v1904_v50 = vpop.f32.mrf.mxu1 }
 0x14b   : > { %v1857_v52 = vpop.f32.mrf.mxu0  ;;  %v1905_v54 = vpop.f32.mrf.mxu1 }
 0x14c   : > { %v1858_v55 = vadd.f32 %v1857_v52, %v1856_v49  ;;  %v1906_v56 = vadd.f32 %v1905_v54, %v1904_v50  ;;  %v347_v49 = vld [vmem:[#allocation2 + $0xb0] sm:$0xff] }
 0x14d   : > { %v1859_v57 = vpop.f32.mrf.mxu0  ;;  %v1907_v58 = vpop.f32.mrf.mxu1 }
 0x14e   : > { %v838_v59 = vadd.f32 %v1858_v55, %v325_v51  ;;  %v854_v60 = vadd.f32 %v1906_v56, %v341_v53 }
 0x14f   : > { %v1860_v62 = vpop.f32.mrf.mxu0  ;;  %v1908_v0 = vpop.f32.mrf.mxu1 }
 0x150   : > { %871 = vst.msk [vmem:[#allocation2] sm:$0xff] %vm870_vm1, %v838_v59  ;;  %887 = vst.msk [vmem:[#allocation2 + $0x80] sm:$0xff] %vm870_vm1, %v854_v60  ;;  %v1861_v1 = vadd.f32 %v1860_v62, %v1859_v57  ;;  %v1909_v2 = vadd.f32 %v1908_v0, %v1907_v58  ;;  %v332_v57 = vld [vmem:[#allocation2 + $0x38] sm:$0xff] }
 0x151   : > { %v1862_v3 = vpop.f32.mrf.mxu0  ;;  %v1910_v4 = vpop.f32.mrf.mxu1  ;;  %v348_v59 = vld [vmem:[#allocation2 + $0xb8] sm:$0xff] }
 0x152   : > { %v839_v5 = vadd.f32 %v1861_v1, %v326_v61  ;;  %v855_v6 = vadd.f32 %v1909_v2, %v342_v63 }
 0x153   : > { %v1863_v8 = vpop.f32.mrf.mxu0  ;;  %v1911_v10 = vpop.f32.mrf.mxu1 }
 0x154   : > { %872 = vst.msk [vmem:[#allocation2 + $0x8] sm:$0xff] %vm870_vm1, %v839_v5  ;;  %888 = vst.msk [vmem:[#allocation2 + $0x88] sm:$0xff] %vm870_vm1, %v855_v6  ;;  %v1864_v11 = vadd.f32 %v1863_v8, %v1862_v3  ;;  %v1912_v12 = vadd.f32 %v1911_v10, %v1910_v4  ;;  %v333_v3 = vld [vmem:[#allocation2 + $0x40] sm:$0xff] }
 0x155   : > { %v1865_v13 = vpop.f32.mrf.mxu0  ;;  %v1913_v14 = vpop.f32.mrf.mxu1  ;;  %v349_v5 = vld [vmem:[#allocation2 + $0xc0] sm:$0xff] }
 0x156   : > { %v840_v15 = vadd.f32 %v1864_v11, %v327_v7  ;;  %v856_v16 = vadd.f32 %v1912_v12, %v343_v9 }
 0x157   : > { %v1866_v18 = vpop.f32.mrf.mxu0  ;;  %v1914_v20 = vpop.f32.mrf.mxu1 }
 0x158   : > { %873 = vst.msk [vmem:[#allocation2 + $0x10] sm:$0xff] %vm870_vm1, %v840_v15  ;;  %889 = vst.msk [vmem:[#allocation2 + $0x90] sm:$0xff] %vm870_vm1, %v856_v16  ;;  %v1867_v21 = vadd.f32 %v1866_v18, %v1865_v13  ;;  %v1915_v22 = vadd.f32 %v1914_v20, %v1913_v14  ;;  %v334_v13 = vld [vmem:[#allocation2 + $0x48] sm:$0xff] }
 0x159   : > { %v1868_v23 = vpop.f32.mrf.mxu0  ;;  %v1916_v24 = vpop.f32.mrf.mxu1  ;;  %v350_v15 = vld [vmem:[#allocation2 + $0xc8] sm:$0xff] }
 0x15a   : > { %v841_v25 = vadd.f32 %v1867_v21, %v328_v17  ;;  %v857_v26 = vadd.f32 %v1915_v22, %v344_v19 }
 0x15b   : > { %v1869_v28 = vpop.f32.mrf.mxu0  ;;  %v1917_v30 = vpop.f32.mrf.mxu1 }
 0x15c   : > { %874 = vst.msk [vmem:[#allocation2 + $0x18] sm:$0xff] %vm870_vm1, %v841_v25  ;;  %890 = vst.msk [vmem:[#allocation2 + $0x98] sm:$0xff] %vm870_vm1, %v857_v26  ;;  %v1870_v31 = vadd.f32 %v1869_v28, %v1868_v23  ;;  %v1918_v32 = vadd.f32 %v1917_v30, %v1916_v24  ;;  %v335_v23 = vld [vmem:[#allocation2 + $0x50] sm:$0xff] }
 0x15d   : > { %v1871_v33 = vpop.f32.mrf.mxu0  ;;  %v1919_v34 = vpop.f32.mrf.mxu1  ;;  %v351_v25 = vld [vmem:[#allocation2 + $0xd0] sm:$0xff] }
 0x15e   : > { %v842_v35 = vadd.f32 %v1870_v31, %v329_v27  ;;  %v858_v36 = vadd.f32 %v1918_v32, %v345_v29 }
 0x15f   : > { %v1872_v38 = vpop.f32.mrf.mxu0  ;;  %v1920_v40 = vpop.f32.mrf.mxu1 }
 0x160   : > { %875 = vst.msk [vmem:[#allocation2 + $0x20] sm:$0xff] %vm870_vm1, %v842_v35  ;;  %891 = vst.msk [vmem:[#allocation2 + $0xa0] sm:$0xff] %vm870_vm1, %v858_v36  ;;  %v1873_v41 = vadd.f32 %v1872_v38, %v1871_v33  ;;  %v1921_v42 = vadd.f32 %v1920_v40, %v1919_v34  ;;  %v336_v33 = vld [vmem:[#allocation2 + $0x58] sm:$0xff] }
 0x161   : > { %v1874_v43 = vpop.f32.mrf.mxu0  ;;  %v1922_v44 = vpop.f32.mrf.mxu1  ;;  %v352_v35 = vld [vmem:[#allocation2 + $0xd8] sm:$0xff] }
 0x162   : > { %v843_v45 = vadd.f32 %v1873_v41, %v330_v37  ;;  %v859_v46 = vadd.f32 %v1921_v42, %v346_v39 }
 0x163   : > { %v1875_v48 = vpop.f32.mrf.mxu0  ;;  %v1923_v50 = vpop.f32.mrf.mxu1 }
 0x164   : > { %876 = vst.msk [vmem:[#allocation2 + $0x28] sm:$0xff] %vm870_vm1, %v843_v45  ;;  %892 = vst.msk [vmem:[#allocation2 + $0xa8] sm:$0xff] %vm870_vm1, %v859_v46  ;;  %v1876_v51 = vadd.f32 %v1875_v48, %v1874_v43  ;;  %v1924_v52 = vadd.f32 %v1923_v50, %v1922_v44  ;;  %v337_v43 = vld [vmem:[#allocation2 + $0x60] sm:$0xff] }
 0x165   : > { %v1877_v53 = vpop.f32.mrf.mxu0  ;;  %v1925_v54 = vpop.f32.mrf.mxu1  ;;  %v353_v45 = vld [vmem:[#allocation2 + $0xe0] sm:$0xff] }
 0x166   : > { %v844_v55 = vadd.f32 %v1876_v51, %v331_v47  ;;  %v860_v56 = vadd.f32 %v1924_v52, %v347_v49 }
 0x167   : > { %v1878_v58 = vpop.f32.mrf.mxu0  ;;  %v1926_v60 = vpop.f32.mrf.mxu1 }
 0x168   : > { %877 = vst.msk [vmem:[#allocation2 + $0x30] sm:$0xff] %vm870_vm1, %v844_v55  ;;  %893 = vst.msk [vmem:[#allocation2 + $0xb0] sm:$0xff] %vm870_vm1, %v860_v56  ;;  %v1879_v61 = vadd.f32 %v1878_v58, %v1877_v53  ;;  %v1927_v62 = vadd.f32 %v1926_v60, %v1925_v54  ;;  %v338_v53 = vld [vmem:[#allocation2 + $0x68] sm:$0xff] }
 0x169   : > { %v1880_v63 = vpop.f32.mrf.mxu0  ;;  %v1928_v0 = vpop.f32.mrf.mxu1  ;;  %v354_v55 = vld [vmem:[#allocation2 + $0xe8] sm:$0xff] }
 0x16a   : > { %v845_v1 = vadd.f32 %v1879_v61, %v332_v57  ;;  %v861_v2 = vadd.f32 %v1927_v62, %v348_v59 }
 0x16b   : > { %v1881_v4 = vpop.f32.mrf.mxu0  ;;  %v1929_v6 = vpop.f32.mrf.mxu1 }
 0x16c   : > { %878 = vst.msk [vmem:[#allocation2 + $0x38] sm:$0xff] %vm870_vm1, %v845_v1  ;;  %894 = vst.msk [vmem:[#allocation2 + $0xb8] sm:$0xff] %vm870_vm1, %v861_v2  ;;  %v1882_v7 = vadd.f32 %v1881_v4, %v1880_v63  ;;  %v1930_v8 = vadd.f32 %v1929_v6, %v1928_v0  ;;  %v339_v63 = vld [vmem:[#allocation2 + $0x70] sm:$0xff] }
 0x16d   : > { %v1883_v9 = vpop.f32.mrf.mxu0  ;;  %v1931_v10 = vpop.f32.mrf.mxu1  ;;  %v355_v1 = vld [vmem:[#allocation2 + $0xf0] sm:$0xff] }
 0x16e   : > { %v846_v11 = vadd.f32 %v1882_v7, %v333_v3  ;;  %v862_v12 = vadd.f32 %v1930_v8, %v349_v5 }
 0x16f   : > { %v1884_v14 = vpop.f32.mrf.mxu0  ;;  %v1932_v16 = vpop.f32.mrf.mxu1 }
 0x170   : > { %879 = vst.msk [vmem:[#allocation2 + $0x40] sm:$0xff] %vm870_vm1, %v846_v11  ;;  %895 = vst.msk [vmem:[#allocation2 + $0xc0] sm:$0xff] %vm870_vm1, %v862_v12  ;;  %v1885_v17 = vadd.f32 %v1884_v14, %v1883_v9  ;;  %v1933_v18 = vadd.f32 %v1932_v16, %v1931_v10  ;;  %v340_v9 = vld [vmem:[#allocation2 + $0x78] sm:$0xff] }
 0x171   : > { %v1886_v19 = vpop.f32.mrf.mxu0  ;;  %v1934_v20 = vpop.f32.mrf.mxu1  ;;  %v356_v11 = vld [vmem:[#allocation2 + $0xf8] sm:$0xff] }
 0x172   : > { %v847_v21 = vadd.f32 %v1885_v17, %v334_v13  ;;  %v863_v22 = vadd.f32 %v1933_v18, %v350_v15 }
 0x173   : > { %v1887_v24 = vpop.f32.mrf.mxu0  ;;  %v1935_v26 = vpop.f32.mrf.mxu1 }
 0x174   : > { %880 = vst.msk [vmem:[#allocation2 + $0x48] sm:$0xff] %vm870_vm1, %v847_v21  ;;  %896 = vst.msk [vmem:[#allocation2 + $0xc8] sm:$0xff] %vm870_vm1, %v863_v22  ;;  %v1888_v27 = vadd.f32 %v1887_v24, %v1886_v19  ;;  %v1936_v28 = vadd.f32 %v1935_v26, %v1934_v20 }
 0x175   : > { %v1889_v29 = vpop.f32.mrf.mxu0  ;;  %v1937_v30 = vpop.f32.mrf.mxu1 }
 0x176   : > { %v848_v31 = vadd.f32 %v1888_v27, %v335_v23  ;;  %v864_v32 = vadd.f32 %v1936_v28, %v351_v25 }
 0x177   : > { %v1890_v34 = vpop.f32.mrf.mxu0  ;;  %v1938_v36 = vpop.f32.mrf.mxu1 }
 0x178   : > { %881 = vst.msk [vmem:[#allocation2 + $0x50] sm:$0xff] %vm870_vm1, %v848_v31  ;;  %897 = vst.msk [vmem:[#allocation2 + $0xd0] sm:$0xff] %vm870_vm1, %v864_v32  ;;  %v1891_v37 = vadd.f32 %v1890_v34, %v1889_v29  ;;  %v1939_v38 = vadd.f32 %v1938_v36, %v1937_v30 }
 0x179   : > { %v1892_v39 = vpop.f32.mrf.mxu0  ;;  %v1940_v40 = vpop.f32.mrf.mxu1 }
 0x17a   : > { %v849_v41 = vadd.f32 %v1891_v37, %v336_v33  ;;  %v865_v42 = vadd.f32 %v1939_v38, %v352_v35 }
 0x17b   : > { %v1893_v44 = vpop.f32.mrf.mxu0  ;;  %v1941_v46 = vpop.f32.mrf.mxu1 }
 0x17c   : > { %882 = vst.msk [vmem:[#allocation2 + $0x58] sm:$0xff] %vm870_vm1, %v849_v41  ;;  %898 = vst.msk [vmem:[#allocation2 + $0xd8] sm:$0xff] %vm870_vm1, %v865_v42  ;;  %v1894_v47 = vadd.f32 %v1893_v44, %v1892_v39  ;;  %v1942_v48 = vadd.f32 %v1941_v46, %v1940_v40 }
 0x17d   : > { %v1895_v49 = vpop.f32.mrf.mxu0  ;;  %v1943_v50 = vpop.f32.mrf.mxu1 }
 0x17e   : > { %v850_v51 = vadd.f32 %v1894_v47, %v337_v43  ;;  %v866_v52 = vadd.f32 %v1942_v48, %v353_v45 }
 0x17f   : > { %v1896_v54 = vpop.f32.mrf.mxu0  ;;  %v1944_v56 = vpop.f32.mrf.mxu1 }
 0x180   : > { %883 = vst.msk [vmem:[#allocation2 + $0x60] sm:$0xff] %vm870_vm1, %v850_v51  ;;  %899 = vst.msk [vmem:[#allocation2 + $0xe0] sm:$0xff] %vm870_vm1, %v866_v52  ;;  %v1897_v57 = vadd.f32 %v1896_v54, %v1895_v49  ;;  %v1945_v58 = vadd.f32 %v1944_v56, %v1943_v50 }
 0x181   : > { %v1898_v59 = vpop.f32.mrf.mxu0  ;;  %v1946_v60 = vpop.f32.mrf.mxu1 }
 0x182   : > { %v851_v61 = vadd.f32 %v1897_v57, %v338_v53  ;;  %v867_v62 = vadd.f32 %v1945_v58, %v354_v55 }
 0x183   : > { %v1899_v0 = vpop.f32.mrf.mxu0  ;;  %v1947_v2 = vpop.f32.mrf.mxu1 }
 0x184   : > { %884 = vst.msk [vmem:[#allocation2 + $0x68] sm:$0xff] %vm870_vm1, %v851_v61  ;;  %900 = vst.msk [vmem:[#allocation2 + $0xe8] sm:$0xff] %vm870_vm1, %v867_v62  ;;  %v1900_v3 = vadd.f32 %v1899_v0, %v1898_v59  ;;  %v1948_v4 = vadd.f32 %v1947_v2, %v1946_v60 }
 0x185   : > { %v1901_v5 = vpop.f32.mrf.mxu0  ;;  %v1949_v6 = vpop.f32.mrf.mxu1 }
 0x186   : > { %v852_v7 = vadd.f32 %v1900_v3, %v339_v63  ;;  %v868_v8 = vadd.f32 %v1948_v4, %v355_v1 }
 0x187   : > { %v1902_v10 = vpop.f32.mrf.mxu0  ;;  %v1950_v12 = vpop.f32.mrf.mxu1 }
 0x188   : > { %885 = vst.msk [vmem:[#allocation2 + $0x70] sm:$0xff] %vm870_vm1, %v852_v7  ;;  %901 = vst.msk [vmem:[#allocation2 + $0xf0] sm:$0xff] %vm870_vm1, %v868_v8  ;;  %v1903_v13 = vadd.f32 %v1902_v10, %v1901_v5  ;;  %v1951_v14 = vadd.f32 %v1950_v12, %v1949_v6  ;;  %906 = sbr.rel (%p1644_p7) target bundleno = 637 (0x27d), region = 56 }
 0x18a   : > { %v853_v15 = vadd.f32 %v1903_v13, %v340_v9  ;;  %v869_v16 = vadd.f32 %v1951_v14, %v356_v11 }
 0x18c   : > { %886 = vst.msk [vmem:[#allocation2 + $0x78] sm:$0xff] %vm870_vm1, %v853_v15  ;;  %902 = vst.msk [vmem:[#allocation2 + $0xf8] sm:$0xff] %vm870_vm1, %v869_v16 }
 0x18d   : > { %v942_v17 = vld [vmem:[#allocation5 + $0x18] sm:$0xff]  ;;  %v941_v18 = vld [vmem:[#allocation5 + $0x10] sm:$0xff]  ;;  %v940_v19 = vld [vmem:[#allocation5 + $0x8] sm:$0xff] }
 0x18e   : > { %1988 = vmatprep.subr.mxu0 %v942_v17  ;;  %2060 = vmatprep.subr.mxu1 %v942_v17  ;;  %v939_v20 = vld [vmem:[#allocation5] sm:$0xff]  ;;  %v908_v23 = vld [vmem:[#allocation2 + $0x8] sm:$0xff]  ;;  %v909_v25 = vld [vmem:[#allocation2 + $0x10] sm:$0xff] }
 0x18f   : > { %1989 = vmatpush3.msra.mxu0 %v942_v17  ;;  %2064 = vmatpush3.msra.mxu1 %v942_v17  ;;  %v907_v21 = vld [vmem:[#allocation2] sm:$0xff]  ;;  %v924_v24 = vld [vmem:[#allocation2 + $0x88] sm:$0xff]  ;;  %v925_v26 = vld [vmem:[#allocation2 + $0x90] sm:$0xff] }
 0x190   : > { %1990 = vmatprep.subr.mxu0 %v941_v18  ;;  %2061 = vmatprep.subr.mxu1 %v941_v18  ;;  %v923_v22 = vld [vmem:[#allocation2 + $0x80] sm:$0xff]  ;;  %v910_v27 = vld [vmem:[#allocation2 + $0x18] sm:$0xff]  ;;  %v912_v31 = vld [vmem:[#allocation2 + $0x28] sm:$0xff] }
 0x191   : > { %1991 = vmatpush3.msra.mxu0 %v941_v18  ;;  %2065 = vmatpush3.msra.mxu1 %v941_v18  ;;  %v926_v28 = vld [vmem:[#allocation2 + $0x98] sm:$0xff]  ;;  %v911_v29 = vld [vmem:[#allocation2 + $0x20] sm:$0xff]  ;;  %v928_v32 = vld [vmem:[#allocation2 + $0xa8] sm:$0xff] }
 0x192   : > { %1992 = vmatprep.subr.mxu0 %v940_v19  ;;  %2062 = vmatprep.subr.mxu1 %v940_v19  ;;  %v927_v30 = vld [vmem:[#allocation2 + $0xa0] sm:$0xff]  ;;  %v913_v33 = vld [vmem:[#allocation2 + $0x30] sm:$0xff]  ;;  %v914_v35 = vld [vmem:[#allocation2 + $0x38] sm:$0xff] }
 0x193   : > { %1993 = vmatpush3.msra.mxu0 %v940_v19  ;;  %2066 = vmatpush3.msra.mxu1 %v940_v19  ;;  %v929_v34 = vld [vmem:[#allocation2 + $0xb0] sm:$0xff]  ;;  %v930_v36 = vld [vmem:[#allocation2 + $0xb8] sm:$0xff]  ;;  %v915_v37 = vld [vmem:[#allocation2 + $0x40] sm:$0xff] }
 0x194   : > { %1994 = vmatprep.subr.mxu0 %v939_v20  ;;  %2063 = vmatprep.subr.mxu1 %v939_v20  ;;  %v931_v38 = vld [vmem:[#allocation2 + $0xc0] sm:$0xff]  ;;  %v916_v39 = vld [vmem:[#allocation2 + $0x48] sm:$0xff]  ;;  %v917_v41 = vld [vmem:[#allocation2 + $0x50] sm:$0xff] }
 0x195   : > { %1995 = vmatpush3.msra.mxu0 %v939_v20  ;;  %2067 = vmatpush3.msra.mxu1 %v939_v20  ;;  %v932_v40 = vld [vmem:[#allocation2 + $0xc8] sm:$0xff]  ;;  %v933_v42 = vld [vmem:[#allocation2 + $0xd0] sm:$0xff]  ;;  %v918_v43 = vld [vmem:[#allocation2 + $0x58] sm:$0xff] }
 0x196   : > { %1996 = vmatprep.mubr.msk.f32.mxu0 %vm870_vm1, %v907_v21  ;;  %2020 = vmatprep.mubr.msk.f32.mxu1 %vm870_vm1, %v923_v22  ;;  %v934_v44 = vld [vmem:[#allocation2 + $0xd8] sm:$0xff]  ;;  %v919_v45 = vld [vmem:[#allocation2 + $0x60] sm:$0xff]  ;;  %v920_v47 = vld [vmem:[#allocation2 + $0x68] sm:$0xff] }
 0x197   : > { %1997 = vmatmul.mubr.msk.f32.vlgmr.msra.gmra.mxu0 %vm870_vm1, %v908_v23  ;;  %2021 = vmatmul.mubr.msk.f32.vlgmr.msra.gmra.mxu1 %vm870_vm1, %v924_v24  ;;  %v935_v46 = vld [vmem:[#allocation2 + $0xe0] sm:$0xff]  ;;  %v936_v48 = vld [vmem:[#allocation2 + $0xe8] sm:$0xff]  ;;  %v921_v49 = vld [vmem:[#allocation2 + $0x70] sm:$0xff] }
 0x198   : > { %1999 = vmatprep.mubr.msk.f32.mxu0 %vm870_vm1, %v909_v25  ;;  %2023 = vmatprep.mubr.msk.f32.mxu1 %vm870_vm1, %v925_v26  ;;  %v937_v50 = vld [vmem:[#allocation2 + $0xf0] sm:$0xff]  ;;  %v922_v51 = vld [vmem:[#allocation2 + $0x78] sm:$0xff]  ;;  %v2705_v53 = vld [vmem:[#allocation7] ss:$0 sm:$0xff] }
 0x199   : > { %v938_v52 = vld [vmem:[#allocation2 + $0xf8] sm:$0xff] }
 0x19b   : > { %2000 = vmatmul.mubr.msk.f32.gmra.mxu0 %vm870_vm1, %v910_v27  ;;  %2024 = vmatmul.mubr.msk.f32.gmra.mxu1 %vm870_vm1, %v926_v28 }
 0x19c   : > { %2002 = vmatprep.mubr.msk.f32.mxu0 %vm870_vm1, %v911_v29  ;;  %2026 = vmatprep.mubr.msk.f32.mxu1 %vm870_vm1, %v927_v30 }
 0x19f   : > { %2003 = vmatmul.mubr.msk.f32.gmra.mxu0 %vm870_vm1, %v912_v31  ;;  %2027 = vmatmul.mubr.msk.f32.gmra.mxu1 %vm870_vm1, %v928_v32 }
 0x1a0   : > { %2005 = vmatprep.mubr.msk.f32.mxu0 %vm870_vm1, %v913_v33  ;;  %2029 = vmatprep.mubr.msk.f32.mxu1 %vm870_vm1, %v929_v34 }
 0x1a3   : > { %2006 = vmatmul.mubr.msk.f32.gmra.mxu0 %vm870_vm1, %v914_v35  ;;  %2030 = vmatmul.mubr.msk.f32.gmra.mxu1 %vm870_vm1, %v930_v36 }
 0x1a4   : > { %2008 = vmatprep.mubr.msk.f32.mxu0 %vm870_vm1, %v915_v37  ;;  %2032 = vmatprep.mubr.msk.f32.mxu1 %vm870_vm1, %v931_v38 }
 0x1a7   : > { %2009 = vmatmul.mubr.msk.f32.gmra.mxu0 %vm870_vm1, %v916_v39  ;;  %2033 = vmatmul.mubr.msk.f32.gmra.mxu1 %vm870_vm1, %v932_v40 }
 0x1a8   : > { %2011 = vmatprep.mubr.msk.f32.mxu0 %vm870_vm1, %v917_v41  ;;  %2035 = vmatprep.mubr.msk.f32.mxu1 %vm870_vm1, %v933_v42 }
 0x1ab   : > { %2012 = vmatmul.mubr.msk.f32.gmra.mxu0 %vm870_vm1, %v918_v43  ;;  %2036 = vmatmul.mubr.msk.f32.gmra.mxu1 %vm870_vm1, %v934_v44 }
 0x1ac   : > { %2014 = vmatprep.mubr.msk.f32.mxu0 %vm870_vm1, %v919_v45  ;;  %2038 = vmatprep.mubr.msk.f32.mxu1 %vm870_vm1, %v935_v46 }
 0x1af   : > { %2015 = vmatmul.mubr.msk.f32.gmra.mxu0 %vm870_vm1, %v920_v47  ;;  %2039 = vmatmul.mubr.msk.f32.gmra.mxu1 %vm870_vm1, %v936_v48 }
 0x1b0   : > { %2017 = vmatprep.mubr.msk.f32.mxu0 %vm870_vm1, %v921_v49  ;;  %2041 = vmatprep.mubr.msk.f32.mxu1 %vm870_vm1, %v937_v50 }
 0x1b3   : > { %2018 = vmatmul.mubr.msk.f32.gmra.mxu0 %vm870_vm1, %v922_v51  ;;  %2042 = vmatmul.mubr.msk.f32.gmra.mxu1 %vm870_vm1, %v938_v52 }
 0x257   : > { %v1998_v54 = vpop.f32.mrf.mxu0  ;;  %v2022_v55 = vpop.f32.mrf.mxu1 }
 0x258   : > { %v1118_v56 = vadd.f32 %v1998_v54, %v2705_v53  ;;  %v1198_v57 = vadd.f32 %v2022_v55, %v2705_v53 }
 0x259   : > { %v1112_v58 = vpop.f32.mrf.mxu0  ;;  %v1192_v59 = vpop.f32.mrf.mxu1 }
 0x25a   : > { %v1113_v60 = vadd.f32 %v2705_v53, %v1112_v58  ;;  %v1193_v61 = vadd.f32 %v2705_v53, %v1192_v59  ;;  %v1272_v0 = vmax.f32 %v1118_v56, 0.0  ;;  %v1288_v1 = vmax.f32 %v1198_v57, 0.0 }
 0x25b   : > { %v2001_v62 = vpop.f32.mrf.mxu0  ;;  %v2025_v63 = vpop.f32.mrf.mxu1 }
 0x25c   : > { %v1271_v2 = vmax.f32 %v1113_v60, 0.0  ;;  %v1287_v3 = vmax.f32 %v1193_v61, 0.0  ;;  %v1128_v4 = vadd.f32 %v2001_v62, %v2705_v53  ;;  %v1208_v5 = vadd.f32 %v2025_v63, %v2705_v53 }
 0x25d   : > { %v1122_v6 = vpop.f32.mrf.mxu0  ;;  %v1202_v7 = vpop.f32.mrf.mxu1 }
 0x25e   : > { %v1748_v8 = vpack.c.bf16 %v1272_v0, %v1271_v2  ;;  %v1788_v9 = vpack.c.bf16 %v1288_v1, %v1287_v3  ;;  %v1123_v10 = vadd.f32 %v2705_v53, %v1122_v6  ;;  %v1203_v11 = vadd.f32 %v2705_v53, %v1202_v7 }
 0x25f   : > { %v2004_v12 = vpop.f32.mrf.mxu0  ;;  %v2028_v13 = vpop.f32.mrf.mxu1  ;;  %v1274_v16 = vmax.f32 %v1128_v4, 0.0  ;;  %v1290_v17 = vmax.f32 %v1208_v5, 0.0 }
 0x260   : > { %1749 = vst [vmem:[%s2557_s25] sm:$0xff] %v1748_v8   ;;  %1832 = vst [vmem:[%s2557_s25 + $0x40] sm:$0xff] %v1788_v9   ;;  %v1138_v14 = vadd.f32 %v2004_v12, %v2705_v53  ;;  %v1218_v15 = vadd.f32 %v2028_v13, %v2705_v53  ;;  %v1273_v18 = vmax.f32 %v1123_v10, 0.0  ;;  %v1289_v19 = vmax.f32 %v1203_v11, 0.0 }
 0x261   : > { %v1132_v20 = vpop.f32.mrf.mxu0  ;;  %v1212_v21 = vpop.f32.mrf.mxu1 }
 0x262   : > { %v1133_v22 = vadd.f32 %v2705_v53, %v1132_v20  ;;  %v1213_v23 = vadd.f32 %v2705_v53, %v1212_v21  ;;  %v1753_v24 = vpack.c.bf16 %v1274_v16, %v1273_v18  ;;  %v1793_v25 = vpack.c.bf16 %v1290_v17, %v1289_v19 }
 0x263   : > { %v2007_v26 = vpop.f32.mrf.mxu0  ;;  %v2031_v27 = vpop.f32.mrf.mxu1  ;;  %v1276_v28 = vmax.f32 %v1138_v14, 0.0  ;;  %v1292_v29 = vmax.f32 %v1218_v15, 0.0 }
 0x264   : > { %v1275_v30 = vmax.f32 %v1133_v22, 0.0  ;;  %v1291_v31 = vmax.f32 %v1213_v23, 0.0  ;;  %1825 = vst [vmem:[%s2557_s25 + $0x8] sm:$0xff] %v1753_v24   ;;  %1833 = vst [vmem:[%s2557_s25 + $0x48] sm:$0xff] %v1793_v25   ;;  %v1148_v32 = vadd.f32 %v2007_v26, %v2705_v53  ;;  %v1228_v33 = vadd.f32 %v2031_v27, %v2705_v53 }
 0x265   : > { %v1142_v34 = vpop.f32.mrf.mxu0  ;;  %v1222_v35 = vpop.f32.mrf.mxu1 }
 0x266   : > { %v1758_v36 = vpack.c.bf16 %v1276_v28, %v1275_v30  ;;  %v1798_v37 = vpack.c.bf16 %v1292_v29, %v1291_v31  ;;  %v1143_v38 = vadd.f32 %v2705_v53, %v1142_v34  ;;  %v1223_v39 = vadd.f32 %v2705_v53, %v1222_v35 }
 0x267   : > { %v2010_v40 = vpop.f32.mrf.mxu0  ;;  %v2034_v41 = vpop.f32.mrf.mxu1  ;;  %v1278_v44 = vmax.f32 %v1148_v32, 0.0  ;;  %v1294_v45 = vmax.f32 %v1228_v33, 0.0 }
 0x268   : > { %1826 = vst [vmem:[%s2557_s25 + $0x10] sm:$0xff] %v1758_v36   ;;  %1834 = vst [vmem:[%s2557_s25 + $0x50] sm:$0xff] %v1798_v37   ;;  %v1158_v42 = vadd.f32 %v2010_v40, %v2705_v53  ;;  %v1238_v43 = vadd.f32 %v2034_v41, %v2705_v53  ;;  %v1277_v46 = vmax.f32 %v1143_v38, 0.0  ;;  %v1293_v47 = vmax.f32 %v1223_v39, 0.0 }
 0x269   : > { %v1152_v48 = vpop.f32.mrf.mxu0  ;;  %v1232_v49 = vpop.f32.mrf.mxu1 }
 0x26a   : > { %v1153_v50 = vadd.f32 %v2705_v53, %v1152_v48  ;;  %v1233_v51 = vadd.f32 %v2705_v53, %v1232_v49  ;;  %v1763_v52 = vpack.c.bf16 %v1278_v44, %v1277_v46  ;;  %v1803_v54 = vpack.c.bf16 %v1294_v45, %v1293_v47 }
 0x26b   : > { %v2013_v55 = vpop.f32.mrf.mxu0  ;;  %v2037_v56 = vpop.f32.mrf.mxu1  ;;  %v1280_v57 = vmax.f32 %v1158_v42, 0.0  ;;  %v1296_v58 = vmax.f32 %v1238_v43, 0.0 }
 0x26c   : > { %v1279_v59 = vmax.f32 %v1153_v50, 0.0  ;;  %v1295_v60 = vmax.f32 %v1233_v51, 0.0  ;;  %1827 = vst [vmem:[%s2557_s25 + $0x18] sm:$0xff] %v1763_v52   ;;  %1835 = vst [vmem:[%s2557_s25 + $0x58] sm:$0xff] %v1803_v54   ;;  %v1168_v61 = vadd.f32 %v2013_v55, %v2705_v53  ;;  %v1248_v62 = vadd.f32 %v2037_v56, %v2705_v53 }
 0x26d   : > { %v1162_v63 = vpop.f32.mrf.mxu0  ;;  %v1242_v0 = vpop.f32.mrf.mxu1 }
 0x26e   : > { %v1768_v1 = vpack.c.bf16 %v1280_v57, %v1279_v59  ;;  %v1808_v2 = vpack.c.bf16 %v1296_v58, %v1295_v60  ;;  %v1163_v3 = vadd.f32 %v2705_v53, %v1162_v63  ;;  %v1243_v4 = vadd.f32 %v2705_v53, %v1242_v0 }
 0x26f   : > { %v2016_v5 = vpop.f32.mrf.mxu0  ;;  %v2040_v6 = vpop.f32.mrf.mxu1  ;;  %v1282_v9 = vmax.f32 %v1168_v61, 0.0  ;;  %v1298_v10 = vmax.f32 %v1248_v62, 0.0 }
 0x270   : > { %1828 = vst [vmem:[%s2557_s25 + $0x20] sm:$0xff] %v1768_v1   ;;  %1836 = vst [vmem:[%s2557_s25 + $0x60] sm:$0xff] %v1808_v2   ;;  %v1178_v7 = vadd.f32 %v2016_v5, %v2705_v53  ;;  %v1258_v8 = vadd.f32 %v2040_v6, %v2705_v53  ;;  %v1281_v11 = vmax.f32 %v1163_v3, 0.0  ;;  %v1297_v12 = vmax.f32 %v1243_v4, 0.0 }
 0x271   : > { %v1172_v13 = vpop.f32.mrf.mxu0  ;;  %v1252_v14 = vpop.f32.mrf.mxu1 }
 0x272   : > { %v1173_v15 = vadd.f32 %v2705_v53, %v1172_v13  ;;  %v1253_v16 = vadd.f32 %v2705_v53, %v1252_v14  ;;  %v1773_v17 = vpack.c.bf16 %v1282_v9, %v1281_v11  ;;  %v1813_v18 = vpack.c.bf16 %v1298_v10, %v1297_v12 }
 0x273   : > { %v2019_v19 = vpop.f32.mrf.mxu0  ;;  %v2043_v20 = vpop.f32.mrf.mxu1  ;;  %v1284_v21 = vmax.f32 %v1178_v7, 0.0  ;;  %v1300_v22 = vmax.f32 %v1258_v8, 0.0 }
 0x274   : > { %v1283_v23 = vmax.f32 %v1173_v15, 0.0  ;;  %v1299_v24 = vmax.f32 %v1253_v16, 0.0  ;;  %1829 = vst [vmem:[%s2557_s25 + $0x28] sm:$0xff] %v1773_v17   ;;  %1837 = vst [vmem:[%s2557_s25 + $0x68] sm:$0xff] %v1813_v18   ;;  %v1188_v25 = vadd.f32 %v2019_v19, %v2705_v53  ;;  %v1268_v26 = vadd.f32 %v2043_v20, %v2705_v53 }
 0x275   : > { %v1182_v27 = vpop.f32.mrf.mxu0  ;;  %v1262_v28 = vpop.f32.mrf.mxu1 }
 0x276   : > { %v1778_v29 = vpack.c.bf16 %v1284_v21, %v1283_v23  ;;  %v1818_v30 = vpack.c.bf16 %v1300_v22, %v1299_v24  ;;  %v1183_v31 = vadd.f32 %v2705_v53, %v1182_v27  ;;  %v1263_v32 = vadd.f32 %v2705_v53, %v1262_v28 }
 0x277   : > { %v1286_v33 = vmax.f32 %v1188_v25, 0.0  ;;  %v1302_v34 = vmax.f32 %v1268_v26, 0.0 }
 0x278   : > { %1830 = vst [vmem:[%s2557_s25 + $0x30] sm:$0xff] %v1778_v29   ;;  %1838 = vst [vmem:[%s2557_s25 + $0x70] sm:$0xff] %v1818_v30   ;;  %v1285_v35 = vmax.f32 %v1183_v31, 0.0  ;;  %v1301_v36 = vmax.f32 %v1263_v32, 0.0 }
 0x27a   : > { %v1783_v37 = vpack.c.bf16 %v1286_v33, %v1285_v35  ;;  %v1823_v38 = vpack.c.bf16 %v1302_v34, %v1301_v36 }
 0x27c   : > { %1831 = vst [vmem:[%s2557_s25 + $0x38] sm:$0xff] %v1783_v37   ;;  %1839 = vst [vmem:[%s2557_s25 + $0x78] sm:$0xff] %v1823_v38  }
 0x27d PF: > { %s2807_s18 = sld [smem:[#allocation11_spill]]  ;;  %s2810_s15 = smov %s2354_s16 }
 0x27e   : > { %s2809_s20 = sld [smem:[#allocation12_spill]]  ;;  %s2811_s16 = smov %s2358_s17 }
 0x27f   : > { %s2812_s17 = smov %s2526_s28  ;;  %s2813_s19 = smov %s2374_s21 }
 0x280   : > { %s2814_s21 = smov %s2820_s29 }
 0x283   : > { %s18_s22 = sadd.s32 1, %s2807_s18   ;;  %s2808_s18 = sld [smem:[#allocation10_spill]] }
 0x284   : > { %p15_p11 = scmp.ge.s32.totalorder %s18_s22, 6  }
 0x286   :  { %17 = sbr.rel (!%p15_p11) target bundleno = 9 (0x9), region = 95 }
 0x28b   :  { %1485 = vsyncpa [#allocation4], 1 }
 0x28c   :  { %1487 = vsyncpa [#allocation4 + $0x1], 1 }
 0x28d   :  { %1488 = vsyncpa [#allocation6], 1 }

</bundles_post_ra>
